<compile_context>
chip_gen: v7x
topology: tpu7x:2x2x1
jax: 0.10.0
libtpu: 0.0.40
codegen_flags: <defaults>
</compile_context>

<pallas_src>
import math

import jax
import jax.numpy as jnp
from jax.experimental import pallas as pl
from jax.experimental.pallas import tpu as pltpu

N_ACTIONS = 6
RNN_HIDDEN = 32
GRU_N_LAYERS = 1
IN_C, IN_H, IN_W = 10, 5, 7   # conv out: (80, 1, 3) -> flatten = 240
B_TILE = 8                    # envs per grid step (one sublane group)


# ----------------------------- fused Pallas kernel -----------------------------

def _fused_forward_kernel(x_ref, h_ref, wconv_ref, wlin_ref, bias_ref, out_ref):
    f32 = jnp.float32
    B = B_TILE
    H = RNN_HIDDEN

    # ---- hoisted bias loads: one (8,128) tile, then static lane slices ----
    bias = bias_ref[...]
    b1, b2, b3 = bias[0:1, 0:20], bias[1:2, 0:40], bias[2:3, 0:80]
    b_ih, b_hh, b_fc = bias[3:4, 0:96], bias[4:5, 0:96], bias[5:6, 0:N_ACTIONS]

    # ---- observation block (H=5, W=7, B=8, C=10); x[h, w] is a clean (B,C) tile ----
    x = x_ref[...]

    # ---- conv1 + ReLU: 9 taps, one (120,10)@(10,20) dot each ----
    # output rows r = (oy*5 + ox)*B + b
    acc1 = jnp.zeros((15 * B, 20), f32)
    for ky in range(3):
        for kx in range(3):
            lhs = jnp.concatenate(
                [x[oy + ky, ox + kx] for oy in range(3) for ox in range(5)], axis=0)
            acc1 = acc1 + jnp.dot(lhs, wconv_ref[ky * 3 + kx, 0:10, 0:20],
                                  preferred_element_type=f32)
    a1 = jnp.maximum(acc1 + b1, 0.0)                                   # (120, 20)

    # ---- conv2 + ReLU: 9 taps, (24,20)@(20,40); rows r = ox*B + b (oy == 0) ----
    acc2 = jnp.zeros((3 * B, 40), f32)
    for ky in range(3):
        for kx in range(3):
            base = (ky * 5 + kx) * B            # a1 rows for positions (ky, kx..kx+2)
            acc2 = acc2 + jnp.dot(a1[base:base + 3 * B, :],
                                  wconv_ref[9 + ky * 3 + kx, 0:20, 0:40],
                                  preferred_element_type=f32)
    a2 = jnp.maximum(acc2 + b2, 0.0)                                   # (24, 40)

    # ---- conv3 (padding=1) + ReLU: only ky=1 taps hit non-zero rows; 3 dots ----
    zpad = jnp.zeros((B, 40), f32)
    lhs3 = (jnp.concatenate([zpad, a2[0:2 * B, :]], axis=0),   # kx=0 -> input col ox-1
            a2,                                                # kx=1 -> input col ox
            jnp.concatenate([a2[B:3 * B, :], zpad], axis=0))   # kx=2 -> input col ox+1
    acc3 = jnp.zeros((3 * B, 80), f32)
    for kx in range(3):
        acc3 = acc3 + jnp.dot(lhs3[kx], wconv_ref[18 + kx],
                              preferred_element_type=f32)
    a3 = jnp.maximum(acc3 + b3, 0.0)                   # (24, 80), rows r = ox*B + b

    # ---- GRU cell (PyTorch gate order r, z, n), fused into 2 dots ----
    # Flatten lane index = ox*80 + co; PyTorch's co-major flatten order and the
    # (r,z,n) gate stacking are folded into the packed wlin rows [0:240).
    gru_in = jnp.concatenate([a3[0:B, :], a3[B:2 * B, :], a3[2 * B:3 * B, :]],
                             axis=-1)                                  # (B, 240)
    h_prev = h_ref[...]                                                # (B, 32)
    gi = jnp.dot(gru_in, wlin_ref[0:240, :], preferred_element_type=f32) + b_ih
    gh = jnp.dot(h_prev, wlin_ref[240:272, :], preferred_element_type=f32) + b_hh
    r = jax.nn.sigmoid(gi[:, 0:H] + gh[:, 0:H])
    z = jax.nn.sigmoid(gi[:, H:2 * H] + gh[:, H:2 * H])
    n = jnp.tanh(gi[:, 2 * H:3 * H] + r * gh[:, 2 * H:3 * H])
    h_new = (1.0 - z) * n + z * h_prev                                 # (B, 32)

    # ---- final LazyLinear: (B,32) @ (32,6) ----
    q = jnp.dot(h_new, wlin_ref[272:304, 0:N_ACTIONS],
                preferred_element_type=f32) + b_fc

    # ---- single lane-dense packed output: lanes [0:32)=h_new, [32:38)=q ----
    pad = jnp.zeros((B, 128 - H - N_ACTIONS), f32)
    out_ref[...] = jnp.concatenate([h_new, q, pad], axis=-1)


# ------------------------------- wrapper (JAX) --------------------------------

def prepare_obs(x_nchw):
    """(B, C, H, W) -> (H, W, B, C): env batch on sublanes, channels on lanes.
    Do this upstream (outside the jitted per-step call)."""
    return jnp.transpose(x_nchw, (2, 3, 0, 1))


def prepare_params(p):
    """One-time (outside jit) packing of PyTorch-layout params into 3 kernel-ready
    arrays: conv taps (21,40,80), GRU+FC weights (304,96), biases (8,128)."""
    def conv_taps(w):                                   # (Co,Ci,3,3) -> (9,Ci,Co)
        co, ci = w.shape[0], w.shape[1]
        return jnp.transpose(w, (2, 3, 1, 0)).reshape(9, ci, co)

    w1 = conv_taps(p['c1_w'])                           # (9, 10, 20)
    w2 = conv_taps(p['c2_w'])                           # (9, 20, 40)
    w3 = conv_taps(p['c3_w'])[3:6]                      # (3, 40, 80)  ky=1 taps only
    wconv = jnp.zeros((21, 40, 80), jnp.float32)
    wconv = wconv.at[0:9, 0:10, 0:20].set(w1)
    wconv = wconv.at[9:18, 0:20, 0:40].set(w2)
    wconv = wconv.at[18:21, :, :].set(w3)

    # Fused GRU input weight: row = ox*80 + co  <-  PyTorch column co*3 + ox.
    wih = p['gru_w_ih'].reshape(3 * RNN_HIDDEN, 80, 3)  # [g*H+hd, co, ox]
    wih = jnp.transpose(wih, (2, 1, 0)).reshape(240, 3 * RNN_HIDDEN)
    whh = p['gru_w_hh'].T                               # (32, 96)
    fcw = p['fc_w'].T                                   # (32, 6)
    wlin = jnp.zeros((304, 96), jnp.float32)
    wlin = wlin.at[0:240, :].set(wih)
    wlin = wlin.at[240:272, :].set(whh)
    wlin = wlin.at[272:304, 0:N_ACTIONS].set(fcw)

    bias = jnp.zeros((8, 128), jnp.float32)
    bias = bias.at[0, 0:20].set(p['c1_b'])
    bias = bias.at[1, 0:40].set(p['c2_b'])
    bias = bias.at[2, 0:80].set(p['c3_b'])
    bias = bias.at[3, 0:96].set(p['gru_b_ih'])
    bias = bias.at[4, 0:96].set(p['gru_b_hh'])
    bias = bias.at[5, 0:N_ACTIONS].set(p['fc_b'])
    return {'wconv': wconv, 'wlin': wlin, 'bias': bias}


def forward(kparams, obs_hwbc, hidden_state=None):
    """Mirrors SCLazyLinear.forward, batched over envs.
    obs_hwbc: (5, 7, B, 10) from prepare_obs(); hidden_state: (B, 32).
    Returns (Q (B, n_actions), new_hidden (B, rnn_hidden_dim))."""
    if hidden_state is None:
        raise Exception('Needs hidden state, will not automatically assume it exists')
    B = obs_hwbc.shape[2]
    assert B % B_TILE == 0, "env batch must be a multiple of 8"
    packed = pl.pallas_call(
        _fused_forward_kernel,
        out_shape=jax.ShapeDtypeStruct((B, 128), jnp.float32),
        grid=(B // B_TILE,),
        in_specs=[
            pl.BlockSpec((IN_H, IN_W, B_TILE, IN_C), lambda i: (0, 0, i, 0)),
            pl.BlockSpec((B_TILE, RNN_HIDDEN), lambda i: (i, 0)),
            pl.BlockSpec((21, 40, 80), lambda i: (0, 0, 0)),   # weights resident
            pl.BlockSpec((304, 96), lambda i: (0, 0)),
            pl.BlockSpec((8, 128), lambda i: (0, 0)),
        ],
        out_specs=pl.BlockSpec((B_TILE, 128), lambda i: (i, 0)),
        compiler_params=pltpu.CompilerParams(dimension_semantics=("parallel",)),
    )(obs_hwbc, hidden_state, kparams['wconv'], kparams['wlin'], kparams['bias'])
    h_new = packed[:, :RNN_HIDDEN]
    q = packed[:, RNN_HIDDEN:RNN_HIDDEN + N_ACTIONS]
    return q, h_new


# ---------------------- pure-JAX reference (PyTorch layout) ----------------------

def _im2col(x_chw, kh, kw):
    C, Hh, Ww = x_chw.shape
    Ho, Wo = Hh - kh + 1, Ww - kw + 1
    cols = []
    for ky in range(kh):
        for kx in range(kw):
            cols.append(x_chw[:, ky:ky + Ho, kx:kx + Wo])
    patches = jnp.stack(cols, axis=1).reshape(C * kh * kw, Ho * Wo)
    return patches.T, Ho, Wo


def forward_ref(params, x_nchw, h_b):
    def one(x, h):
        cur = x
        for w, b, pad in [(params['c1_w'], params['c1_b'], 0),
                          (params['c2_w'], params['c2_b'], 0),
                          (params['c3_w'], params['c3_b'], 1)]:
            if pad:
                cur = jnp.pad(cur, ((0, 0), (pad, pad), (pad, pad)))
            patches, Ho, Wo = _im2col(cur, 3, 3)
            out = jnp.maximum(patches @ w.reshape(w.shape[0], -1).T + b, 0.0)
            cur = out.T.reshape(w.shape[0], Ho, Wo)
        xr = cur.reshape(1, -1)                       # torch.flatten: channel-major
        hh = h.reshape(1, -1)
        H = hh.shape[-1]
        gi = xr @ params['gru_w_ih'].T + params['gru_b_ih']
        gh = hh @ params['gru_w_hh'].T + params['gru_b_hh']
        r = jax.nn.sigmoid(gi[:, :H] + gh[:, :H])
        z = jax.nn.sigmoid(gi[:, H:2 * H] + gh[:, H:2 * H])
        n = jnp.tanh(gi[:, 2 * H:] + r * gh[:, 2 * H:])
        h_new = (1.0 - z) * n + z * hh
        q = h_new @ params['fc_w'].T + params['fc_b']
        return q[0], h_new[0]
    return jax.vmap(one)(x_nchw, h_b)


def init_params(key):
    """Deterministic init with the PyTorch-layout shapes implied by the module."""
    ks = jax.random.split(key, 12)

    def u(k, shape, bound):
        return jax.random.uniform(k, shape, jnp.float32, -bound, bound)

    p = {}
    k1 = 1.0 / math.sqrt(10 * 9)
    p['c1_w'] = u(ks[0], (20, 10, 3, 3), k1)
    p['c1_b'] = u(ks[1], (20,), k1)
    k2 = 1.0 / math.sqrt(20 * 9)
    p['c2_w'] = u(ks[2], (40, 20, 3, 3), k2)
    p['c2_b'] = u(ks[3], (40,), k2)
    k3 = 1.0 / math.sqrt(40 * 9)
    p['c3_w'] = u(ks[4], (80, 40, 3, 3), k3)
    p['c3_b'] = u(ks[5], (80,), k3)
    kg = 1.0 / math.sqrt(RNN_HIDDEN)
    p['gru_w_ih'] = u(ks[6], (3 * RNN_HIDDEN, 240), kg)
    p['gru_w_hh'] = u(ks[7], (3 * RNN_HIDDEN, RNN_HIDDEN), kg)
    p['gru_b_ih'] = u(ks[8], (3 * RNN_HIDDEN,), kg)
    p['gru_b_hh'] = u(ks[9], (3 * RNN_HIDDEN,), kg)
    kf = 1.0 / math.sqrt(RNN_HIDDEN)
    p['fc_w'] = u(ks[10], (N_ACTIONS, RNN_HIDDEN), kf)
    p['fc_b'] = u(ks[11], (N_ACTIONS,), kf)
    return p


if __name__ == "__main__":
    key = jax.random.PRNGKey(0)
    kp_key, kx_key, kh_key = jax.random.split(key, 3)
    params = init_params(kp_key)
    kparams = prepare_params(params)                 # one-time packing, outside jit

    # 16 envs; per-env NCHW observation (10, 5, 7) so the conv flatten is 240.
    B = 16
    x_nchw = jax.random.normal(kx_key, (B, IN_C, IN_H, IN_W), dtype=jnp.float32)
    h0 = 0.1 * jax.random.normal(kh_key, (B, RNN_HIDDEN), dtype=jnp.float32)
    x_k = prepare_obs(x_nchw)                        # layout prep, outside hot path

    fwd = jax.jit(forward)
    q, h1 = fwd(kparams, x_k, h0)
    jax.block_until_ready((q, h1))

    q_ref, h1_ref = forward_ref(params, x_nchw, h0)
    assert q.shape == (B, N_ACTIONS) and h1.shape == (B, RNN_HIDDEN)
    assert jnp.allclose(q, q_ref, atol=1e-4, rtol=1e-4)
    assert jnp.allclose(h1, h1_ref, atol=1e-4, rtol=1e-4)
    print("KERNEL_OK")
</pallas_src>

<mosaic_0001>
module attributes {stable_mosaic.version = 11 : i64} {
  func.func @_fused_forward_kernel(%arg0: i32, %arg1: memref<5x7x8x10xf32, #tpu.memory_space<vmem>>, %arg2: memref<8x32xf32, #tpu.memory_space<vmem>>, %arg3: memref<21x40x80xf32, #tpu.memory_space<vmem>>, %arg4: memref<304x96xf32, #tpu.memory_space<vmem>>, %arg5: memref<8x128xf32, #tpu.memory_space<vmem>>, %arg6: memref<8x128xf32, #tpu.memory_space<vmem>>) attributes {dimension_semantics = [#tpu.dimension_semantics<parallel>], iteration_bounds = array<i64: 2>, scalar_prefetch = 0 : i64, scratch_operands = 0 : i64, tpu.core_type = #tpu.core_type<tc>, window_params = [{transform_indices = @transform_0, window_bounds = array<i64: 5, 7, 8, 10>}, {transform_indices = @transform_1, window_bounds = array<i64: 8, 32>}, {pipeline_mode = #tpu.pipeline_mode<synchronous>, transform_indices = @transform_2, window_bounds = array<i64: 21, 40, 80>}, {pipeline_mode = #tpu.pipeline_mode<synchronous>, transform_indices = @transform_3, window_bounds = array<i64: 304, 96>}, {pipeline_mode = #tpu.pipeline_mode<synchronous>, transform_indices = @transform_4, window_bounds = array<i64: 8, 128>}, {transform_indices = @transform_5, window_bounds = array<i64: 8, 128>}]} {
    %c0 = arith.constant 0 : index
    %c0_0 = arith.constant 0 : index
    %0 = vector.load %arg5[%c0, %c0_0] : memref<8x128xf32, #tpu.memory_space<vmem>>, vector<8x128xf32>
    %1 = vector.extract_strided_slice %0 {offsets = [0, 0], sizes = [1, 20], strides = [1, 1]} : vector<8x128xf32> to vector<1x20xf32>
    %2 = vector.extract_strided_slice %0 {offsets = [1, 0], sizes = [1, 40], strides = [1, 1]} : vector<8x128xf32> to vector<1x40xf32>
    %3 = vector.extract_strided_slice %0 {offsets = [2, 0], sizes = [1, 80], strides = [1, 1]} : vector<8x128xf32> to vector<1x80xf32>
    %4 = vector.extract_strided_slice %0 {offsets = [3, 0], sizes = [1, 96], strides = [1, 1]} : vector<8x128xf32> to vector<1x96xf32>
    %5 = vector.extract_strided_slice %0 {offsets = [4, 0], sizes = [1, 96], strides = [1, 1]} : vector<8x128xf32> to vector<1x96xf32>
    %6 = vector.extract_strided_slice %0 {offsets = [5, 0], sizes = [1, 6], strides = [1, 1]} : vector<8x128xf32> to vector<1x6xf32>
    %c0_1 = arith.constant 0 : index
    %c0_2 = arith.constant 0 : index
    %c0_3 = arith.constant 0 : index
    %c0_4 = arith.constant 0 : index
    %7 = vector.load %arg1[%c0_1, %c0_2, %c0_3, %c0_4] : memref<5x7x8x10xf32, #tpu.memory_space<vmem>>, vector<5x7x8x10xf32>
    %cst = arith.constant 0.000000e+00 : f32
    %8 = vector.broadcast %cst : f32 to vector<120x20xf32>
    %9 = vector.extract_strided_slice %7 {offsets = [0, 0, 0, 0], sizes = [1, 1, 8, 10], strides = [1, 1, 1, 1]} : vector<5x7x8x10xf32> to vector<1x1x8x10xf32>
    %10 = vector.shape_cast %9 : vector<1x1x8x10xf32> to vector<8x10xf32>
    %11 = vector.extract_strided_slice %7 {offsets = [0, 1, 0, 0], sizes = [1, 1, 8, 10], strides = [1, 1, 1, 1]} : vector<5x7x8x10xf32> to vector<1x1x8x10xf32>
    %12 = vector.shape_cast %11 : vector<1x1x8x10xf32> to vector<8x10xf32>
    %13 = vector.extract_strided_slice %7 {offsets = [0, 2, 0, 0], sizes = [1, 1, 8, 10], strides = [1, 1, 1, 1]} : vector<5x7x8x10xf32> to vector<1x1x8x10xf32>
    %14 = vector.shape_cast %13 : vector<1x1x8x10xf32> to vector<8x10xf32>
    %15 = vector.extract_strided_slice %7 {offsets = [0, 3, 0, 0], sizes = [1, 1, 8, 10], strides = [1, 1, 1, 1]} : vector<5x7x8x10xf32> to vector<1x1x8x10xf32>
    %16 = vector.shape_cast %15 : vector<1x1x8x10xf32> to vector<8x10xf32>
    %17 = vector.extract_strided_slice %7 {offsets = [0, 4, 0, 0], sizes = [1, 1, 8, 10], strides = [1, 1, 1, 1]} : vector<5x7x8x10xf32> to vector<1x1x8x10xf32>
    %18 = vector.shape_cast %17 : vector<1x1x8x10xf32> to vector<8x10xf32>
    %19 = vector.extract_strided_slice %7 {offsets = [1, 0, 0, 0], sizes = [1, 1, 8, 10], strides = [1, 1, 1, 1]} : vector<5x7x8x10xf32> to vector<1x1x8x10xf32>
    %20 = vector.shape_cast %19 : vector<1x1x8x10xf32> to vector<8x10xf32>
    %21 = vector.extract_strided_slice %7 {offsets = [1, 1, 0, 0], sizes = [1, 1, 8, 10], strides = [1, 1, 1, 1]} : vector<5x7x8x10xf32> to vector<1x1x8x10xf32>
    %22 = vector.shape_cast %21 : vector<1x1x8x10xf32> to vector<8x10xf32>
    %23 = vector.extract_strided_slice %7 {offsets = [1, 2, 0, 0], sizes = [1, 1, 8, 10], strides = [1, 1, 1, 1]} : vector<5x7x8x10xf32> to vector<1x1x8x10xf32>
    %24 = vector.shape_cast %23 : vector<1x1x8x10xf32> to vector<8x10xf32>
    %25 = vector.extract_strided_slice %7 {offsets = [1, 3, 0, 0], sizes = [1, 1, 8, 10], strides = [1, 1, 1, 1]} : vector<5x7x8x10xf32> to vector<1x1x8x10xf32>
    %26 = vector.shape_cast %25 : vector<1x1x8x10xf32> to vector<8x10xf32>
    %27 = vector.extract_strided_slice %7 {offsets = [1, 4, 0, 0], sizes = [1, 1, 8, 10], strides = [1, 1, 1, 1]} : vector<5x7x8x10xf32> to vector<1x1x8x10xf32>
    %28 = vector.shape_cast %27 : vector<1x1x8x10xf32> to vector<8x10xf32>
    %29 = vector.extract_strided_slice %7 {offsets = [2, 0, 0, 0], sizes = [1, 1, 8, 10], strides = [1, 1, 1, 1]} : vector<5x7x8x10xf32> to vector<1x1x8x10xf32>
    %30 = vector.shape_cast %29 : vector<1x1x8x10xf32> to vector<8x10xf32>
    %31 = vector.extract_strided_slice %7 {offsets = [2, 1, 0, 0], sizes = [1, 1, 8, 10], strides = [1, 1, 1, 1]} : vector<5x7x8x10xf32> to vector<1x1x8x10xf32>
    %32 = vector.shape_cast %31 : vector<1x1x8x10xf32> to vector<8x10xf32>
    %33 = vector.extract_strided_slice %7 {offsets = [2, 2, 0, 0], sizes = [1, 1, 8, 10], strides = [1, 1, 1, 1]} : vector<5x7x8x10xf32> to vector<1x1x8x10xf32>
    %34 = vector.shape_cast %33 : vector<1x1x8x10xf32> to vector<8x10xf32>
    %35 = vector.extract_strided_slice %7 {offsets = [2, 3, 0, 0], sizes = [1, 1, 8, 10], strides = [1, 1, 1, 1]} : vector<5x7x8x10xf32> to vector<1x1x8x10xf32>
    %36 = vector.shape_cast %35 : vector<1x1x8x10xf32> to vector<8x10xf32>
    %37 = vector.extract_strided_slice %7 {offsets = [2, 4, 0, 0], sizes = [1, 1, 8, 10], strides = [1, 1, 1, 1]} : vector<5x7x8x10xf32> to vector<1x1x8x10xf32>
    %38 = vector.shape_cast %37 : vector<1x1x8x10xf32> to vector<8x10xf32>
    %39 = tpu.concatenate %10, %12, %14, %16, %18, %20, %22, %24, %26, %28, %30, %32, %34, %36, %38 in 0 : vector<8x10xf32>, vector<8x10xf32>, vector<8x10xf32>, vector<8x10xf32>, vector<8x10xf32>, vector<8x10xf32>, vector<8x10xf32>, vector<8x10xf32>, vector<8x10xf32>, vector<8x10xf32>, vector<8x10xf32>, vector<8x10xf32>, vector<8x10xf32>, vector<8x10xf32>, vector<8x10xf32> -> vector<120x10xf32>
    %c0_5 = arith.constant 0 : index
    %c0_6 = arith.constant 0 : index
    %c0_7 = arith.constant 0 : index
    %40 = vector.load %arg3[%c0_5, %c0_6, %c0_7] : memref<21x40x80xf32, #tpu.memory_space<vmem>>, vector<1x10x20xf32>
    %41 = vector.shape_cast %40 : vector<1x10x20xf32> to vector<10x20xf32>
    %cst_8 = arith.constant dense<0.000000e+00> : vector<120x20xf32>
    %42 = tpu.matmul %39, %41, %cst_8 {dimension_numbers = #tpu.dot_dimension_numbers<[1], [0], [0], [1], [0, 0, 1, 1], [], []>} : vector<120x10xf32>, vector<10x20xf32>, vector<120x20xf32> -> vector<120x20xf32>
    %43 = arith.addf %8, %42 : vector<120x20xf32>
    %44 = vector.extract_strided_slice %7 {offsets = [0, 1, 0, 0], sizes = [1, 1, 8, 10], strides = [1, 1, 1, 1]} : vector<5x7x8x10xf32> to vector<1x1x8x10xf32>
    %45 = vector.shape_cast %44 : vector<1x1x8x10xf32> to vector<8x10xf32>
    %46 = vector.extract_strided_slice %7 {offsets = [0, 2, 0, 0], sizes = [1, 1, 8, 10], strides = [1, 1, 1, 1]} : vector<5x7x8x10xf32> to vector<1x1x8x10xf32>
    %47 = vector.shape_cast %46 : vector<1x1x8x10xf32> to vector<8x10xf32>
    %48 = vector.extract_strided_slice %7 {offsets = [0, 3, 0, 0], sizes = [1, 1, 8, 10], strides = [1, 1, 1, 1]} : vector<5x7x8x10xf32> to vector<1x1x8x10xf32>
    %49 = vector.shape_cast %48 : vector<1x1x8x10xf32> to vector<8x10xf32>
    %50 = vector.extract_strided_slice %7 {offsets = [0, 4, 0, 0], sizes = [1, 1, 8, 10], strides = [1, 1, 1, 1]} : vector<5x7x8x10xf32> to vector<1x1x8x10xf32>
    %51 = vector.shape_cast %50 : vector<1x1x8x10xf32> to vector<8x10xf32>
    %52 = vector.extract_strided_slice %7 {offsets = [0, 5, 0, 0], sizes = [1, 1, 8, 10], strides = [1, 1, 1, 1]} : vector<5x7x8x10xf32> to vector<1x1x8x10xf32>
    %53 = vector.shape_cast %52 : vector<1x1x8x10xf32> to vector<8x10xf32>
    %54 = vector.extract_strided_slice %7 {offsets = [1, 1, 0, 0], sizes = [1, 1, 8, 10], strides = [1, 1, 1, 1]} : vector<5x7x8x10xf32> to vector<1x1x8x10xf32>
    %55 = vector.shape_cast %54 : vector<1x1x8x10xf32> to vector<8x10xf32>
    %56 = vector.extract_strided_slice %7 {offsets = [1, 2, 0, 0], sizes = [1, 1, 8, 10], strides = [1, 1, 1, 1]} : vector<5x7x8x10xf32> to vector<1x1x8x10xf32>
    %57 = vector.shape_cast %56 : vector<1x1x8x10xf32> to vector<8x10xf32>
    %58 = vector.extract_strided_slice %7 {offsets = [1, 3, 0, 0], sizes = [1, 1, 8, 10], strides = [1, 1, 1, 1]} : vector<5x7x8x10xf32> to vector<1x1x8x10xf32>
    %59 = vector.shape_cast %58 : vector<1x1x8x10xf32> to vector<8x10xf32>
    %60 = vector.extract_strided_slice %7 {offsets = [1, 4, 0, 0], sizes = [1, 1, 8, 10], strides = [1, 1, 1, 1]} : vector<5x7x8x10xf32> to vector<1x1x8x10xf32>
    %61 = vector.shape_cast %60 : vector<1x1x8x10xf32> to vector<8x10xf32>
    %62 = vector.extract_strided_slice %7 {offsets = [1, 5, 0, 0], sizes = [1, 1, 8, 10], strides = [1, 1, 1, 1]} : vector<5x7x8x10xf32> to vector<1x1x8x10xf32>
    %63 = vector.shape_cast %62 : vector<1x1x8x10xf32> to vector<8x10xf32>
    %64 = vector.extract_strided_slice %7 {offsets = [2, 1, 0, 0], sizes = [1, 1, 8, 10], strides = [1, 1, 1, 1]} : vector<5x7x8x10xf32> to vector<1x1x8x10xf32>
    %65 = vector.shape_cast %64 : vector<1x1x8x10xf32> to vector<8x10xf32>
    %66 = vector.extract_strided_slice %7 {offsets = [2, 2, 0, 0], sizes = [1, 1, 8, 10], strides = [1, 1, 1, 1]} : vector<5x7x8x10xf32> to vector<1x1x8x10xf32>
    %67 = vector.shape_cast %66 : vector<1x1x8x10xf32> to vector<8x10xf32>
    %68 = vector.extract_strided_slice %7 {offsets = [2, 3, 0, 0], sizes = [1, 1, 8, 10], strides = [1, 1, 1, 1]} : vector<5x7x8x10xf32> to vector<1x1x8x10xf32>
    %69 = vector.shape_cast %68 : vector<1x1x8x10xf32> to vector<8x10xf32>
    %70 = vector.extract_strided_slice %7 {offsets = [2, 4, 0, 0], sizes = [1, 1, 8, 10], strides = [1, 1, 1, 1]} : vector<5x7x8x10xf32> to vector<1x1x8x10xf32>
    %71 = vector.shape_cast %70 : vector<1x1x8x10xf32> to vector<8x10xf32>
    %72 = vector.extract_strided_slice %7 {offsets = [2, 5, 0, 0], sizes = [1, 1, 8, 10], strides = [1, 1, 1, 1]} : vector<5x7x8x10xf32> to vector<1x1x8x10xf32>
    %73 = vector.shape_cast %72 : vector<1x1x8x10xf32> to vector<8x10xf32>
    %74 = tpu.concatenate %45, %47, %49, %51, %53, %55, %57, %59, %61, %63, %65, %67, %69, %71, %73 in 0 : vector<8x10xf32>, vector<8x10xf32>, vector<8x10xf32>, vector<8x10xf32>, vector<8x10xf32>, vector<8x10xf32>, vector<8x10xf32>, vector<8x10xf32>, vector<8x10xf32>, vector<8x10xf32>, vector<8x10xf32>, vector<8x10xf32>, vector<8x10xf32>, vector<8x10xf32>, vector<8x10xf32> -> vector<120x10xf32>
    %c1 = arith.constant 1 : index
    %c0_9 = arith.constant 0 : index
    %c0_10 = arith.constant 0 : index
    %75 = vector.load %arg3[%c1, %c0_9, %c0_10] : memref<21x40x80xf32, #tpu.memory_space<vmem>>, vector<1x10x20xf32>
    %76 = vector.shape_cast %75 : vector<1x10x20xf32> to vector<10x20xf32>
    %cst_11 = arith.constant dense<0.000000e+00> : vector<120x20xf32>
    %77 = tpu.matmul %74, %76, %cst_11 {dimension_numbers = #tpu.dot_dimension_numbers<[1], [0], [0], [1], [0, 0, 1, 1], [], []>} : vector<120x10xf32>, vector<10x20xf32>, vector<120x20xf32> -> vector<120x20xf32>
    %78 = arith.addf %43, %77 : vector<120x20xf32>
    %79 = vector.extract_strided_slice %7 {offsets = [0, 2, 0, 0], sizes = [1, 1, 8, 10], strides = [1, 1, 1, 1]} : vector<5x7x8x10xf32> to vector<1x1x8x10xf32>
    %80 = vector.shape_cast %79 : vector<1x1x8x10xf32> to vector<8x10xf32>
    %81 = vector.extract_strided_slice %7 {offsets = [0, 3, 0, 0], sizes = [1, 1, 8, 10], strides = [1, 1, 1, 1]} : vector<5x7x8x10xf32> to vector<1x1x8x10xf32>
    %82 = vector.shape_cast %81 : vector<1x1x8x10xf32> to vector<8x10xf32>
    %83 = vector.extract_strided_slice %7 {offsets = [0, 4, 0, 0], sizes = [1, 1, 8, 10], strides = [1, 1, 1, 1]} : vector<5x7x8x10xf32> to vector<1x1x8x10xf32>
    %84 = vector.shape_cast %83 : vector<1x1x8x10xf32> to vector<8x10xf32>
    %85 = vector.extract_strided_slice %7 {offsets = [0, 5, 0, 0], sizes = [1, 1, 8, 10], strides = [1, 1, 1, 1]} : vector<5x7x8x10xf32> to vector<1x1x8x10xf32>
    %86 = vector.shape_cast %85 : vector<1x1x8x10xf32> to vector<8x10xf32>
    %87 = vector.extract_strided_slice %7 {offsets = [0, 6, 0, 0], sizes = [1, 1, 8, 10], strides = [1, 1, 1, 1]} : vector<5x7x8x10xf32> to vector<1x1x8x10xf32>
    %88 = vector.shape_cast %87 : vector<1x1x8x10xf32> to vector<8x10xf32>
    %89 = vector.extract_strided_slice %7 {offsets = [1, 2, 0, 0], sizes = [1, 1, 8, 10], strides = [1, 1, 1, 1]} : vector<5x7x8x10xf32> to vector<1x1x8x10xf32>
    %90 = vector.shape_cast %89 : vector<1x1x8x10xf32> to vector<8x10xf32>
    %91 = vector.extract_strided_slice %7 {offsets = [1, 3, 0, 0], sizes = [1, 1, 8, 10], strides = [1, 1, 1, 1]} : vector<5x7x8x10xf32> to vector<1x1x8x10xf32>
    %92 = vector.shape_cast %91 : vector<1x1x8x10xf32> to vector<8x10xf32>
    %93 = vector.extract_strided_slice %7 {offsets = [1, 4, 0, 0], sizes = [1, 1, 8, 10], strides = [1, 1, 1, 1]} : vector<5x7x8x10xf32> to vector<1x1x8x10xf32>
    %94 = vector.shape_cast %93 : vector<1x1x8x10xf32> to vector<8x10xf32>
    %95 = vector.extract_strided_slice %7 {offsets = [1, 5, 0, 0], sizes = [1, 1, 8, 10], strides = [1, 1, 1, 1]} : vector<5x7x8x10xf32> to vector<1x1x8x10xf32>
    %96 = vector.shape_cast %95 : vector<1x1x8x10xf32> to vector<8x10xf32>
    %97 = vector.extract_strided_slice %7 {offsets = [1, 6, 0, 0], sizes = [1, 1, 8, 10], strides = [1, 1, 1, 1]} : vector<5x7x8x10xf32> to vector<1x1x8x10xf32>
    %98 = vector.shape_cast %97 : vector<1x1x8x10xf32> to vector<8x10xf32>
    %99 = vector.extract_strided_slice %7 {offsets = [2, 2, 0, 0], sizes = [1, 1, 8, 10], strides = [1, 1, 1, 1]} : vector<5x7x8x10xf32> to vector<1x1x8x10xf32>
    %100 = vector.shape_cast %99 : vector<1x1x8x10xf32> to vector<8x10xf32>
    %101 = vector.extract_strided_slice %7 {offsets = [2, 3, 0, 0], sizes = [1, 1, 8, 10], strides = [1, 1, 1, 1]} : vector<5x7x8x10xf32> to vector<1x1x8x10xf32>
    %102 = vector.shape_cast %101 : vector<1x1x8x10xf32> to vector<8x10xf32>
    %103 = vector.extract_strided_slice %7 {offsets = [2, 4, 0, 0], sizes = [1, 1, 8, 10], strides = [1, 1, 1, 1]} : vector<5x7x8x10xf32> to vector<1x1x8x10xf32>
    %104 = vector.shape_cast %103 : vector<1x1x8x10xf32> to vector<8x10xf32>
    %105 = vector.extract_strided_slice %7 {offsets = [2, 5, 0, 0], sizes = [1, 1, 8, 10], strides = [1, 1, 1, 1]} : vector<5x7x8x10xf32> to vector<1x1x8x10xf32>
    %106 = vector.shape_cast %105 : vector<1x1x8x10xf32> to vector<8x10xf32>
    %107 = vector.extract_strided_slice %7 {offsets = [2, 6, 0, 0], sizes = [1, 1, 8, 10], strides = [1, 1, 1, 1]} : vector<5x7x8x10xf32> to vector<1x1x8x10xf32>
    %108 = vector.shape_cast %107 : vector<1x1x8x10xf32> to vector<8x10xf32>
    %109 = tpu.concatenate %80, %82, %84, %86, %88, %90, %92, %94, %96, %98, %100, %102, %104, %106, %108 in 0 : vector<8x10xf32>, vector<8x10xf32>, vector<8x10xf32>, vector<8x10xf32>, vector<8x10xf32>, vector<8x10xf32>, vector<8x10xf32>, vector<8x10xf32>, vector<8x10xf32>, vector<8x10xf32>, vector<8x10xf32>, vector<8x10xf32>, vector<8x10xf32>, vector<8x10xf32>, vector<8x10xf32> -> vector<120x10xf32>
    %c2 = arith.constant 2 : index
    %c0_12 = arith.constant 0 : index
    %c0_13 = arith.constant 0 : index
    %110 = vector.load %arg3[%c2, %c0_12, %c0_13] : memref<21x40x80xf32, #tpu.memory_space<vmem>>, vector<1x10x20xf32>
    %111 = vector.shape_cast %110 : vector<1x10x20xf32> to vector<10x20xf32>
    %cst_14 = arith.constant dense<0.000000e+00> : vector<120x20xf32>
    %112 = tpu.matmul %109, %111, %cst_14 {dimension_numbers = #tpu.dot_dimension_numbers<[1], [0], [0], [1], [0, 0, 1, 1], [], []>} : vector<120x10xf32>, vector<10x20xf32>, vector<120x20xf32> -> vector<120x20xf32>
    %113 = arith.addf %78, %112 : vector<120x20xf32>
    %114 = vector.extract_strided_slice %7 {offsets = [1, 0, 0, 0], sizes = [1, 1, 8, 10], strides = [1, 1, 1, 1]} : vector<5x7x8x10xf32> to vector<1x1x8x10xf32>
    %115 = vector.shape_cast %114 : vector<1x1x8x10xf32> to vector<8x10xf32>
    %116 = vector.extract_strided_slice %7 {offsets = [1, 1, 0, 0], sizes = [1, 1, 8, 10], strides = [1, 1, 1, 1]} : vector<5x7x8x10xf32> to vector<1x1x8x10xf32>
    %117 = vector.shape_cast %116 : vector<1x1x8x10xf32> to vector<8x10xf32>
    %118 = vector.extract_strided_slice %7 {offsets = [1, 2, 0, 0], sizes = [1, 1, 8, 10], strides = [1, 1, 1, 1]} : vector<5x7x8x10xf32> to vector<1x1x8x10xf32>
    %119 = vector.shape_cast %118 : vector<1x1x8x10xf32> to vector<8x10xf32>
    %120 = vector.extract_strided_slice %7 {offsets = [1, 3, 0, 0], sizes = [1, 1, 8, 10], strides = [1, 1, 1, 1]} : vector<5x7x8x10xf32> to vector<1x1x8x10xf32>
    %121 = vector.shape_cast %120 : vector<1x1x8x10xf32> to vector<8x10xf32>
    %122 = vector.extract_strided_slice %7 {offsets = [1, 4, 0, 0], sizes = [1, 1, 8, 10], strides = [1, 1, 1, 1]} : vector<5x7x8x10xf32> to vector<1x1x8x10xf32>
    %123 = vector.shape_cast %122 : vector<1x1x8x10xf32> to vector<8x10xf32>
    %124 = vector.extract_strided_slice %7 {offsets = [2, 0, 0, 0], sizes = [1, 1, 8, 10], strides = [1, 1, 1, 1]} : vector<5x7x8x10xf32> to vector<1x1x8x10xf32>
    %125 = vector.shape_cast %124 : vector<1x1x8x10xf32> to vector<8x10xf32>
    %126 = vector.extract_strided_slice %7 {offsets = [2, 1, 0, 0], sizes = [1, 1, 8, 10], strides = [1, 1, 1, 1]} : vector<5x7x8x10xf32> to vector<1x1x8x10xf32>
    %127 = vector.shape_cast %126 : vector<1x1x8x10xf32> to vector<8x10xf32>
    %128 = vector.extract_strided_slice %7 {offsets = [2, 2, 0, 0], sizes = [1, 1, 8, 10], strides = [1, 1, 1, 1]} : vector<5x7x8x10xf32> to vector<1x1x8x10xf32>
    %129 = vector.shape_cast %128 : vector<1x1x8x10xf32> to vector<8x10xf32>
    %130 = vector.extract_strided_slice %7 {offsets = [2, 3, 0, 0], sizes = [1, 1, 8, 10], strides = [1, 1, 1, 1]} : vector<5x7x8x10xf32> to vector<1x1x8x10xf32>
    %131 = vector.shape_cast %130 : vector<1x1x8x10xf32> to vector<8x10xf32>
    %132 = vector.extract_strided_slice %7 {offsets = [2, 4, 0, 0], sizes = [1, 1, 8, 10], strides = [1, 1, 1, 1]} : vector<5x7x8x10xf32> to vector<1x1x8x10xf32>
    %133 = vector.shape_cast %132 : vector<1x1x8x10xf32> to vector<8x10xf32>
    %134 = vector.extract_strided_slice %7 {offsets = [3, 0, 0, 0], sizes = [1, 1, 8, 10], strides = [1, 1, 1, 1]} : vector<5x7x8x10xf32> to vector<1x1x8x10xf32>
    %135 = vector.shape_cast %134 : vector<1x1x8x10xf32> to vector<8x10xf32>
    %136 = vector.extract_strided_slice %7 {offsets = [3, 1, 0, 0], sizes = [1, 1, 8, 10], strides = [1, 1, 1, 1]} : vector<5x7x8x10xf32> to vector<1x1x8x10xf32>
    %137 = vector.shape_cast %136 : vector<1x1x8x10xf32> to vector<8x10xf32>
    %138 = vector.extract_strided_slice %7 {offsets = [3, 2, 0, 0], sizes = [1, 1, 8, 10], strides = [1, 1, 1, 1]} : vector<5x7x8x10xf32> to vector<1x1x8x10xf32>
    %139 = vector.shape_cast %138 : vector<1x1x8x10xf32> to vector<8x10xf32>
    %140 = vector.extract_strided_slice %7 {offsets = [3, 3, 0, 0], sizes = [1, 1, 8, 10], strides = [1, 1, 1, 1]} : vector<5x7x8x10xf32> to vector<1x1x8x10xf32>
    %141 = vector.shape_cast %140 : vector<1x1x8x10xf32> to vector<8x10xf32>
    %142 = vector.extract_strided_slice %7 {offsets = [3, 4, 0, 0], sizes = [1, 1, 8, 10], strides = [1, 1, 1, 1]} : vector<5x7x8x10xf32> to vector<1x1x8x10xf32>
    %143 = vector.shape_cast %142 : vector<1x1x8x10xf32> to vector<8x10xf32>
    %144 = tpu.concatenate %115, %117, %119, %121, %123, %125, %127, %129, %131, %133, %135, %137, %139, %141, %143 in 0 : vector<8x10xf32>, vector<8x10xf32>, vector<8x10xf32>, vector<8x10xf32>, vector<8x10xf32>, vector<8x10xf32>, vector<8x10xf32>, vector<8x10xf32>, vector<8x10xf32>, vector<8x10xf32>, vector<8x10xf32>, vector<8x10xf32>, vector<8x10xf32>, vector<8x10xf32>, vector<8x10xf32> -> vector<120x10xf32>
    %c3 = arith.constant 3 : index
    %c0_15 = arith.constant 0 : index
    %c0_16 = arith.constant 0 : index
    %145 = vector.load %arg3[%c3, %c0_15, %c0_16] : memref<21x40x80xf32, #tpu.memory_space<vmem>>, vector<1x10x20xf32>
    %146 = vector.shape_cast %145 : vector<1x10x20xf32> to vector<10x20xf32>
    %cst_17 = arith.constant dense<0.000000e+00> : vector<120x20xf32>
    %147 = tpu.matmul %144, %146, %cst_17 {dimension_numbers = #tpu.dot_dimension_numbers<[1], [0], [0], [1], [0, 0, 1, 1], [], []>} : vector<120x10xf32>, vector<10x20xf32>, vector<120x20xf32> -> vector<120x20xf32>
    %148 = arith.addf %113, %147 : vector<120x20xf32>
    %149 = vector.extract_strided_slice %7 {offsets = [1, 1, 0, 0], sizes = [1, 1, 8, 10], strides = [1, 1, 1, 1]} : vector<5x7x8x10xf32> to vector<1x1x8x10xf32>
    %150 = vector.shape_cast %149 : vector<1x1x8x10xf32> to vector<8x10xf32>
    %151 = vector.extract_strided_slice %7 {offsets = [1, 2, 0, 0], sizes = [1, 1, 8, 10], strides = [1, 1, 1, 1]} : vector<5x7x8x10xf32> to vector<1x1x8x10xf32>
    %152 = vector.shape_cast %151 : vector<1x1x8x10xf32> to vector<8x10xf32>
    %153 = vector.extract_strided_slice %7 {offsets = [1, 3, 0, 0], sizes = [1, 1, 8, 10], strides = [1, 1, 1, 1]} : vector<5x7x8x10xf32> to vector<1x1x8x10xf32>
    %154 = vector.shape_cast %153 : vector<1x1x8x10xf32> to vector<8x10xf32>
    %155 = vector.extract_strided_slice %7 {offsets = [1, 4, 0, 0], sizes = [1, 1, 8, 10], strides = [1, 1, 1, 1]} : vector<5x7x8x10xf32> to vector<1x1x8x10xf32>
    %156 = vector.shape_cast %155 : vector<1x1x8x10xf32> to vector<8x10xf32>
    %157 = vector.extract_strided_slice %7 {offsets = [1, 5, 0, 0], sizes = [1, 1, 8, 10], strides = [1, 1, 1, 1]} : vector<5x7x8x10xf32> to vector<1x1x8x10xf32>
    %158 = vector.shape_cast %157 : vector<1x1x8x10xf32> to vector<8x10xf32>
    %159 = vector.extract_strided_slice %7 {offsets = [2, 1, 0, 0], sizes = [1, 1, 8, 10], strides = [1, 1, 1, 1]} : vector<5x7x8x10xf32> to vector<1x1x8x10xf32>
    %160 = vector.shape_cast %159 : vector<1x1x8x10xf32> to vector<8x10xf32>
    %161 = vector.extract_strided_slice %7 {offsets = [2, 2, 0, 0], sizes = [1, 1, 8, 10], strides = [1, 1, 1, 1]} : vector<5x7x8x10xf32> to vector<1x1x8x10xf32>
    %162 = vector.shape_cast %161 : vector<1x1x8x10xf32> to vector<8x10xf32>
    %163 = vector.extract_strided_slice %7 {offsets = [2, 3, 0, 0], sizes = [1, 1, 8, 10], strides = [1, 1, 1, 1]} : vector<5x7x8x10xf32> to vector<1x1x8x10xf32>
    %164 = vector.shape_cast %163 : vector<1x1x8x10xf32> to vector<8x10xf32>
    %165 = vector.extract_strided_slice %7 {offsets = [2, 4, 0, 0], sizes = [1, 1, 8, 10], strides = [1, 1, 1, 1]} : vector<5x7x8x10xf32> to vector<1x1x8x10xf32>
    %166 = vector.shape_cast %165 : vector<1x1x8x10xf32> to vector<8x10xf32>
    %167 = vector.extract_strided_slice %7 {offsets = [2, 5, 0, 0], sizes = [1, 1, 8, 10], strides = [1, 1, 1, 1]} : vector<5x7x8x10xf32> to vector<1x1x8x10xf32>
    %168 = vector.shape_cast %167 : vector<1x1x8x10xf32> to vector<8x10xf32>
    %169 = vector.extract_strided_slice %7 {offsets = [3, 1, 0, 0], sizes = [1, 1, 8, 10], strides = [1, 1, 1, 1]} : vector<5x7x8x10xf32> to vector<1x1x8x10xf32>
    %170 = vector.shape_cast %169 : vector<1x1x8x10xf32> to vector<8x10xf32>
    %171 = vector.extract_strided_slice %7 {offsets = [3, 2, 0, 0], sizes = [1, 1, 8, 10], strides = [1, 1, 1, 1]} : vector<5x7x8x10xf32> to vector<1x1x8x10xf32>
    %172 = vector.shape_cast %171 : vector<1x1x8x10xf32> to vector<8x10xf32>
    %173 = vector.extract_strided_slice %7 {offsets = [3, 3, 0, 0], sizes = [1, 1, 8, 10], strides = [1, 1, 1, 1]} : vector<5x7x8x10xf32> to vector<1x1x8x10xf32>
    %174 = vector.shape_cast %173 : vector<1x1x8x10xf32> to vector<8x10xf32>
    %175 = vector.extract_strided_slice %7 {offsets = [3, 4, 0, 0], sizes = [1, 1, 8, 10], strides = [1, 1, 1, 1]} : vector<5x7x8x10xf32> to vector<1x1x8x10xf32>
    %176 = vector.shape_cast %175 : vector<1x1x8x10xf32> to vector<8x10xf32>
    %177 = vector.extract_strided_slice %7 {offsets = [3, 5, 0, 0], sizes = [1, 1, 8, 10], strides = [1, 1, 1, 1]} : vector<5x7x8x10xf32> to vector<1x1x8x10xf32>
    %178 = vector.shape_cast %177 : vector<1x1x8x10xf32> to vector<8x10xf32>
    %179 = tpu.concatenate %150, %152, %154, %156, %158, %160, %162, %164, %166, %168, %170, %172, %174, %176, %178 in 0 : vector<8x10xf32>, vector<8x10xf32>, vector<8x10xf32>, vector<8x10xf32>, vector<8x10xf32>, vector<8x10xf32>, vector<8x10xf32>, vector<8x10xf32>, vector<8x10xf32>, vector<8x10xf32>, vector<8x10xf32>, vector<8x10xf32>, vector<8x10xf32>, vector<8x10xf32>, vector<8x10xf32> -> vector<120x10xf32>
    %c4 = arith.constant 4 : index
    %c0_18 = arith.constant 0 : index
    %c0_19 = arith.constant 0 : index
    %180 = vector.load %arg3[%c4, %c0_18, %c0_19] : memref<21x40x80xf32, #tpu.memory_space<vmem>>, vector<1x10x20xf32>
    %181 = vector.shape_cast %180 : vector<1x10x20xf32> to vector<10x20xf32>
    %cst_20 = arith.constant dense<0.000000e+00> : vector<120x20xf32>
    %182 = tpu.matmul %179, %181, %cst_20 {dimension_numbers = #tpu.dot_dimension_numbers<[1], [0], [0], [1], [0, 0, 1, 1], [], []>} : vector<120x10xf32>, vector<10x20xf32>, vector<120x20xf32> -> vector<120x20xf32>
    %183 = arith.addf %148, %182 : vector<120x20xf32>
    %184 = vector.extract_strided_slice %7 {offsets = [1, 2, 0, 0], sizes = [1, 1, 8, 10], strides = [1, 1, 1, 1]} : vector<5x7x8x10xf32> to vector<1x1x8x10xf32>
    %185 = vector.shape_cast %184 : vector<1x1x8x10xf32> to vector<8x10xf32>
    %186 = vector.extract_strided_slice %7 {offsets = [1, 3, 0, 0], sizes = [1, 1, 8, 10], strides = [1, 1, 1, 1]} : vector<5x7x8x10xf32> to vector<1x1x8x10xf32>
    %187 = vector.shape_cast %186 : vector<1x1x8x10xf32> to vector<8x10xf32>
    %188 = vector.extract_strided_slice %7 {offsets = [1, 4, 0, 0], sizes = [1, 1, 8, 10], strides = [1, 1, 1, 1]} : vector<5x7x8x10xf32> to vector<1x1x8x10xf32>
    %189 = vector.shape_cast %188 : vector<1x1x8x10xf32> to vector<8x10xf32>
    %190 = vector.extract_strided_slice %7 {offsets = [1, 5, 0, 0], sizes = [1, 1, 8, 10], strides = [1, 1, 1, 1]} : vector<5x7x8x10xf32> to vector<1x1x8x10xf32>
    %191 = vector.shape_cast %190 : vector<1x1x8x10xf32> to vector<8x10xf32>
    %192 = vector.extract_strided_slice %7 {offsets = [1, 6, 0, 0], sizes = [1, 1, 8, 10], strides = [1, 1, 1, 1]} : vector<5x7x8x10xf32> to vector<1x1x8x10xf32>
    %193 = vector.shape_cast %192 : vector<1x1x8x10xf32> to vector<8x10xf32>
    %194 = vector.extract_strided_slice %7 {offsets = [2, 2, 0, 0], sizes = [1, 1, 8, 10], strides = [1, 1, 1, 1]} : vector<5x7x8x10xf32> to vector<1x1x8x10xf32>
    %195 = vector.shape_cast %194 : vector<1x1x8x10xf32> to vector<8x10xf32>
    %196 = vector.extract_strided_slice %7 {offsets = [2, 3, 0, 0], sizes = [1, 1, 8, 10], strides = [1, 1, 1, 1]} : vector<5x7x8x10xf32> to vector<1x1x8x10xf32>
    %197 = vector.shape_cast %196 : vector<1x1x8x10xf32> to vector<8x10xf32>
    %198 = vector.extract_strided_slice %7 {offsets = [2, 4, 0, 0], sizes = [1, 1, 8, 10], strides = [1, 1, 1, 1]} : vector<5x7x8x10xf32> to vector<1x1x8x10xf32>
    %199 = vector.shape_cast %198 : vector<1x1x8x10xf32> to vector<8x10xf32>
    %200 = vector.extract_strided_slice %7 {offsets = [2, 5, 0, 0], sizes = [1, 1, 8, 10], strides = [1, 1, 1, 1]} : vector<5x7x8x10xf32> to vector<1x1x8x10xf32>
    %201 = vector.shape_cast %200 : vector<1x1x8x10xf32> to vector<8x10xf32>
    %202 = vector.extract_strided_slice %7 {offsets = [2, 6, 0, 0], sizes = [1, 1, 8, 10], strides = [1, 1, 1, 1]} : vector<5x7x8x10xf32> to vector<1x1x8x10xf32>
    %203 = vector.shape_cast %202 : vector<1x1x8x10xf32> to vector<8x10xf32>
    %204 = vector.extract_strided_slice %7 {offsets = [3, 2, 0, 0], sizes = [1, 1, 8, 10], strides = [1, 1, 1, 1]} : vector<5x7x8x10xf32> to vector<1x1x8x10xf32>
    %205 = vector.shape_cast %204 : vector<1x1x8x10xf32> to vector<8x10xf32>
    %206 = vector.extract_strided_slice %7 {offsets = [3, 3, 0, 0], sizes = [1, 1, 8, 10], strides = [1, 1, 1, 1]} : vector<5x7x8x10xf32> to vector<1x1x8x10xf32>
    %207 = vector.shape_cast %206 : vector<1x1x8x10xf32> to vector<8x10xf32>
    %208 = vector.extract_strided_slice %7 {offsets = [3, 4, 0, 0], sizes = [1, 1, 8, 10], strides = [1, 1, 1, 1]} : vector<5x7x8x10xf32> to vector<1x1x8x10xf32>
    %209 = vector.shape_cast %208 : vector<1x1x8x10xf32> to vector<8x10xf32>
    %210 = vector.extract_strided_slice %7 {offsets = [3, 5, 0, 0], sizes = [1, 1, 8, 10], strides = [1, 1, 1, 1]} : vector<5x7x8x10xf32> to vector<1x1x8x10xf32>
    %211 = vector.shape_cast %210 : vector<1x1x8x10xf32> to vector<8x10xf32>
    %212 = vector.extract_strided_slice %7 {offsets = [3, 6, 0, 0], sizes = [1, 1, 8, 10], strides = [1, 1, 1, 1]} : vector<5x7x8x10xf32> to vector<1x1x8x10xf32>
    %213 = vector.shape_cast %212 : vector<1x1x8x10xf32> to vector<8x10xf32>
    %214 = tpu.concatenate %185, %187, %189, %191, %193, %195, %197, %199, %201, %203, %205, %207, %209, %211, %213 in 0 : vector<8x10xf32>, vector<8x10xf32>, vector<8x10xf32>, vector<8x10xf32>, vector<8x10xf32>, vector<8x10xf32>, vector<8x10xf32>, vector<8x10xf32>, vector<8x10xf32>, vector<8x10xf32>, vector<8x10xf32>, vector<8x10xf32>, vector<8x10xf32>, vector<8x10xf32>, vector<8x10xf32> -> vector<120x10xf32>
    %c5 = arith.constant 5 : index
    %c0_21 = arith.constant 0 : index
    %c0_22 = arith.constant 0 : index
    %215 = vector.load %arg3[%c5, %c0_21, %c0_22] : memref<21x40x80xf32, #tpu.memory_space<vmem>>, vector<1x10x20xf32>
    %216 = vector.shape_cast %215 : vector<1x10x20xf32> to vector<10x20xf32>
    %cst_23 = arith.constant dense<0.000000e+00> : vector<120x20xf32>
    %217 = tpu.matmul %214, %216, %cst_23 {dimension_numbers = #tpu.dot_dimension_numbers<[1], [0], [0], [1], [0, 0, 1, 1], [], []>} : vector<120x10xf32>, vector<10x20xf32>, vector<120x20xf32> -> vector<120x20xf32>
    %218 = arith.addf %183, %217 : vector<120x20xf32>
    %219 = vector.extract_strided_slice %7 {offsets = [2, 0, 0, 0], sizes = [1, 1, 8, 10], strides = [1, 1, 1, 1]} : vector<5x7x8x10xf32> to vector<1x1x8x10xf32>
    %220 = vector.shape_cast %219 : vector<1x1x8x10xf32> to vector<8x10xf32>
    %221 = vector.extract_strided_slice %7 {offsets = [2, 1, 0, 0], sizes = [1, 1, 8, 10], strides = [1, 1, 1, 1]} : vector<5x7x8x10xf32> to vector<1x1x8x10xf32>
    %222 = vector.shape_cast %221 : vector<1x1x8x10xf32> to vector<8x10xf32>
    %223 = vector.extract_strided_slice %7 {offsets = [2, 2, 0, 0], sizes = [1, 1, 8, 10], strides = [1, 1, 1, 1]} : vector<5x7x8x10xf32> to vector<1x1x8x10xf32>
    %224 = vector.shape_cast %223 : vector<1x1x8x10xf32> to vector<8x10xf32>
    %225 = vector.extract_strided_slice %7 {offsets = [2, 3, 0, 0], sizes = [1, 1, 8, 10], strides = [1, 1, 1, 1]} : vector<5x7x8x10xf32> to vector<1x1x8x10xf32>
    %226 = vector.shape_cast %225 : vector<1x1x8x10xf32> to vector<8x10xf32>
    %227 = vector.extract_strided_slice %7 {offsets = [2, 4, 0, 0], sizes = [1, 1, 8, 10], strides = [1, 1, 1, 1]} : vector<5x7x8x10xf32> to vector<1x1x8x10xf32>
    %228 = vector.shape_cast %227 : vector<1x1x8x10xf32> to vector<8x10xf32>
    %229 = vector.extract_strided_slice %7 {offsets = [3, 0, 0, 0], sizes = [1, 1, 8, 10], strides = [1, 1, 1, 1]} : vector<5x7x8x10xf32> to vector<1x1x8x10xf32>
    %230 = vector.shape_cast %229 : vector<1x1x8x10xf32> to vector<8x10xf32>
    %231 = vector.extract_strided_slice %7 {offsets = [3, 1, 0, 0], sizes = [1, 1, 8, 10], strides = [1, 1, 1, 1]} : vector<5x7x8x10xf32> to vector<1x1x8x10xf32>
    %232 = vector.shape_cast %231 : vector<1x1x8x10xf32> to vector<8x10xf32>
    %233 = vector.extract_strided_slice %7 {offsets = [3, 2, 0, 0], sizes = [1, 1, 8, 10], strides = [1, 1, 1, 1]} : vector<5x7x8x10xf32> to vector<1x1x8x10xf32>
    %234 = vector.shape_cast %233 : vector<1x1x8x10xf32> to vector<8x10xf32>
    %235 = vector.extract_strided_slice %7 {offsets = [3, 3, 0, 0], sizes = [1, 1, 8, 10], strides = [1, 1, 1, 1]} : vector<5x7x8x10xf32> to vector<1x1x8x10xf32>
    %236 = vector.shape_cast %235 : vector<1x1x8x10xf32> to vector<8x10xf32>
    %237 = vector.extract_strided_slice %7 {offsets = [3, 4, 0, 0], sizes = [1, 1, 8, 10], strides = [1, 1, 1, 1]} : vector<5x7x8x10xf32> to vector<1x1x8x10xf32>
    %238 = vector.shape_cast %237 : vector<1x1x8x10xf32> to vector<8x10xf32>
    %239 = vector.extract_strided_slice %7 {offsets = [4, 0, 0, 0], sizes = [1, 1, 8, 10], strides = [1, 1, 1, 1]} : vector<5x7x8x10xf32> to vector<1x1x8x10xf32>
    %240 = vector.shape_cast %239 : vector<1x1x8x10xf32> to vector<8x10xf32>
    %241 = vector.extract_strided_slice %7 {offsets = [4, 1, 0, 0], sizes = [1, 1, 8, 10], strides = [1, 1, 1, 1]} : vector<5x7x8x10xf32> to vector<1x1x8x10xf32>
    %242 = vector.shape_cast %241 : vector<1x1x8x10xf32> to vector<8x10xf32>
    %243 = vector.extract_strided_slice %7 {offsets = [4, 2, 0, 0], sizes = [1, 1, 8, 10], strides = [1, 1, 1, 1]} : vector<5x7x8x10xf32> to vector<1x1x8x10xf32>
    %244 = vector.shape_cast %243 : vector<1x1x8x10xf32> to vector<8x10xf32>
    %245 = vector.extract_strided_slice %7 {offsets = [4, 3, 0, 0], sizes = [1, 1, 8, 10], strides = [1, 1, 1, 1]} : vector<5x7x8x10xf32> to vector<1x1x8x10xf32>
    %246 = vector.shape_cast %245 : vector<1x1x8x10xf32> to vector<8x10xf32>
    %247 = vector.extract_strided_slice %7 {offsets = [4, 4, 0, 0], sizes = [1, 1, 8, 10], strides = [1, 1, 1, 1]} : vector<5x7x8x10xf32> to vector<1x1x8x10xf32>
    %248 = vector.shape_cast %247 : vector<1x1x8x10xf32> to vector<8x10xf32>
    %249 = tpu.concatenate %220, %222, %224, %226, %228, %230, %232, %234, %236, %238, %240, %242, %244, %246, %248 in 0 : vector<8x10xf32>, vector<8x10xf32>, vector<8x10xf32>, vector<8x10xf32>, vector<8x10xf32>, vector<8x10xf32>, vector<8x10xf32>, vector<8x10xf32>, vector<8x10xf32>, vector<8x10xf32>, vector<8x10xf32>, vector<8x10xf32>, vector<8x10xf32>, vector<8x10xf32>, vector<8x10xf32> -> vector<120x10xf32>
    %c6 = arith.constant 6 : index
    %c0_24 = arith.constant 0 : index
    %c0_25 = arith.constant 0 : index
    %250 = vector.load %arg3[%c6, %c0_24, %c0_25] : memref<21x40x80xf32, #tpu.memory_space<vmem>>, vector<1x10x20xf32>
    %251 = vector.shape_cast %250 : vector<1x10x20xf32> to vector<10x20xf32>
    %cst_26 = arith.constant dense<0.000000e+00> : vector<120x20xf32>
    %252 = tpu.matmul %249, %251, %cst_26 {dimension_numbers = #tpu.dot_dimension_numbers<[1], [0], [0], [1], [0, 0, 1, 1], [], []>} : vector<120x10xf32>, vector<10x20xf32>, vector<120x20xf32> -> vector<120x20xf32>
    %253 = arith.addf %218, %252 : vector<120x20xf32>
    %254 = vector.extract_strided_slice %7 {offsets = [2, 1, 0, 0], sizes = [1, 1, 8, 10], strides = [1, 1, 1, 1]} : vector<5x7x8x10xf32> to vector<1x1x8x10xf32>
    %255 = vector.shape_cast %254 : vector<1x1x8x10xf32> to vector<8x10xf32>
    %256 = vector.extract_strided_slice %7 {offsets = [2, 2, 0, 0], sizes = [1, 1, 8, 10], strides = [1, 1, 1, 1]} : vector<5x7x8x10xf32> to vector<1x1x8x10xf32>
    %257 = vector.shape_cast %256 : vector<1x1x8x10xf32> to vector<8x10xf32>
    %258 = vector.extract_strided_slice %7 {offsets = [2, 3, 0, 0], sizes = [1, 1, 8, 10], strides = [1, 1, 1, 1]} : vector<5x7x8x10xf32> to vector<1x1x8x10xf32>
    %259 = vector.shape_cast %258 : vector<1x1x8x10xf32> to vector<8x10xf32>
    %260 = vector.extract_strided_slice %7 {offsets = [2, 4, 0, 0], sizes = [1, 1, 8, 10], strides = [1, 1, 1, 1]} : vector<5x7x8x10xf32> to vector<1x1x8x10xf32>
    %261 = vector.shape_cast %260 : vector<1x1x8x10xf32> to vector<8x10xf32>
    %262 = vector.extract_strided_slice %7 {offsets = [2, 5, 0, 0], sizes = [1, 1, 8, 10], strides = [1, 1, 1, 1]} : vector<5x7x8x10xf32> to vector<1x1x8x10xf32>
    %263 = vector.shape_cast %262 : vector<1x1x8x10xf32> to vector<8x10xf32>
    %264 = vector.extract_strided_slice %7 {offsets = [3, 1, 0, 0], sizes = [1, 1, 8, 10], strides = [1, 1, 1, 1]} : vector<5x7x8x10xf32> to vector<1x1x8x10xf32>
    %265 = vector.shape_cast %264 : vector<1x1x8x10xf32> to vector<8x10xf32>
    %266 = vector.extract_strided_slice %7 {offsets = [3, 2, 0, 0], sizes = [1, 1, 8, 10], strides = [1, 1, 1, 1]} : vector<5x7x8x10xf32> to vector<1x1x8x10xf32>
    %267 = vector.shape_cast %266 : vector<1x1x8x10xf32> to vector<8x10xf32>
    %268 = vector.extract_strided_slice %7 {offsets = [3, 3, 0, 0], sizes = [1, 1, 8, 10], strides = [1, 1, 1, 1]} : vector<5x7x8x10xf32> to vector<1x1x8x10xf32>
    %269 = vector.shape_cast %268 : vector<1x1x8x10xf32> to vector<8x10xf32>
    %270 = vector.extract_strided_slice %7 {offsets = [3, 4, 0, 0], sizes = [1, 1, 8, 10], strides = [1, 1, 1, 1]} : vector<5x7x8x10xf32> to vector<1x1x8x10xf32>
    %271 = vector.shape_cast %270 : vector<1x1x8x10xf32> to vector<8x10xf32>
    %272 = vector.extract_strided_slice %7 {offsets = [3, 5, 0, 0], sizes = [1, 1, 8, 10], strides = [1, 1, 1, 1]} : vector<5x7x8x10xf32> to vector<1x1x8x10xf32>
    %273 = vector.shape_cast %272 : vector<1x1x8x10xf32> to vector<8x10xf32>
    %274 = vector.extract_strided_slice %7 {offsets = [4, 1, 0, 0], sizes = [1, 1, 8, 10], strides = [1, 1, 1, 1]} : vector<5x7x8x10xf32> to vector<1x1x8x10xf32>
    %275 = vector.shape_cast %274 : vector<1x1x8x10xf32> to vector<8x10xf32>
    %276 = vector.extract_strided_slice %7 {offsets = [4, 2, 0, 0], sizes = [1, 1, 8, 10], strides = [1, 1, 1, 1]} : vector<5x7x8x10xf32> to vector<1x1x8x10xf32>
    %277 = vector.shape_cast %276 : vector<1x1x8x10xf32> to vector<8x10xf32>
    %278 = vector.extract_strided_slice %7 {offsets = [4, 3, 0, 0], sizes = [1, 1, 8, 10], strides = [1, 1, 1, 1]} : vector<5x7x8x10xf32> to vector<1x1x8x10xf32>
    %279 = vector.shape_cast %278 : vector<1x1x8x10xf32> to vector<8x10xf32>
    %280 = vector.extract_strided_slice %7 {offsets = [4, 4, 0, 0], sizes = [1, 1, 8, 10], strides = [1, 1, 1, 1]} : vector<5x7x8x10xf32> to vector<1x1x8x10xf32>
    %281 = vector.shape_cast %280 : vector<1x1x8x10xf32> to vector<8x10xf32>
    %282 = vector.extract_strided_slice %7 {offsets = [4, 5, 0, 0], sizes = [1, 1, 8, 10], strides = [1, 1, 1, 1]} : vector<5x7x8x10xf32> to vector<1x1x8x10xf32>
    %283 = vector.shape_cast %282 : vector<1x1x8x10xf32> to vector<8x10xf32>
    %284 = tpu.concatenate %255, %257, %259, %261, %263, %265, %267, %269, %271, %273, %275, %277, %279, %281, %283 in 0 : vector<8x10xf32>, vector<8x10xf32>, vector<8x10xf32>, vector<8x10xf32>, vector<8x10xf32>, vector<8x10xf32>, vector<8x10xf32>, vector<8x10xf32>, vector<8x10xf32>, vector<8x10xf32>, vector<8x10xf32>, vector<8x10xf32>, vector<8x10xf32>, vector<8x10xf32>, vector<8x10xf32> -> vector<120x10xf32>
    %c7 = arith.constant 7 : index
    %c0_27 = arith.constant 0 : index
    %c0_28 = arith.constant 0 : index
    %285 = vector.load %arg3[%c7, %c0_27, %c0_28] : memref<21x40x80xf32, #tpu.memory_space<vmem>>, vector<1x10x20xf32>
    %286 = vector.shape_cast %285 : vector<1x10x20xf32> to vector<10x20xf32>
    %cst_29 = arith.constant dense<0.000000e+00> : vector<120x20xf32>
    %287 = tpu.matmul %284, %286, %cst_29 {dimension_numbers = #tpu.dot_dimension_numbers<[1], [0], [0], [1], [0, 0, 1, 1], [], []>} : vector<120x10xf32>, vector<10x20xf32>, vector<120x20xf32> -> vector<120x20xf32>
    %288 = arith.addf %253, %287 : vector<120x20xf32>
    %289 = vector.extract_strided_slice %7 {offsets = [2, 2, 0, 0], sizes = [1, 1, 8, 10], strides = [1, 1, 1, 1]} : vector<5x7x8x10xf32> to vector<1x1x8x10xf32>
    %290 = vector.shape_cast %289 : vector<1x1x8x10xf32> to vector<8x10xf32>
    %291 = vector.extract_strided_slice %7 {offsets = [2, 3, 0, 0], sizes = [1, 1, 8, 10], strides = [1, 1, 1, 1]} : vector<5x7x8x10xf32> to vector<1x1x8x10xf32>
    %292 = vector.shape_cast %291 : vector<1x1x8x10xf32> to vector<8x10xf32>
    %293 = vector.extract_strided_slice %7 {offsets = [2, 4, 0, 0], sizes = [1, 1, 8, 10], strides = [1, 1, 1, 1]} : vector<5x7x8x10xf32> to vector<1x1x8x10xf32>
    %294 = vector.shape_cast %293 : vector<1x1x8x10xf32> to vector<8x10xf32>
    %295 = vector.extract_strided_slice %7 {offsets = [2, 5, 0, 0], sizes = [1, 1, 8, 10], strides = [1, 1, 1, 1]} : vector<5x7x8x10xf32> to vector<1x1x8x10xf32>
    %296 = vector.shape_cast %295 : vector<1x1x8x10xf32> to vector<8x10xf32>
    %297 = vector.extract_strided_slice %7 {offsets = [2, 6, 0, 0], sizes = [1, 1, 8, 10], strides = [1, 1, 1, 1]} : vector<5x7x8x10xf32> to vector<1x1x8x10xf32>
    %298 = vector.shape_cast %297 : vector<1x1x8x10xf32> to vector<8x10xf32>
    %299 = vector.extract_strided_slice %7 {offsets = [3, 2, 0, 0], sizes = [1, 1, 8, 10], strides = [1, 1, 1, 1]} : vector<5x7x8x10xf32> to vector<1x1x8x10xf32>
    %300 = vector.shape_cast %299 : vector<1x1x8x10xf32> to vector<8x10xf32>
    %301 = vector.extract_strided_slice %7 {offsets = [3, 3, 0, 0], sizes = [1, 1, 8, 10], strides = [1, 1, 1, 1]} : vector<5x7x8x10xf32> to vector<1x1x8x10xf32>
    %302 = vector.shape_cast %301 : vector<1x1x8x10xf32> to vector<8x10xf32>
    %303 = vector.extract_strided_slice %7 {offsets = [3, 4, 0, 0], sizes = [1, 1, 8, 10], strides = [1, 1, 1, 1]} : vector<5x7x8x10xf32> to vector<1x1x8x10xf32>
    %304 = vector.shape_cast %303 : vector<1x1x8x10xf32> to vector<8x10xf32>
    %305 = vector.extract_strided_slice %7 {offsets = [3, 5, 0, 0], sizes = [1, 1, 8, 10], strides = [1, 1, 1, 1]} : vector<5x7x8x10xf32> to vector<1x1x8x10xf32>
    %306 = vector.shape_cast %305 : vector<1x1x8x10xf32> to vector<8x10xf32>
    %307 = vector.extract_strided_slice %7 {offsets = [3, 6, 0, 0], sizes = [1, 1, 8, 10], strides = [1, 1, 1, 1]} : vector<5x7x8x10xf32> to vector<1x1x8x10xf32>
    %308 = vector.shape_cast %307 : vector<1x1x8x10xf32> to vector<8x10xf32>
    %309 = vector.extract_strided_slice %7 {offsets = [4, 2, 0, 0], sizes = [1, 1, 8, 10], strides = [1, 1, 1, 1]} : vector<5x7x8x10xf32> to vector<1x1x8x10xf32>
    %310 = vector.shape_cast %309 : vector<1x1x8x10xf32> to vector<8x10xf32>
    %311 = vector.extract_strided_slice %7 {offsets = [4, 3, 0, 0], sizes = [1, 1, 8, 10], strides = [1, 1, 1, 1]} : vector<5x7x8x10xf32> to vector<1x1x8x10xf32>
    %312 = vector.shape_cast %311 : vector<1x1x8x10xf32> to vector<8x10xf32>
    %313 = vector.extract_strided_slice %7 {offsets = [4, 4, 0, 0], sizes = [1, 1, 8, 10], strides = [1, 1, 1, 1]} : vector<5x7x8x10xf32> to vector<1x1x8x10xf32>
    %314 = vector.shape_cast %313 : vector<1x1x8x10xf32> to vector<8x10xf32>
    %315 = vector.extract_strided_slice %7 {offsets = [4, 5, 0, 0], sizes = [1, 1, 8, 10], strides = [1, 1, 1, 1]} : vector<5x7x8x10xf32> to vector<1x1x8x10xf32>
    %316 = vector.shape_cast %315 : vector<1x1x8x10xf32> to vector<8x10xf32>
    %317 = vector.extract_strided_slice %7 {offsets = [4, 6, 0, 0], sizes = [1, 1, 8, 10], strides = [1, 1, 1, 1]} : vector<5x7x8x10xf32> to vector<1x1x8x10xf32>
    %318 = vector.shape_cast %317 : vector<1x1x8x10xf32> to vector<8x10xf32>
    %319 = tpu.concatenate %290, %292, %294, %296, %298, %300, %302, %304, %306, %308, %310, %312, %314, %316, %318 in 0 : vector<8x10xf32>, vector<8x10xf32>, vector<8x10xf32>, vector<8x10xf32>, vector<8x10xf32>, vector<8x10xf32>, vector<8x10xf32>, vector<8x10xf32>, vector<8x10xf32>, vector<8x10xf32>, vector<8x10xf32>, vector<8x10xf32>, vector<8x10xf32>, vector<8x10xf32>, vector<8x10xf32> -> vector<120x10xf32>
    %c8 = arith.constant 8 : index
    %c0_30 = arith.constant 0 : index
    %c0_31 = arith.constant 0 : index
    %320 = vector.load %arg3[%c8, %c0_30, %c0_31] : memref<21x40x80xf32, #tpu.memory_space<vmem>>, vector<1x10x20xf32>
    %321 = vector.shape_cast %320 : vector<1x10x20xf32> to vector<10x20xf32>
    %cst_32 = arith.constant dense<0.000000e+00> : vector<120x20xf32>
    %322 = tpu.matmul %319, %321, %cst_32 {dimension_numbers = #tpu.dot_dimension_numbers<[1], [0], [0], [1], [0, 0, 1, 1], [], []>} : vector<120x10xf32>, vector<10x20xf32>, vector<120x20xf32> -> vector<120x20xf32>
    %323 = arith.addf %288, %322 : vector<120x20xf32>
    %324 = vector.broadcast %1 : vector<1x20xf32> to vector<120x20xf32>
    %325 = arith.addf %323, %324 : vector<120x20xf32>
    %cst_33 = arith.constant 0.000000e+00 : f32
    %326 = vector.broadcast %cst_33 : f32 to vector<120x20xf32>
    %327 = arith.maximumf %325, %326 : vector<120x20xf32>
    %cst_34 = arith.constant 0.000000e+00 : f32
    %328 = vector.broadcast %cst_34 : f32 to vector<24x40xf32>
    %329 = vector.extract_strided_slice %327 {offsets = [0, 0], sizes = [24, 20], strides = [1, 1]} : vector<120x20xf32> to vector<24x20xf32>
    %c9 = arith.constant 9 : index
    %c0_35 = arith.constant 0 : index
    %c0_36 = arith.constant 0 : index
    %330 = vector.load %arg3[%c9, %c0_35, %c0_36] : memref<21x40x80xf32, #tpu.memory_space<vmem>>, vector<1x20x40xf32>
    %331 = vector.shape_cast %330 : vector<1x20x40xf32> to vector<20x40xf32>
    %cst_37 = arith.constant dense<0.000000e+00> : vector<24x40xf32>
    %332 = tpu.matmul %329, %331, %cst_37 {dimension_numbers = #tpu.dot_dimension_numbers<[1], [0], [0], [1], [0, 0, 1, 1], [], []>} : vector<24x20xf32>, vector<20x40xf32>, vector<24x40xf32> -> vector<24x40xf32>
    %333 = arith.addf %328, %332 : vector<24x40xf32>
    %334 = vector.extract_strided_slice %327 {offsets = [8, 0], sizes = [24, 20], strides = [1, 1]} : vector<120x20xf32> to vector<24x20xf32>
    %c10 = arith.constant 10 : index
    %c0_38 = arith.constant 0 : index
    %c0_39 = arith.constant 0 : index
    %335 = vector.load %arg3[%c10, %c0_38, %c0_39] : memref<21x40x80xf32, #tpu.memory_space<vmem>>, vector<1x20x40xf32>
    %336 = vector.shape_cast %335 : vector<1x20x40xf32> to vector<20x40xf32>
    %cst_40 = arith.constant dense<0.000000e+00> : vector<24x40xf32>
    %337 = tpu.matmul %334, %336, %cst_40 {dimension_numbers = #tpu.dot_dimension_numbers<[1], [0], [0], [1], [0, 0, 1, 1], [], []>} : vector<24x20xf32>, vector<20x40xf32>, vector<24x40xf32> -> vector<24x40xf32>
    %338 = arith.addf %333, %337 : vector<24x40xf32>
    %339 = vector.extract_strided_slice %327 {offsets = [16, 0], sizes = [24, 20], strides = [1, 1]} : vector<120x20xf32> to vector<24x20xf32>
    %c11 = arith.constant 11 : index
    %c0_41 = arith.constant 0 : index
    %c0_42 = arith.constant 0 : index
    %340 = vector.load %arg3[%c11, %c0_41, %c0_42] : memref<21x40x80xf32, #tpu.memory_space<vmem>>, vector<1x20x40xf32>
    %341 = vector.shape_cast %340 : vector<1x20x40xf32> to vector<20x40xf32>
    %cst_43 = arith.constant dense<0.000000e+00> : vector<24x40xf32>
    %342 = tpu.matmul %339, %341, %cst_43 {dimension_numbers = #tpu.dot_dimension_numbers<[1], [0], [0], [1], [0, 0, 1, 1], [], []>} : vector<24x20xf32>, vector<20x40xf32>, vector<24x40xf32> -> vector<24x40xf32>
    %343 = arith.addf %338, %342 : vector<24x40xf32>
    %344 = vector.extract_strided_slice %327 {offsets = [40, 0], sizes = [24, 20], strides = [1, 1]} : vector<120x20xf32> to vector<24x20xf32>
    %c12 = arith.constant 12 : index
    %c0_44 = arith.constant 0 : index
    %c0_45 = arith.constant 0 : index
    %345 = vector.load %arg3[%c12, %c0_44, %c0_45] : memref<21x40x80xf32, #tpu.memory_space<vmem>>, vector<1x20x40xf32>
    %346 = vector.shape_cast %345 : vector<1x20x40xf32> to vector<20x40xf32>
    %cst_46 = arith.constant dense<0.000000e+00> : vector<24x40xf32>
    %347 = tpu.matmul %344, %346, %cst_46 {dimension_numbers = #tpu.dot_dimension_numbers<[1], [0], [0], [1], [0, 0, 1, 1], [], []>} : vector<24x20xf32>, vector<20x40xf32>, vector<24x40xf32> -> vector<24x40xf32>
    %348 = arith.addf %343, %347 : vector<24x40xf32>
    %349 = vector.extract_strided_slice %327 {offsets = [48, 0], sizes = [24, 20], strides = [1, 1]} : vector<120x20xf32> to vector<24x20xf32>
    %c13 = arith.constant 13 : index
    %c0_47 = arith.constant 0 : index
    %c0_48 = arith.constant 0 : index
    %350 = vector.load %arg3[%c13, %c0_47, %c0_48] : memref<21x40x80xf32, #tpu.memory_space<vmem>>, vector<1x20x40xf32>
    %351 = vector.shape_cast %350 : vector<1x20x40xf32> to vector<20x40xf32>
    %cst_49 = arith.constant dense<0.000000e+00> : vector<24x40xf32>
    %352 = tpu.matmul %349, %351, %cst_49 {dimension_numbers = #tpu.dot_dimension_numbers<[1], [0], [0], [1], [0, 0, 1, 1], [], []>} : vector<24x20xf32>, vector<20x40xf32>, vector<24x40xf32> -> vector<24x40xf32>
    %353 = arith.addf %348, %352 : vector<24x40xf32>
    %354 = vector.extract_strided_slice %327 {offsets = [56, 0], sizes = [24, 20], strides = [1, 1]} : vector<120x20xf32> to vector<24x20xf32>
    %c14 = arith.constant 14 : index
    %c0_50 = arith.constant 0 : index
    %c0_51 = arith.constant 0 : index
    %355 = vector.load %arg3[%c14, %c0_50, %c0_51] : memref<21x40x80xf32, #tpu.memory_space<vmem>>, vector<1x20x40xf32>
    %356 = vector.shape_cast %355 : vector<1x20x40xf32> to vector<20x40xf32>
    %cst_52 = arith.constant dense<0.000000e+00> : vector<24x40xf32>
    %357 = tpu.matmul %354, %356, %cst_52 {dimension_numbers = #tpu.dot_dimension_numbers<[1], [0], [0], [1], [0, 0, 1, 1], [], []>} : vector<24x20xf32>, vector<20x40xf32>, vector<24x40xf32> -> vector<24x40xf32>
    %358 = arith.addf %353, %357 : vector<24x40xf32>
    %359 = vector.extract_strided_slice %327 {offsets = [80, 0], sizes = [24, 20], strides = [1, 1]} : vector<120x20xf32> to vector<24x20xf32>
    %c15 = arith.constant 15 : index
    %c0_53 = arith.constant 0 : index
    %c0_54 = arith.constant 0 : index
    %360 = vector.load %arg3[%c15, %c0_53, %c0_54] : memref<21x40x80xf32, #tpu.memory_space<vmem>>, vector<1x20x40xf32>
    %361 = vector.shape_cast %360 : vector<1x20x40xf32> to vector<20x40xf32>
    %cst_55 = arith.constant dense<0.000000e+00> : vector<24x40xf32>
    %362 = tpu.matmul %359, %361, %cst_55 {dimension_numbers = #tpu.dot_dimension_numbers<[1], [0], [0], [1], [0, 0, 1, 1], [], []>} : vector<24x20xf32>, vector<20x40xf32>, vector<24x40xf32> -> vector<24x40xf32>
    %363 = arith.addf %358, %362 : vector<24x40xf32>
    %364 = vector.extract_strided_slice %327 {offsets = [88, 0], sizes = [24, 20], strides = [1, 1]} : vector<120x20xf32> to vector<24x20xf32>
    %c16 = arith.constant 16 : index
    %c0_56 = arith.constant 0 : index
    %c0_57 = arith.constant 0 : index
    %365 = vector.load %arg3[%c16, %c0_56, %c0_57] : memref<21x40x80xf32, #tpu.memory_space<vmem>>, vector<1x20x40xf32>
    %366 = vector.shape_cast %365 : vector<1x20x40xf32> to vector<20x40xf32>
    %cst_58 = arith.constant dense<0.000000e+00> : vector<24x40xf32>
    %367 = tpu.matmul %364, %366, %cst_58 {dimension_numbers = #tpu.dot_dimension_numbers<[1], [0], [0], [1], [0, 0, 1, 1], [], []>} : vector<24x20xf32>, vector<20x40xf32>, vector<24x40xf32> -> vector<24x40xf32>
    %368 = arith.addf %363, %367 : vector<24x40xf32>
    %369 = vector.extract_strided_slice %327 {offsets = [96, 0], sizes = [24, 20], strides = [1, 1]} : vector<120x20xf32> to vector<24x20xf32>
    %c17 = arith.constant 17 : index
    %c0_59 = arith.constant 0 : index
    %c0_60 = arith.constant 0 : index
    %370 = vector.load %arg3[%c17, %c0_59, %c0_60] : memref<21x40x80xf32, #tpu.memory_space<vmem>>, vector<1x20x40xf32>
    %371 = vector.shape_cast %370 : vector<1x20x40xf32> to vector<20x40xf32>
    %cst_61 = arith.constant dense<0.000000e+00> : vector<24x40xf32>
    %372 = tpu.matmul %369, %371, %cst_61 {dimension_numbers = #tpu.dot_dimension_numbers<[1], [0], [0], [1], [0, 0, 1, 1], [], []>} : vector<24x20xf32>, vector<20x40xf32>, vector<24x40xf32> -> vector<24x40xf32>
    %373 = arith.addf %368, %372 : vector<24x40xf32>
    %374 = vector.broadcast %2 : vector<1x40xf32> to vector<24x40xf32>
    %375 = arith.addf %373, %374 : vector<24x40xf32>
    %cst_62 = arith.constant 0.000000e+00 : f32
    %376 = vector.broadcast %cst_62 : f32 to vector<24x40xf32>
    %377 = arith.maximumf %375, %376 : vector<24x40xf32>
    %cst_63 = arith.constant 0.000000e+00 : f32
    %378 = vector.broadcast %cst_63 : f32 to vector<8x40xf32>
    %379 = vector.extract_strided_slice %377 {offsets = [0, 0], sizes = [16, 40], strides = [1, 1]} : vector<24x40xf32> to vector<16x40xf32>
    %380 = tpu.concatenate %378, %379 in 0 : vector<8x40xf32>, vector<16x40xf32> -> vector<24x40xf32>
    %381 = vector.extract_strided_slice %377 {offsets = [8, 0], sizes = [16, 40], strides = [1, 1]} : vector<24x40xf32> to vector<16x40xf32>
    %382 = tpu.concatenate %381, %378 in 0 : vector<16x40xf32>, vector<8x40xf32> -> vector<24x40xf32>
    %cst_64 = arith.constant 0.000000e+00 : f32
    %383 = vector.broadcast %cst_64 : f32 to vector<24x80xf32>
    %c18 = arith.constant 18 : index
    %c0_65 = arith.constant 0 : index
    %c0_66 = arith.constant 0 : index
    %384 = vector.load %arg3[%c18, %c0_65, %c0_66] : memref<21x40x80xf32, #tpu.memory_space<vmem>>, vector<1x40x80xf32>
    %385 = vector.shape_cast %384 : vector<1x40x80xf32> to vector<40x80xf32>
    %cst_67 = arith.constant dense<0.000000e+00> : vector<24x80xf32>
    %386 = tpu.matmul %380, %385, %cst_67 {dimension_numbers = #tpu.dot_dimension_numbers<[1], [0], [0], [1], [0, 0, 1, 1], [], []>} : vector<24x40xf32>, vector<40x80xf32>, vector<24x80xf32> -> vector<24x80xf32>
    %387 = arith.addf %383, %386 : vector<24x80xf32>
    %c19 = arith.constant 19 : index
    %c0_68 = arith.constant 0 : index
    %c0_69 = arith.constant 0 : index
    %388 = vector.load %arg3[%c19, %c0_68, %c0_69] : memref<21x40x80xf32, #tpu.memory_space<vmem>>, vector<1x40x80xf32>
    %389 = vector.shape_cast %388 : vector<1x40x80xf32> to vector<40x80xf32>
    %cst_70 = arith.constant dense<0.000000e+00> : vector<24x80xf32>
    %390 = tpu.matmul %377, %389, %cst_70 {dimension_numbers = #tpu.dot_dimension_numbers<[1], [0], [0], [1], [0, 0, 1, 1], [], []>} : vector<24x40xf32>, vector<40x80xf32>, vector<24x80xf32> -> vector<24x80xf32>
    %391 = arith.addf %387, %390 : vector<24x80xf32>
    %c20 = arith.constant 20 : index
    %c0_71 = arith.constant 0 : index
    %c0_72 = arith.constant 0 : index
    %392 = vector.load %arg3[%c20, %c0_71, %c0_72] : memref<21x40x80xf32, #tpu.memory_space<vmem>>, vector<1x40x80xf32>
    %393 = vector.shape_cast %392 : vector<1x40x80xf32> to vector<40x80xf32>
    %cst_73 = arith.constant dense<0.000000e+00> : vector<24x80xf32>
    %394 = tpu.matmul %382, %393, %cst_73 {dimension_numbers = #tpu.dot_dimension_numbers<[1], [0], [0], [1], [0, 0, 1, 1], [], []>} : vector<24x40xf32>, vector<40x80xf32>, vector<24x80xf32> -> vector<24x80xf32>
    %395 = arith.addf %391, %394 : vector<24x80xf32>
    %396 = vector.broadcast %3 : vector<1x80xf32> to vector<24x80xf32>
    %397 = arith.addf %395, %396 : vector<24x80xf32>
    %cst_74 = arith.constant 0.000000e+00 : f32
    %398 = vector.broadcast %cst_74 : f32 to vector<24x80xf32>
    %399 = arith.maximumf %397, %398 : vector<24x80xf32>
    %400 = vector.extract_strided_slice %399 {offsets = [0, 0], sizes = [8, 80], strides = [1, 1]} : vector<24x80xf32> to vector<8x80xf32>
    %401 = vector.extract_strided_slice %399 {offsets = [8, 0], sizes = [8, 80], strides = [1, 1]} : vector<24x80xf32> to vector<8x80xf32>
    %402 = vector.extract_strided_slice %399 {offsets = [16, 0], sizes = [8, 80], strides = [1, 1]} : vector<24x80xf32> to vector<8x80xf32>
    %403 = tpu.concatenate %400, %401, %402 in 1 : vector<8x80xf32>, vector<8x80xf32>, vector<8x80xf32> -> vector<8x240xf32>
    %c0_75 = arith.constant 0 : index
    %c0_76 = arith.constant 0 : index
    %404 = vector.load %arg2[%c0_75, %c0_76] : memref<8x32xf32, #tpu.memory_space<vmem>>, vector<8x32xf32>
    %c0_77 = arith.constant 0 : index
    %c0_78 = arith.constant 0 : index
    %405 = vector.load %arg4[%c0_77, %c0_78] : memref<304x96xf32, #tpu.memory_space<vmem>>, vector<240x96xf32>
    %cst_79 = arith.constant dense<0.000000e+00> : vector<8x96xf32>
    %406 = tpu.matmul %403, %405, %cst_79 {dimension_numbers = #tpu.dot_dimension_numbers<[1], [0], [0], [1], [0, 0, 1, 1], [], []>} : vector<8x240xf32>, vector<240x96xf32>, vector<8x96xf32> -> vector<8x96xf32>
    %407 = vector.broadcast %4 : vector<1x96xf32> to vector<8x96xf32>
    %408 = arith.addf %406, %407 : vector<8x96xf32>
    %c240 = arith.constant 240 : index
    %c0_80 = arith.constant 0 : index
    %409 = vector.load %arg4[%c240, %c0_80] : memref<304x96xf32, #tpu.memory_space<vmem>>, vector<32x96xf32>
    %cst_81 = arith.constant dense<0.000000e+00> : vector<8x96xf32>
    %410 = tpu.matmul %404, %409, %cst_81 {dimension_numbers = #tpu.dot_dimension_numbers<[1], [0], [0], [1], [0, 0, 1, 1], [], []>} : vector<8x32xf32>, vector<32x96xf32>, vector<8x96xf32> -> vector<8x96xf32>
    %411 = vector.broadcast %5 : vector<1x96xf32> to vector<8x96xf32>
    %412 = arith.addf %410, %411 : vector<8x96xf32>
    %413 = vector.extract_strided_slice %408 {offsets = [0, 0], sizes = [8, 32], strides = [1, 1]} : vector<8x96xf32> to vector<8x32xf32>
    %414 = vector.extract_strided_slice %412 {offsets = [0, 0], sizes = [8, 32], strides = [1, 1]} : vector<8x96xf32> to vector<8x32xf32>
    %415 = arith.addf %413, %414 : vector<8x32xf32>
    %416 = arith.negf %415 : vector<8x32xf32>
    %417 = math.exp %416 : vector<8x32xf32>
    %cst_82 = arith.constant 1.000000e+00 : f32
    %418 = vector.broadcast %cst_82 : f32 to vector<8x32xf32>
    %419 = arith.addf %418, %417 : vector<8x32xf32>
    %420 = arith.divf %418, %419 : vector<8x32xf32>
    %421 = vector.extract_strided_slice %408 {offsets = [0, 32], sizes = [8, 32], strides = [1, 1]} : vector<8x96xf32> to vector<8x32xf32>
    %422 = vector.extract_strided_slice %412 {offsets = [0, 32], sizes = [8, 32], strides = [1, 1]} : vector<8x96xf32> to vector<8x32xf32>
    %423 = arith.addf %421, %422 : vector<8x32xf32>
    %424 = arith.negf %423 : vector<8x32xf32>
    %425 = math.exp %424 : vector<8x32xf32>
    %cst_83 = arith.constant 1.000000e+00 : f32
    %426 = vector.broadcast %cst_83 : f32 to vector<8x32xf32>
    %427 = arith.addf %426, %425 : vector<8x32xf32>
    %428 = arith.divf %426, %427 : vector<8x32xf32>
    %429 = vector.extract_strided_slice %408 {offsets = [0, 64], sizes = [8, 32], strides = [1, 1]} : vector<8x96xf32> to vector<8x32xf32>
    %430 = vector.extract_strided_slice %412 {offsets = [0, 64], sizes = [8, 32], strides = [1, 1]} : vector<8x96xf32> to vector<8x32xf32>
    %431 = arith.mulf %420, %430 : vector<8x32xf32>
    %432 = arith.addf %429, %431 : vector<8x32xf32>
    %433 = math.tanh %432 : vector<8x32xf32>
    %cst_84 = arith.constant 1.000000e+00 : f32
    %434 = vector.broadcast %cst_84 : f32 to vector<8x32xf32>
    %435 = arith.subf %434, %428 : vector<8x32xf32>
    %436 = arith.mulf %435, %433 : vector<8x32xf32>
    %437 = arith.mulf %428, %404 : vector<8x32xf32>
    %438 = arith.addf %436, %437 : vector<8x32xf32>
    %c272 = arith.constant 272 : index
    %c0_85 = arith.constant 0 : index
    %439 = vector.load %arg4[%c272, %c0_85] : memref<304x96xf32, #tpu.memory_space<vmem>>, vector<32x6xf32>
    %cst_86 = arith.constant dense<0.000000e+00> : vector<8x6xf32>
    %440 = tpu.matmul %438, %439, %cst_86 {dimension_numbers = #tpu.dot_dimension_numbers<[1], [0], [0], [1], [0, 0, 1, 1], [], []>} : vector<8x32xf32>, vector<32x6xf32>, vector<8x6xf32> -> vector<8x6xf32>
    %441 = vector.broadcast %6 : vector<1x6xf32> to vector<8x6xf32>
    %442 = arith.addf %440, %441 : vector<8x6xf32>
    %cst_87 = arith.constant 0.000000e+00 : f32
    %443 = vector.broadcast %cst_87 : f32 to vector<8x90xf32>
    %444 = tpu.concatenate %438, %442, %443 in 1 : vector<8x32xf32>, vector<8x6xf32>, vector<8x90xf32> -> vector<8x128xf32>
    %c0_88 = arith.constant 0 : index
    %c0_89 = arith.constant 0 : index
    %445 = vector.load %arg6[%c0_88, %c0_89] : memref<8x128xf32, #tpu.memory_space<vmem>>, vector<8x128xf32>
    tpu.vector_store %arg6[%c0_88, %c0_89], %444 {strides = array<i32>} : memref<8x128xf32, #tpu.memory_space<vmem>>, vector<8x128xf32>,
    return
  }
  func.func @transform_0(%arg0: i32) -> (i32, i32, i32, i32) {
    %c0_i32 = arith.constant 0 : i32
    %c0_i32_0 = arith.constant 0 : i32
    %c0_i32_1 = arith.constant 0 : i32
    %c0_i32_2 = arith.constant 0 : i32
    return %c0_i32, %c0_i32_0, %arg0, %c0_i32_1 : i32, i32, i32, i32
  }
  func.func @transform_1(%arg0: i32) -> (i32, i32) {
    %c0_i32 = arith.constant 0 : i32
    %c0_i32_0 = arith.constant 0 : i32
    return %arg0, %c0_i32 : i32, i32
  }
  func.func @transform_2(%arg0: i32) -> (i32, i32, i32) {
    %c0_i32 = arith.constant 0 : i32
    %c0_i32_0 = arith.constant 0 : i32
    %c0_i32_1 = arith.constant 0 : i32
    %c0_i32_2 = arith.constant 0 : i32
    return %c0_i32, %c0_i32_0, %c0_i32_1 : i32, i32, i32
  }
  func.func @transform_3(%arg0: i32) -> (i32, i32) {
    %c0_i32 = arith.constant 0 : i32
    %c0_i32_0 = arith.constant 0 : i32
    %c0_i32_1 = arith.constant 0 : i32
    return %c0_i32, %c0_i32_0 : i32, i32
  }
  func.func @transform_4(%arg0: i32) -> (i32, i32) {
    %c0_i32 = arith.constant 0 : i32
    %c0_i32_0 = arith.constant 0 : i32
    %c0_i32_1 = arith.constant 0 : i32
    return %c0_i32, %c0_i32_0 : i32, i32
  }
  func.func @transform_5(%arg0: i32) -> (i32, i32) {
    %c0_i32 = arith.constant 0 : i32
    %c0_i32_0 = arith.constant 0 : i32
    return %arg0, %c0_i32 : i32, i32
  }
}

</mosaic_0001>

<bundles_post_ra>
// kernel: forward.1
= control target key start
LH: loop header
LB: loop body
LE: loop exit
PB: predicated region body
PF: predicated region fallthrough
CT: control target
= control target key end

     0   :  { %s4942_s18 = smov 0   ;;  %s4944_s19 = smov 0   ;;  %s6448_s0 = inlined_call_operand.vmem [shape: f32[5,7,16,10], index: 0, kind: input, shape index: {}]   ;;  %s6449_s1 = inlined_call_operand.vmem [shape: f32[16,32], index: 1, kind: input, shape index: {}]   ;;  %s6450_s2 = inlined_call_operand.vmem [shape: f32[21,40,80], index: 2, kind: input, shape index: {}]   ;;  %s6451_s3 = inlined_call_operand.vmem [shape: f32[304,96], index: 3, kind: input, shape index: {}]   ;;  %s6452_s4 = inlined_call_operand.vmem [shape: f32[8,128], index: 4, kind: input, shape index: {}]   ;;  %s6453_s5 = inlined_call_operand.vmem [shape: f32[16,128], index: 5, kind: output, shape index: {}]  }
   0x1   :  { %s4946_s20 = smov 0  }
   0x2 LB: > { %s3544_s21 = sadd.s32 4294967295, %s4902_s20   ;;  %s4959_s22 = sadd.s32 1, %s4902_s20   ;;  %s4902_s20 = sphi %s4946_s20, %s6458_s20   ;;  %s4898_s19 = sphi %s4944_s19, %s6457_s19   ;;  %s4894_s18 = sphi %s4942_s18, %s6456_s18  }
   0x3   : > { %s19_s23 = ssub.s32 %s4902_s20, %s4959_s22  ;;  %s22_s24 = sadd.s32 1, %s4898_s19 }
   0x4   : > { %p20_p0 = scmp.eq.s32.totalorder %s19_s23, 0  ;;  %p29_p1 = scmp.ne.s32.totalorder %s4898_s19, %s4894_s18 }
   0x5   : > { %p30_p2 = scmp.eq.s32.totalorder %s4902_s20, 0  ;;  %p3547_p4 = scmp.ge.s32.totalorder %s4902_s20, 2 }
   0x6   : > { %s4968_s25 = scalar_select %p20_p0, %s4898_s19, %s22_s24  }
   0x7   : > { %p31_p3 = por %p30_p2, %p29_p1  ;;  %179 = sbr.rel (%p3547_p4) target bundleno = 36 (0x24), region = 28 }
   0xe   : > { %182 = sbr.rel (!%p31_p3) target bundleno = 36 (0x24), region = 32  ;;  %s184_s26 = sand.u32 (%p31_p3), 1, %s4898_s19  }
   0xf   : > { %s3548_s27 = sshll.u32 (%p31_p3), %s4902_s20, 3  ;;  %s4839_s28 = smul.u32 (%p31_p3), 280, %s184_s26 }
  0x10   : > { %s4976_s6 = scalar_lea.vmem (%p31_p3), %s6448_s0, %s3548_s27 }
  0x11   : > { %v284_v0 = vld [vmem:[%s4976_s6] sm:$0xff] (%p31_p3)  ;;  %v286_v1 = vld [vmem:[%s4976_s6 + $0x10] sm:$0xff] (%p31_p3)  ;;  %s4984_s7 = scalar_lea.vmem (%p31_p3), [#allocation2], %s4839_s28 }
  0x12   : > { %v288_v2 = vld [vmem:[%s4976_s6 + $0x20] sm:$0xff] (%p31_p3)  ;;  %v290_v3 = vld [vmem:[%s4976_s6 + $0x30] sm:$0xff] (%p31_p3)  ;;  %285 = vst [vmem:[%s4984_s7] sm:$0xff] (%p31_p3), %v284_v0  ;;  %287 = vst [vmem:[%s4984_s7 + $0x8] sm:$0xff] (%p31_p3), %v286_v1 }
  0x13   : > { %v292_v4 = vld [vmem:[%s4976_s6 + $0x40] sm:$0xff] (%p31_p3)  ;;  %v294_v5 = vld [vmem:[%s4976_s6 + $0x50] sm:$0xff] (%p31_p3)  ;;  %289 = vst [vmem:[%s4984_s7 + $0x10] sm:$0xff] (%p31_p3), %v288_v2  ;;  %291 = vst [vmem:[%s4984_s7 + $0x18] sm:$0xff] (%p31_p3), %v290_v3 }
  0x14   : > { %293 = vst [vmem:[%s4984_s7 + $0x20] sm:$0xff] (%p31_p3), %v292_v4  ;;  %295 = vst [vmem:[%s4984_s7 + $0x28] sm:$0xff] (%p31_p3), %v294_v5  ;;  %v296_v6 = vld [vmem:[%s4976_s6 + $0x60] sm:$0xff] (%p31_p3)  ;;  %v298_v7 = vld [vmem:[%s4976_s6 + $0x70] sm:$0xff] (%p31_p3) }
  0x15   : > { %v300_v8 = vld [vmem:[%s4976_s6 + $0x80] sm:$0xff]  ;;  %297 = vst [vmem:[%s4984_s7 + $0x30] sm:$0xff] %v296_v6  ;;  %299 = vst [vmem:[%s4984_s7 + $0x38] sm:$0xff] %v298_v7  ;;  %v302_v9 = vld [vmem:[%s4976_s6 + $0x90] sm:$0xff] }
  0x16   : > { %301 = vst [vmem:[%s4984_s7 + $0x40] sm:$0xff] %v300_v8  ;;  %v304_v10 = vld [vmem:[%s4976_s6 + $0xa0] sm:$0xff]  ;;  %v306_v11 = vld [vmem:[%s4976_s6 + $0xb0] sm:$0xff]  ;;  %303 = vst [vmem:[%s4984_s7 + $0x48] sm:$0xff] %v302_v9 }
  0x17   : > { %305 = vst [vmem:[%s4984_s7 + $0x50] sm:$0xff] %v304_v10  ;;  %307 = vst [vmem:[%s4984_s7 + $0x58] sm:$0xff] %v306_v11  ;;  %v308_v12 = vld [vmem:[%s4976_s6 + $0xc0] sm:$0xff]  ;;  %v310_v13 = vld [vmem:[%s4976_s6 + $0xd0] sm:$0xff] }
  0x18   : > { %v312_v14 = vld [vmem:[%s4976_s6 + $0xe0] sm:$0xff]  ;;  %309 = vst [vmem:[%s4984_s7 + $0x60] sm:$0xff] %v308_v12  ;;  %311 = vst [vmem:[%s4984_s7 + $0x68] sm:$0xff] %v310_v13  ;;  %v314_v15 = vld [vmem:[%s4976_s6 + $0xf0] sm:$0xff] }
  0x19   : > { %313 = vst [vmem:[%s4984_s7 + $0x70] sm:$0xff] %v312_v14  ;;  %v316_v16 = vld [vmem:[%s4976_s6 + $0x100] sm:$0xff]  ;;  %v318_v17 = vld [vmem:[%s4976_s6 + $0x110] sm:$0xff]  ;;  %315 = vst [vmem:[%s4984_s7 + $0x78] sm:$0xff] %v314_v15 }
  0x1a   : > { %317 = vst [vmem:[%s4984_s7 + $0x80] sm:$0xff] %v316_v16  ;;  %319 = vst [vmem:[%s4984_s7 + $0x88] sm:$0xff] %v318_v17  ;;  %v320_v18 = vld [vmem:[%s4976_s6 + $0x120] sm:$0xff]  ;;  %v322_v19 = vld [vmem:[%s4976_s6 + $0x130] sm:$0xff] }
  0x1b   : > { %v324_v20 = vld [vmem:[%s4976_s6 + $0x140] sm:$0xff]  ;;  %321 = vst [vmem:[%s4984_s7 + $0x90] sm:$0xff] %v320_v18  ;;  %323 = vst [vmem:[%s4984_s7 + $0x98] sm:$0xff] %v322_v19  ;;  %v326_v21 = vld [vmem:[%s4976_s6 + $0x150] sm:$0xff] }
  0x1c   : > { %325 = vst [vmem:[%s4984_s7 + $0xa0] sm:$0xff] %v324_v20  ;;  %v328_v22 = vld [vmem:[%s4976_s6 + $0x160] sm:$0xff]  ;;  %v330_v23 = vld [vmem:[%s4976_s6 + $0x170] sm:$0xff]  ;;  %327 = vst [vmem:[%s4984_s7 + $0xa8] sm:$0xff] %v326_v21 }
  0x1d   : > { %329 = vst [vmem:[%s4984_s7 + $0xb0] sm:$0xff] %v328_v22  ;;  %331 = vst [vmem:[%s4984_s7 + $0xb8] sm:$0xff] %v330_v23  ;;  %v332_v24 = vld [vmem:[%s4976_s6 + $0x180] sm:$0xff]  ;;  %v334_v25 = vld [vmem:[%s4976_s6 + $0x190] sm:$0xff] }
  0x1e   : > { %v336_v26 = vld [vmem:[%s4976_s6 + $0x1a0] sm:$0xff]  ;;  %333 = vst [vmem:[%s4984_s7 + $0xc0] sm:$0xff] %v332_v24  ;;  %335 = vst [vmem:[%s4984_s7 + $0xc8] sm:$0xff] %v334_v25  ;;  %v338_v27 = vld [vmem:[%s4976_s6 + $0x1b0] sm:$0xff] }
  0x1f   : > { %337 = vst [vmem:[%s4984_s7 + $0xd0] sm:$0xff] %v336_v26  ;;  %v340_v28 = vld [vmem:[%s4976_s6 + $0x1c0] sm:$0xff]  ;;  %v342_v29 = vld [vmem:[%s4976_s6 + $0x1d0] sm:$0xff]  ;;  %339 = vst [vmem:[%s4984_s7 + $0xd8] sm:$0xff] %v338_v27 }
  0x20   : > { %341 = vst [vmem:[%s4984_s7 + $0xe0] sm:$0xff] %v340_v28  ;;  %343 = vst [vmem:[%s4984_s7 + $0xe8] sm:$0xff] %v342_v29  ;;  %v344_v30 = vld [vmem:[%s4976_s6 + $0x1e0] sm:$0xff]  ;;  %v346_v31 = vld [vmem:[%s4976_s6 + $0x1f0] sm:$0xff] }
  0x21   : > { %v348_v32 = vld [vmem:[%s4976_s6 + $0x200] sm:$0xff]  ;;  %345 = vst [vmem:[%s4984_s7 + $0xf0] sm:$0xff] %v344_v30  ;;  %347 = vst [vmem:[%s4984_s7 + $0xf8] sm:$0xff] %v346_v31  ;;  %v350_v33 = vld [vmem:[%s4976_s6 + $0x210] sm:$0xff] }
  0x22   : > { %349 = vst [vmem:[%s4984_s7 + $0x100] sm:$0xff] %v348_v32  ;;  %v352_v34 = vld [vmem:[%s4976_s6 + $0x220] sm:$0xff]  ;;  %351 = vst [vmem:[%s4984_s7 + $0x108] sm:$0xff] %v350_v33 }
  0x23   : > { %353 = vst [vmem:[%s4984_s7 + $0x110] sm:$0xff] %v352_v34 }
  0x24 PF: > { %p3549_p5 = scmp.ge.s32.totalorder %s4902_s20, 1  ;;  %p365_p6 = scmp.lt.s32.totalorder %s4902_s20, 3 }
  0x26   : > { %p366_p7 = pnand %p3549_p5, %p365_p6 }
  0x27   : > { %v3552_v35 = vld [vmem:[%s6450_s2 + $0x28] sm:$0xff] (!%p366_p7)  ;;  %v3553_v36 = vld [vmem:[%s6450_s2 + $0x30] sm:$0x3] (!%p366_p7)  ;;  %vm497_vm0 = vcmask (!%p366_p7), 1041408   ;;  %v4904_v37 = vmov (!%p366_p7), 0.0|0.0   ;;  %vm4905_vm1 = vmmov (!%p366_p7), 1  }
  0x28   : > { %369 = sbr.rel (%p366_p7) target bundleno = 2102 (0x836), region = 74  ;;  %4699 = vmatprep.subr.bf16.mxu0 (!%p366_p7), %v4904_v37  ;;  %v4700_v38 = vpack.c.bf16 (!%p366_p7), %v3553_v36, %v3552_v35  ;;  %vm5059_vm2 = vmpackc.low (!%p366_p7), %vm497_vm0, %vm4905_vm1  ;;  %s372_s12 = sand.u32 (!%p366_p7), 1, %s4894_s18   ;;  %v446_v40 = vld [vmem:[%s6450_s2] sm:$0xff] (!%p366_p7)  ;;  %4837 = vmatprep.subr.bf16.mxu1 (!%p366_p7), %v4904_v37  ;;  %vm4906_vm3 = vmmov (!%p366_p7), 0   ;;  %v4907_v41 = vmov (!%p366_p7), 0.0   ;;  %v3604_v43 = vld [vmem:[%s6450_s2 + $0x78] sm:$0xff] (!%p366_p7) }
  0x29   : > { %4048 = vmatprep.mubr.msk.f32.mxu0 (!%p366_p7), %vm4906_vm3, %v4907_v41  ;;  %s4840_s15 = smul.u32 (!%p366_p7), 280, %s372_s12  ;;  %v447_v42 = vld [vmem:[%s6450_s2 + $0x8] sm:$0x3] (!%p366_p7)  ;;  %4106 = vmatprep.mubr.msk.f32.mxu1 (!%p366_p7), %vm4906_vm3, %v4907_v41  ;;  %vm451_vm4 = vcmask (!%p366_p7), 80896   ;;  %v3605_v45 = vld [vmem:[%s6450_s2 + $0x80] sm:$0x3] (!%p366_p7) }
  0x2a   : > { %4702 = vmatpush3.bf16.msk.msra.mxu0 (!%p366_p7), %vm5059_vm2, %v4700_v38  ;;  %v4704_v44 = vpack.c.bf16 (!%p366_p7), %v447_v42, %v446_v40  ;;  %v4712_v47 = vpack.c.bf16 (!%p366_p7), %v3605_v45, %v3604_v43  ;;  %v3640_v62 = vld [vmem:[%s6450_s2 + $0xc8] sm:$0xff] (!%p366_p7)  ;;  %v3641_v63 = vld [vmem:[%s6450_s2 + $0xd0] sm:$0x3] (!%p366_p7)  ;;  %v3587_v4 = vld [vmem:[%s6450_s2 + $0x58] sm:$0x3] (!%p366_p7)  ;;  %vm2023_vm5 = vcmask (!%p366_p7), 1043456  }
  0x2b   : > { %4703 = vmatprep.subr.bf16.mxu0 (!%p366_p7), %v4904_v37  ;;  %s5084_s27 = scalar_lea.vmem (!%p366_p7), [#allocation2], %s4840_s15  ;;  %v4720_v1 = vpack.c.bf16 (!%p366_p7), %v3641_v63, %v3640_v62  ;;  %v3586_v3 = vld [vmem:[%s6450_s2 + $0x50] sm:$0xff] (!%p366_p7)  ;;  %v3622_v7 = vld [vmem:[%s6450_s2 + $0xa0] sm:$0xff] (!%p366_p7)  ;;  %v3623_v8 = vld [vmem:[%s6450_s2 + $0xa8] sm:$0x3] (!%p366_p7)  ;;  %vm2013_vm6 = vcmask (!%p366_p7), 162816  }
  0x2c   : > { %v5087_v46 = vld [vmem:[%s5084_s27 + $0x8] sm:$0xff] (!%p366_p7)  ;;  %4838 = vmatpush3.bf16.msk.msra.mxu1 (!%p366_p7), %vm5059_vm2, %v4704_v44  ;;  %v5099_v48 = vld [vmem:[%s5084_s27 + $0x10] sm:$0xff] (!%p366_p7)  ;;  %v5102_v49 = vld [vmem:[%s5084_s27 + $0x18] sm:$0xff] (!%p366_p7)  ;;  %v4708_v6 = vpack.c.bf16 (!%p366_p7), %v3587_v4, %v3586_v3  ;;  %v4716_v9 = vpack.c.bf16 (!%p366_p7), %v3623_v8, %v3622_v7  ;;  %vm2878_vm7 = vcmask (!%p366_p7), 326656   ;;  %p402_p8 = scmp.lt.s32.totalorder (!%p366_p7), %s3544_s21, 1  ;;  %vm3160_vm8 = vcmask (!%p366_p7), 261120  }
  0x2d   : > { %4049 = vmatmul.mubr.msk.f32.vlgmr.msra.gmra.mrb[0].mxu0 (!%p366_p7), %vm451_vm4, %v5087_v46  ;;  %4711 = vmatprep.subr.bf16.mxu1 (!%p366_p7), %v4904_v37  ;;  %v5117_v50 = vld [vmem:[%s5084_s27 + $0x20] sm:$0xff] (!%p366_p7)  ;;  %v418_v51 = vld [vmem:[%s5084_s27 + $0x38] sm:$0xff] (!%p366_p7)  ;;  %v5136_v52 = vld [vmem:[%s5084_s27 + $0x28] sm:$0xff] (!%p366_p7)  ;;  %s4908_s30 = smov (!%p366_p7), 80   ;;  %s4909_s6 = smov (!%p366_p7), 32   ;;  %vm3158_vm9 = vcmask (!%p366_p7), 654336  }
  0x2e   : > { %4706 = vmatpush3.bf16.msk.msra.mxu0 (!%p366_p7), %vm5059_vm2, %v4704_v44  ;;  %4051 = vmatprep.mubr.msk.f32.mxu0 (!%p366_p7), %vm4906_vm3, %v4907_v41  ;;  %v5139_v53 = vld [vmem:[%s5084_s27 + $0x40] sm:$0xff] (!%p366_p7)  ;;  %v5150_v54 = vld [vmem:[%s5084_s27 + $0x48] sm:$0xff] (!%p366_p7)  ;;  %v5161_v55 = vld [vmem:[%s5084_s27 + $0x50] sm:$0xff] (!%p366_p7)  ;;  %s4910_s7 = smov (!%p366_p7), 64   ;;  %vm3197_vm10 = vcmask (!%p366_p7), 916480   ;;  %s4911_s15 = smov (!%p366_p7), 96  }
  0x2f   : > { %4107 = vmatmul.mubr.msk.f32.vlgmr.msra.gmra.mrb[0].mxu1 %vm451_vm4, %v5102_v49  ;;  %4707 = vmatprep.subr.bf16.mxu0 %v4904_v37  ;;  %v5172_v56 = vld [vmem:[%s5084_s27 + $0x58] sm:$0xff]  ;;  %v5179_v57 = vld [vmem:[%s5084_s27 + $0x70] sm:$0xff]  ;;  %v5194_v58 = vld [vmem:[%s5084_s27 + $0x60] sm:$0xff]  ;;  %s6460_s21 = smov (!%p402_p8, %s3544_s21), 1  ;;  %vm3470_vm11 = vcmask 310272  }
  0x30   : > { %4109 = vmatprep.mubr.msk.f32.mxu1 %vm4906_vm3, %v4907_v41  ;;  %4714 = vmatpush3.bf16.msk.msra.mxu1 %vm5059_vm2, %v4712_v47  ;;  %v5197_v59 = vld [vmem:[%s5084_s27 + $0x78] sm:$0xff]  ;;  %v5208_v60 = vld [vmem:[%s5084_s27 + $0x80] sm:$0xff]  ;;  %v5219_v61 = vld [vmem:[%s5084_s27 + $0x88] sm:$0xff]  ;;  %s3550_s10 = sshll.u32 %s6460_s21, 3 }
  0x31   : > { %4052 = vmatmul.mubr.msk.f32.gmra.mrb[2].mxu0 %vm451_vm4, %v5099_v48  ;;  %4719 = vmatprep.subr.bf16.mxu1 %v4904_v37  ;;  %v5236_v0 = vld [vmem:[%s5084_s27 + $0x90] sm:$0xff]  ;;  %v5257_v2 = vld [vmem:[%s5084_s27 + $0x98] sm:$0xff]  ;;  %v411_v5 = vld [vmem:[%s5084_s27] sm:$0xff]  ;;  %s409_s24 = scalar_lea.vmem %s6453_s5, %s3550_s10 }
  0x32   : > { %4054 = vmatprep.mubr.msk.f32.mxu0 %vm4906_vm3, %v4907_v41  ;;  %v417_v10 = vld [vmem:[%s5084_s27 + $0x30] sm:$0xff]  ;;  %v5347_v11 = vld [vmem:[%s5084_s27 + $0xa8] sm:$0xff]  ;;  %v5368_v13 = vld [vmem:[%s5084_s27 + $0xb8] sm:$0xff] }
  0x33   : > { %4110 = vmatmul.mubr.msk.f32.gmra.mrb[2].mxu1 %vm451_vm4, %v5117_v50  ;;  %v5357_v12 = vld [vmem:[%s5084_s27 + $0xb0] sm:$0xff]  ;;  %v5379_v14 = vld [vmem:[%s5084_s27 + $0xc0] sm:$0xff]  ;;  %v5390_v15 = vld [vmem:[%s5084_s27 + $0xc8] sm:$0xff] }
  0x34   : > { %4112 = vmatprep.mubr.msk.f32.mxu1 %vm4906_vm3, %v4907_v41  ;;  %v3676_v16 = vld [vmem:[%s6450_s2 + $0x118] sm:$0xff]  ;;  %v3677_v17 = vld [vmem:[%s6450_s2 + $0x120] sm:$0x3]  ;;  %v3658_v21 = vld [vmem:[%s6450_s2 + $0xf0] sm:$0xff] }
  0x35   : > { %4055 = vmatmul.mubr.msk.f32.gmra.mrb[4].mxu0 %vm451_vm4, %v5102_v49  ;;  %v424_v18 = vld [vmem:[%s5084_s27 + $0x68] sm:$0xff]  ;;  %v4728_v19 = vpack.c.bf16 %v3677_v17, %v3676_v16  ;;  %v5446_v20 = vld [vmem:[%s5084_s27 + $0xa0] sm:$0xff]  ;;  %v5525_v24 = vld [vmem:[%s5084_s27 + $0xd0] sm:$0xff] }
  0x36   : > { %4057 = vmatprep.mubr.msk.f32.mxu0 %vm4906_vm3, %v4907_v41  ;;  %v3659_v22 = vld [vmem:[%s6450_s2 + $0xf8] sm:$0x3]  ;;  %v3694_v26 = vld [vmem:[%s6450_s2 + $0x140] sm:$0xff]  ;;  %v3695_v27 = vld [vmem:[%s6450_s2 + $0x148] sm:$0x3] }
  0x37   : > { %4113 = vmatmul.mubr.msk.f32.gmra.mrb[4].mxu1 %vm451_vm4, %v418_v51  ;;  %v4724_v23 = vpack.c.bf16 %v3659_v22, %v3658_v21  ;;  %v5536_v25 = vld [vmem:[%s5084_s27 + $0xd8] sm:$0xff]  ;;  %v4732_v28 = vpack.c.bf16 %v3695_v27, %v3694_v26  ;;  %v440_v29 = vld [vmem:[%s5084_s27 + $0xe8] sm:$0xff]  ;;  %v5646_v31 = vld [vmem:[%s5084_s27 + $0xf0] sm:$0xff] }
  0x38   : > { %4115 = vmatprep.mubr.msk.f32.mxu1 %vm4906_vm3, %v4907_v41  ;;  %v5659_v36 = vld [vmem:[%s5084_s27 + $0xf8] sm:$0xff]  ;;  %v5672_v43 = vld [vmem:[%s5084_s27 + $0x100] sm:$0xff] }
  0x39   : > { %4058 = vmatmul.mubr.msk.f32.gmra.mrb[6].mxu0 %vm451_vm4, %v5117_v50 }
  0x3a   : > { %4060 = vmatprep.mubr.msk.f32.mxu0 %vm4906_vm3, %v4907_v41 }
  0x3b   : > { %4116 = vmatmul.mubr.msk.f32.gmra.mrb[6].mxu1 %vm451_vm4, %v5139_v53 }
  0x3c   : > { %4118 = vmatprep.mubr.msk.f32.mxu1 %vm4906_vm3, %v4907_v41 }
  0x3d   : > { %4061 = vmatmul.mubr.msk.f32.gmra.mrb[8].mxu0 %vm451_vm4, %v5136_v52 }
  0x3e   : > { %4063 = vmatprep.mubr.msk.f32.mxu0 %vm4906_vm3, %v4907_v41 }
  0x3f   : > { %4119 = vmatmul.mubr.msk.f32.gmra.mrb[8].mxu1 %vm451_vm4, %v5150_v54 }
  0x40   : > { %4121 = vmatprep.mubr.msk.f32.mxu1 %vm4906_vm3, %v4907_v41 }
  0x41   : > { %4064 = vmatmul.mubr.msk.f32.gmra.mrb[10].mxu0 %vm451_vm4, %v5139_v53 }
  0x42   : > { %4066 = vmatprep.mubr.msk.f32.mxu0 %vm4906_vm3, %v4907_v41 }
  0x43   : > { %4122 = vmatmul.mubr.msk.f32.gmra.mrb[10].mxu1 %vm451_vm4, %v5161_v55 }
  0x44   : > { %4124 = vmatprep.mubr.msk.f32.mxu1 %vm4906_vm3, %v4907_v41 }
  0x45   : > { %4067 = vmatmul.mubr.msk.f32.gmra.mrb[12].mxu0 %vm451_vm4, %v5150_v54 }
  0x46   : > { %4069 = vmatprep.mubr.msk.f32.mxu0 %vm4906_vm3, %v4907_v41 }
  0x47   : > { %4125 = vmatmul.mubr.msk.f32.gmra.mrb[12].mxu1 %vm451_vm4, %v5172_v56 }
  0x48   : > { %4127 = vmatprep.mubr.msk.f32.mxu1 %vm4906_vm3, %v4907_v41 }
  0x49   : > { %4070 = vmatmul.mubr.msk.f32.gmra.mrb[14].mxu0 %vm451_vm4, %v5161_v55 }
  0x4a   : > { %4072 = vmatprep.mubr.msk.f32.mxu0 %vm4906_vm3, %v4907_v41 }
  0x4b   : > { %4128 = vmatmul.mubr.msk.f32.gmra.mrb[14].mxu1 %vm451_vm4, %v5179_v57 }
  0x4c   : > { %4130 = vmatprep.mubr.msk.f32.mxu1 %vm4906_vm3, %v4907_v41 }
  0x4d   : > { %4073 = vmatmul.mubr.msk.f32.gmra.mrb[16].mxu0 %vm451_vm4, %v5172_v56 }
  0x4e   : > { %4075 = vmatprep.mubr.msk.f32.mxu0 %vm4906_vm3, %v4907_v41 }
  0x4f   : > { %4131 = vmatmul.mubr.msk.f32.gmra.mrb[16].mxu1 %vm451_vm4, %v5197_v59 }
  0x50   : > { %4133 = vmatprep.mubr.msk.f32.mxu1 %vm4906_vm3, %v4907_v41 }
  0x51   : > { %4076 = vmatmul.mubr.msk.f32.gmra.mrb[18].mxu0 %vm451_vm4, %v5194_v58 }
  0x52   : > { %4078 = vmatprep.mubr.msk.f32.mxu0 %vm4906_vm3, %v4907_v41 }
  0x53   : > { %4134 = vmatmul.mubr.msk.f32.gmra.mrb[18].mxu1 %vm451_vm4, %v5208_v60 }
  0x54   : > { %4136 = vmatprep.mubr.msk.f32.mxu1 %vm4906_vm3, %v4907_v41 }
  0x55   : > { %4079 = vmatmul.mubr.msk.f32.gmra.mrb[20].mxu0 %vm451_vm4, %v5197_v59 }
  0x56   : > { %4081 = vmatprep.mubr.msk.f32.mxu0 %vm4906_vm3, %v4907_v41 }
  0x57   : > { %4137 = vmatmul.mubr.msk.f32.gmra.mrb[20].mxu1 %vm451_vm4, %v5219_v61 }
  0x58   : > { %4139 = vmatprep.mubr.msk.f32.mxu1 %vm4906_vm3, %v4907_v41 }
  0x59   : > { %4082 = vmatmul.mubr.msk.f32.gmra.mrb[22].mxu0 %vm451_vm4, %v5208_v60 }
  0x5a   : > { %4084 = vmatprep.mubr.msk.f32.mxu0 %vm4906_vm3, %v4907_v41 }
  0x5b   : > { %4140 = vmatmul.mubr.msk.f32.gmra.mrb[22].mxu1 %vm451_vm4, %v5236_v0 }
  0x5c   : > { %4195 = vmatprep.mubr.msk.f32.mxu1 %vm4906_vm3, %v4907_v41 }
  0x5d   : > { %4085 = vmatmul.mubr.msk.f32.gmra.mrb[24].mxu0 %vm451_vm4, %v5219_v61 }
  0x5e   : > { %4087 = vmatprep.mubr.msk.f32.mxu0 %vm4906_vm3, %v4907_v41 }
  0x5f   : > { %4196 = vmatmul.mubr.msk.f32.vlgmr.msra.gmra.mrb[24].mxu1 %vm451_vm4, %v418_v51 }
  0x60   : > { %4198 = vmatprep.mubr.msk.f32.mxu1 %vm4906_vm3, %v4907_v41  ;;  %4722 = vmatpush3.bf16.msk.msra.mxu1 %vm5059_vm2, %v4720_v1 }
  0x61   : > { %4088 = vmatmul.mubr.msk.f32.gmra.mrb[26].mxu0 %vm451_vm4, %v5236_v0  ;;  %4727 = vmatprep.subr.bf16.mxu1 %v4904_v37 }
  0x62   : > { %4090 = vmatprep.mubr.msk.f32.mxu0 %vm4906_vm3, %v4907_v41 }
  0x63   : > { %4199 = vmatmul.mubr.msk.f32.gmra.mrb[26].mxu1 %vm451_vm4, %v5139_v53 }
  0x64   : > { %4201 = vmatprep.mubr.msk.f32.mxu1 %vm4906_vm3, %v4907_v41 }
  0x65   : > { %4091 = vmatmul.mubr.msk.f32.gmra.mrb[28].mxu0 %vm451_vm4, %v5257_v2 }
  0x66   : > { %4097 = vmatprep.mubr.msk.f32.mxu0 %vm4906_vm3, %v4907_v41 }
  0x67   : > { %4202 = vmatmul.mubr.msk.f32.gmra.mrb[28].mxu1 %vm451_vm4, %v5150_v54 }
  0x68   : > { %4204 = vmatprep.mubr.msk.f32.mxu1 %vm4906_vm3, %v4907_v41 }
  0x69   : > { %4098 = vmatmul.mubr.msk.f32.vlgmr.msra.gmra.mrb[30].mxu0 %vm451_vm4, %v411_v5 }
  0x6a   : > { %4710 = vmatpush3.bf16.msk.msra.mxu0 %vm5059_vm2, %v4708_v6  ;;  %4100 = vmatprep.mubr.msk.f32.mxu0 %vm4906_vm3, %v4907_v41 }
  0x6b   : > { %4715 = vmatprep.subr.bf16.mxu0 %v4904_v37  ;;  %4205 = vmatmul.mubr.msk.f32.gmra.mrb[30].mxu1 %vm451_vm4, %v5161_v55 }
  0x6c   : > { %4207 = vmatprep.mubr.msk.f32.mxu1 %vm4906_vm3, %v4907_v41 }
  0x6d   : > { %4101 = vmatmul.mubr.msk.f32.gmra.mrb[32].mxu0 %vm451_vm4, %v5087_v46 }
  0x6e   : > { %4103 = vmatprep.mubr.msk.f32.mxu0 %vm4906_vm3, %v4907_v41 }
  0x6f   : > { %4208 = vmatmul.mubr.msk.f32.gmra.mrb[32].mxu1 %vm451_vm4, %v5172_v56 }
  0x70   : > { %4210 = vmatprep.mubr.msk.f32.mxu1 %vm4906_vm3, %v4907_v41 }
  0x71   : > { %4104 = vmatmul.mubr.msk.f32.gmra.mrb[34].mxu0 %vm451_vm4, %v5099_v48 }
  0x72   : > { %4146 = vmatprep.mubr.msk.f32.mxu0 %vm4906_vm3, %v4907_v41 }
  0x73   : > { %4211 = vmatmul.mubr.msk.f32.gmra.mrb[34].mxu1 %vm451_vm4, %v5179_v57 }
  0x74   : > { %4213 = vmatprep.mubr.msk.f32.mxu1 %vm4906_vm3, %v4907_v41 }
  0x75   : > { %4147 = vmatmul.mubr.msk.f32.vlgmr.msra.gmra.mrb[36].mxu0 %vm451_vm4, %v5099_v48  ;;  %v5683_v48 = vld [vmem:[%s5084_s27 + $0x108] sm:$0xff] }
  0x76   : > { %4718 = vmatpush3.bf16.msk.msra.mxu0 %vm5059_vm2, %v4716_v9  ;;  %4149 = vmatprep.mubr.msk.f32.mxu0 %vm4906_vm3, %v4907_v41 }
  0x77   : > { %4214 = vmatmul.mubr.msk.f32.gmra.mrb[36].mxu1 %vm451_vm4, %v5197_v59  ;;  %4723 = vmatprep.subr.bf16.mxu0 %v4904_v37 }
  0x78   : > { %4216 = vmatprep.mubr.msk.f32.mxu1 %vm4906_vm3, %v4907_v41 }
  0x79   : > { %4150 = vmatmul.mubr.msk.f32.gmra.mrb[38].mxu0 %vm451_vm4, %v5102_v49 }
  0x7a   : > { %4152 = vmatprep.mubr.msk.f32.mxu0 %vm4906_vm3, %v4907_v41 }
  0x7b   : > { %4217 = vmatmul.mubr.msk.f32.gmra.mrb[38].mxu1 %vm451_vm4, %v5208_v60 }
  0x7c   : > { %4219 = vmatprep.mubr.msk.f32.mxu1 %vm4906_vm3, %v4907_v41 }
  0x7d   : > { %4153 = vmatmul.mubr.msk.f32.gmra.mrb[40].mxu0 %vm451_vm4, %v5117_v50 }
  0x7e   : > { %4155 = vmatprep.mubr.msk.f32.mxu0 %vm4906_vm3, %v4907_v41 }
  0x7f   : > { %4220 = vmatmul.mubr.msk.f32.gmra.mrb[40].mxu1 %vm451_vm4, %v5219_v61 }
  0x80   : > { %4222 = vmatprep.mubr.msk.f32.mxu1 %vm4906_vm3, %v4907_v41 }
  0x81   : > { %4156 = vmatmul.mubr.msk.f32.gmra.mrb[42].mxu0 %vm451_vm4, %v5136_v52 }
  0x82   : > { %4158 = vmatprep.mubr.msk.f32.mxu0 %vm4906_vm3, %v4907_v41 }
  0x83   : > { %4223 = vmatmul.mubr.msk.f32.gmra.mrb[42].mxu1 %vm451_vm4, %v5236_v0 }
  0x84   : > { %4225 = vmatprep.mubr.msk.f32.mxu1 %vm4906_vm3, %v4907_v41 }
  0x85   : > { %4159 = vmatmul.mubr.msk.f32.gmra.mrb[44].mxu0 %vm451_vm4, %v417_v10 }
  0x86   : > { %4161 = vmatprep.mubr.msk.f32.mxu0 %vm4906_vm3, %v4907_v41 }
  0x87   : > { %4226 = vmatmul.mubr.msk.f32.gmra.mrb[44].mxu1 %vm451_vm4, %v5347_v11 }
  0x88   : > { %4228 = vmatprep.mubr.msk.f32.mxu1 %vm4906_vm3, %v4907_v41 }
  0x89   : > { %4162 = vmatmul.mubr.msk.f32.gmra.mrb[46].mxu0 %vm451_vm4, %v5150_v54 }
  0x8a   : > { %4164 = vmatprep.mubr.msk.f32.mxu0 %vm4906_vm3, %v4907_v41 }
  0x8b   : > { %4229 = vmatmul.mubr.msk.f32.gmra.mrb[46].mxu1 %vm451_vm4, %v5357_v12 }
  0x8c   : > { %4231 = vmatprep.mubr.msk.f32.mxu1 %vm4906_vm3, %v4907_v41 }
  0x8d   : > { %4165 = vmatmul.mubr.msk.f32.gmra.mrb[48].mxu0 %vm451_vm4, %v5161_v55 }
  0x8e   : > { %4167 = vmatprep.mubr.msk.f32.mxu0 %vm4906_vm3, %v4907_v41 }
  0x8f   : > { %4232 = vmatmul.mubr.msk.f32.gmra.mrb[48].mxu1 %vm451_vm4, %v5368_v13 }
  0x90   : > { %4234 = vmatprep.mubr.msk.f32.mxu1 %vm4906_vm3, %v4907_v41 }
  0x91   : > { %4168 = vmatmul.mubr.msk.f32.gmra.mrb[50].mxu0 %vm451_vm4, %v5172_v56 }
  0x92   : > { %4170 = vmatprep.mubr.msk.f32.mxu0 %vm4906_vm3, %v4907_v41 }
  0x93   : > { %4235 = vmatmul.mubr.msk.f32.gmra.mrb[50].mxu1 %vm451_vm4, %v5379_v14 }
  0x94   : > { %4237 = vmatprep.mubr.msk.f32.mxu1 %vm4906_vm3, %v4907_v41 }
  0x95   : > { %4171 = vmatmul.mubr.msk.f32.gmra.mrb[52].mxu0 %vm451_vm4, %v5194_v58 }
  0x96   : > { %4173 = vmatprep.mubr.msk.f32.mxu0 %vm4906_vm3, %v4907_v41 }
  0x97   : > { %4238 = vmatmul.mubr.msk.f32.gmra.mrb[52].mxu1 %vm451_vm4, %v5390_v15 }
  0x98   : > { %4293 = vmatprep.mubr.msk.f32.mxu1 %vm4906_vm3, %v4907_v41 }
  0x99   : > { %4174 = vmatmul.mubr.msk.f32.gmra.mrb[54].mxu0 %vm451_vm4, %v424_v18 }
  0x9a   : > { %4176 = vmatprep.mubr.msk.f32.mxu0 %vm4906_vm3, %v4907_v41 }
  0x9b   : > { %4294 = vmatmul.mubr.msk.f32.vlgmr.msra.gmra.mrb[54].mxu1 %vm451_vm4, %v5150_v54 }
  0x9c   : > { %4296 = vmatprep.mubr.msk.f32.mxu1 %vm4906_vm3, %v4907_v41  ;;  %4730 = vmatpush3.bf16.msk.msra.mxu1 %vm5059_vm2, %v4728_v19 }
  0x9d   : > { %4177 = vmatmul.mubr.msk.f32.gmra.mrb[56].mxu0 %vm451_vm4, %v5208_v60  ;;  %4735 = vmatprep.subr.bf16.mxu1 %v4904_v37 }
  0x9e   : > { %4179 = vmatprep.mubr.msk.f32.mxu0 %vm4906_vm3, %v4907_v41 }
  0x9f   : > { %4297 = vmatmul.mubr.msk.f32.gmra.mrb[56].mxu1 %vm451_vm4, %v5161_v55 }
  0xa0   : > { %4299 = vmatprep.mubr.msk.f32.mxu1 %vm4906_vm3, %v4907_v41 }
  0xa1   : > { %4180 = vmatmul.mubr.msk.f32.gmra.mrb[58].mxu0 %vm451_vm4, %v5219_v61 }
  0xa2   : > { %4182 = vmatprep.mubr.msk.f32.mxu0 %vm4906_vm3, %v4907_v41 }
  0xa3   : > { %4300 = vmatmul.mubr.msk.f32.gmra.mrb[58].mxu1 %vm451_vm4, %v5172_v56 }
  0xa4   : > { %4302 = vmatprep.mubr.msk.f32.mxu1 %vm4906_vm3, %v4907_v41 }
  0xa5   : > { %4183 = vmatmul.mubr.msk.f32.gmra.mrb[60].mxu0 %vm451_vm4, %v5236_v0 }
  0xa6   : > { %4185 = vmatprep.mubr.msk.f32.mxu0 %vm4906_vm3, %v4907_v41 }
  0xa7   : > { %4303 = vmatmul.mubr.msk.f32.gmra.mrb[60].mxu1 %vm451_vm4, %v5194_v58 }
  0xa8   : > { %4305 = vmatprep.mubr.msk.f32.mxu1 %vm4906_vm3, %v4907_v41 }
  0xa9   : > { %4186 = vmatmul.mubr.msk.f32.gmra.mrb[62].mxu0 %vm451_vm4, %v5257_v2 }
  0xaa   : > { %4188 = vmatprep.mubr.msk.f32.mxu0 %vm4906_vm3, %v4907_v41 }
  0xab   : > { %4306 = vmatmul.mubr.msk.f32.gmra.mrb[62].mxu1 %vm451_vm4, %v424_v18 }
  0xac   : > { %4308 = vmatprep.mubr.msk.f32.mxu1 %vm4906_vm3, %v4907_v41 }
  0xad   : > { %4189 = vmatmul.mubr.msk.f32.gmra.mrb[64].mxu0 %vm451_vm4, %v5446_v20 }
  0xae   : > { %4244 = vmatprep.mubr.msk.f32.mxu0 %vm4906_vm3, %v4907_v41 }
  0xaf   : > { %4309 = vmatmul.mubr.msk.f32.gmra.mrb[64].mxu1 %vm451_vm4, %v5208_v60 }
  0xb0   : > { %4311 = vmatprep.mubr.msk.f32.mxu1 %vm4906_vm3, %v4907_v41 }
  0xb1   : > { %4245 = vmatmul.mubr.msk.f32.vlgmr.msra.gmra.mrb[66].mxu0 %vm451_vm4, %v5139_v53 }
  0xb2   : > { %4726 = vmatpush3.bf16.msk.msra.mxu0 %vm5059_vm2, %v4724_v23  ;;  %4247 = vmatprep.mubr.msk.f32.mxu0 %vm4906_vm3, %v4907_v41 }
  0xb3   : > { %4312 = vmatmul.mubr.msk.f32.gmra.mrb[66].mxu1 %vm451_vm4, %v5219_v61  ;;  %4731 = vmatprep.subr.bf16.mxu0 %v4904_v37 }
  0xb4   : > { %4314 = vmatprep.mubr.msk.f32.mxu1 %vm4906_vm3, %v4907_v41 }
  0xb5   : > { %4248 = vmatmul.mubr.msk.f32.gmra.mrb[68].mxu0 %vm451_vm4, %v5150_v54 }
  0xb6   : > { %4250 = vmatprep.mubr.msk.f32.mxu0 %vm4906_vm3, %v4907_v41 }
  0xb7   : > { %4315 = vmatmul.mubr.msk.f32.gmra.mrb[68].mxu1 %vm451_vm4, %v5236_v0 }
  0xb8   : > { %4317 = vmatprep.mubr.msk.f32.mxu1 %vm4906_vm3, %v4907_v41 }
  0xb9   : > { %4251 = vmatmul.mubr.msk.f32.gmra.mrb[70].mxu0 %vm451_vm4, %v5161_v55 }
  0xba   : > { %4253 = vmatprep.mubr.msk.f32.mxu0 %vm4906_vm3, %v4907_v41 }
  0xbb   : > { %4318 = vmatmul.mubr.msk.f32.gmra.mrb[70].mxu1 %vm451_vm4, %v5257_v2 }
  0xbc   : > { %4320 = vmatprep.mubr.msk.f32.mxu1 %vm4906_vm3, %v4907_v41 }
  0xbd   : > { %4254 = vmatmul.mubr.msk.f32.gmra.mrb[72].mxu0 %vm451_vm4, %v5172_v56  ;;  %v439_v56 = vld [vmem:[%s5084_s27 + $0xe0] sm:$0xff] }
  0xbe   : > { %4256 = vmatprep.mubr.msk.f32.mxu0 %vm4906_vm3, %v4907_v41 }
  0xbf   : > { %4321 = vmatmul.mubr.msk.f32.gmra.mrb[72].mxu1 %vm451_vm4, %v5446_v20 }
  0xc0   : > { %4323 = vmatprep.mubr.msk.f32.mxu1 %vm4906_vm3, %v4907_v41 }
  0xc1   : > { %4257 = vmatmul.mubr.msk.f32.gmra.mrb[74].mxu0 %vm451_vm4, %v5194_v58 }
  0xc2   : > { %4259 = vmatprep.mubr.msk.f32.mxu0 %vm4906_vm3, %v4907_v41 }
  0xc3   : > { %4324 = vmatmul.mubr.msk.f32.gmra.mrb[74].mxu1 %vm451_vm4, %v5368_v13 }
  0xc4   : > { %4326 = vmatprep.mubr.msk.f32.mxu1 %vm4906_vm3, %v4907_v41 }
  0xc5   : > { %4260 = vmatmul.mubr.msk.f32.gmra.mrb[76].mxu0 %vm451_vm4, %v5197_v59 }
  0xc6   : > { %4262 = vmatprep.mubr.msk.f32.mxu0 %vm4906_vm3, %v4907_v41 }
  0xc7   : > { %4327 = vmatmul.mubr.msk.f32.gmra.mrb[76].mxu1 %vm451_vm4, %v5379_v14 }
  0xc8   : > { %4329 = vmatprep.mubr.msk.f32.mxu1 %vm4906_vm3, %v4907_v41 }
  0xc9   : > { %4263 = vmatmul.mubr.msk.f32.gmra.mrb[78].mxu0 %vm451_vm4, %v5208_v60 }
  0xca   : > { %4265 = vmatprep.mubr.msk.f32.mxu0 %vm4906_vm3, %v4907_v41 }
  0xcb   : > { %4330 = vmatmul.mubr.msk.f32.gmra.mrb[78].mxu1 %vm451_vm4, %v5390_v15 }
  0xcc   : > { %4332 = vmatprep.mubr.msk.f32.mxu1 %vm4906_vm3, %v4907_v41 }
  0xcd   : > { %4266 = vmatmul.mubr.msk.f32.gmra.mrb[80].mxu0 %vm451_vm4, %v5219_v61 }
  0xce   : > { %4268 = vmatprep.mubr.msk.f32.mxu0 %vm4906_vm3, %v4907_v41 }
  0xcf   : > { %4333 = vmatmul.mubr.msk.f32.gmra.mrb[80].mxu1 %vm451_vm4, %v5525_v24 }
  0xd0   : > { %4335 = vmatprep.mubr.msk.f32.mxu1 %vm4906_vm3, %v4907_v41 }
  0xd1   : > { %4269 = vmatmul.mubr.msk.f32.gmra.mrb[82].mxu0 %vm451_vm4, %v5236_v0 }
  0xd2   : > { %4271 = vmatprep.mubr.msk.f32.mxu0 %vm4906_vm3, %v4907_v41 }
  0xd3   : > { %4336 = vmatmul.mubr.msk.f32.gmra.mrb[82].mxu1 %vm451_vm4, %v5536_v25 }
  0xd4   : > { %4391 = vmatprep.mubr.msk.f32.mxu1 %vm4906_vm3, %v4907_v41 }
  0xd5   : > { %4272 = vmatmul.mubr.msk.f32.gmra.mrb[84].mxu0 %vm451_vm4, %v5257_v2 }
  0xd6   : > { %4274 = vmatprep.mubr.msk.f32.mxu0 %vm4906_vm3, %v4907_v41 }
  0xd7   : > { %4392 = vmatmul.mubr.msk.f32.vlgmr.msra.gmra.mrb[84].mxu1 %vm451_vm4, %v5197_v59 }
  0xd8   : > { %4394 = vmatprep.mubr.msk.f32.mxu1 %vm4906_vm3, %v4907_v41 }
  0xd9   : > { %4275 = vmatmul.mubr.msk.f32.gmra.mrb[86].mxu0 %vm451_vm4, %v5357_v12 }
  0xda   : > { %4277 = vmatprep.mubr.msk.f32.mxu0 %vm4906_vm3, %v4907_v41 }
  0xdb   : > { %4395 = vmatmul.mubr.msk.f32.gmra.mrb[86].mxu1 %vm451_vm4, %v5208_v60 }
  0xdc   : > { %4397 = vmatprep.mubr.msk.f32.mxu1 %vm4906_vm3, %v4907_v41 }
  0xdd   : > { %4278 = vmatmul.mubr.msk.f32.gmra.mrb[88].mxu0 %vm451_vm4, %v5368_v13 }
  0xde   : > { %4280 = vmatprep.mubr.msk.f32.mxu0 %vm4906_vm3, %v4907_v41 }
  0xdf   : > { %4398 = vmatmul.mubr.msk.f32.gmra.mrb[88].mxu1 %vm451_vm4, %v5219_v61 }
  0xe0   : > { %4400 = vmatprep.mubr.msk.f32.mxu1 %vm4906_vm3, %v4907_v41 }
  0xe1   : > { %4281 = vmatmul.mubr.msk.f32.gmra.mrb[90].mxu0 %vm451_vm4, %v5379_v14 }
  0xe2   : > { %4283 = vmatprep.mubr.msk.f32.mxu0 %vm4906_vm3, %v4907_v41 }
  0xe3   : > { %4401 = vmatmul.mubr.msk.f32.gmra.mrb[90].mxu1 %vm451_vm4, %v5236_v0 }
  0xe4   : > { %4403 = vmatprep.mubr.msk.f32.mxu1 %vm4906_vm3, %v4907_v41 }
  0xe5   : > { %4284 = vmatmul.mubr.msk.f32.gmra.mrb[92].mxu0 %vm451_vm4, %v5390_v15 }
  0xe6   : > { %4286 = vmatprep.mubr.msk.f32.mxu0 %vm4906_vm3, %v4907_v41 }
  0xe7   : > { %4404 = vmatmul.mubr.msk.f32.gmra.mrb[92].mxu1 %vm451_vm4, %v5257_v2 }
  0xe8   : > { %4406 = vmatprep.mubr.msk.f32.mxu1 %vm4906_vm3, %v4907_v41 }
  0xe9   : > { %4287 = vmatmul.mubr.msk.f32.gmra.mrb[94].mxu0 %vm451_vm4, %v5525_v24 }
  0xea   : > { %4342 = vmatprep.mubr.msk.f32.mxu0 %vm4906_vm3, %v4907_v41 }
  0xeb   : > { %4407 = vmatmul.mubr.msk.f32.gmra.mrb[94].mxu1 %vm451_vm4, %v5357_v12 }
  0xec   : > { %4409 = vmatprep.mubr.msk.f32.mxu1 %vm4906_vm3, %v4907_v41 }
  0xed   : > { %4343 = vmatmul.mubr.msk.f32.vlgmr.msra.gmra.mrb[96].mxu0 %vm451_vm4, %v5179_v57 }
  0xee   : > { %4734 = vmatpush3.bf16.msk.msra.mxu0 %vm5059_vm2, %v4732_v28  ;;  %4345 = vmatprep.mubr.msk.f32.mxu0 %vm4906_vm3, %v4907_v41 }
  0xef   : > { %4410 = vmatmul.mubr.msk.f32.gmra.mrb[96].mxu1 %vm451_vm4, %v5368_v13  ;;  %4750 = vmatprep.subr.bf16.mxu0 %v4904_v37 }
  0xf0   : > { %4412 = vmatprep.mubr.msk.f32.mxu1 %vm4906_vm3, %v4907_v41 }
  0xf1   : > { %4346 = vmatmul.mubr.msk.f32.gmra.mrb[98].mxu0 %vm451_vm4, %v5197_v59 }
  0xf2   : > { %4348 = vmatprep.mubr.msk.f32.mxu0 %vm4906_vm3, %v4907_v41 }
  0xf3   : > { %4413 = vmatmul.mubr.msk.f32.gmra.mrb[98].mxu1 %vm451_vm4, %v5379_v14 }
  0xf4   : > { %4415 = vmatprep.mubr.msk.f32.mxu1 %vm4906_vm3, %v4907_v41 }
  0xf5   : > { %4349 = vmatmul.mubr.msk.f32.gmra.mrb[100].mxu0 %vm451_vm4, %v5208_v60 }
  0xf6   : > { %4351 = vmatprep.mubr.msk.f32.mxu0 %vm4906_vm3, %v4907_v41 }
  0xf7   : > { %4416 = vmatmul.mubr.msk.f32.gmra.mrb[100].mxu1 %vm451_vm4, %v5390_v15 }
  0xf8   : > { %4418 = vmatprep.mubr.msk.f32.mxu1 %vm4906_vm3, %v4907_v41 }
  0xf9   : > { %4352 = vmatmul.mubr.msk.f32.gmra.mrb[102].mxu0 %vm451_vm4, %v5219_v61 }
  0xfa   : > { %4354 = vmatprep.mubr.msk.f32.mxu0 %vm4906_vm3, %v4907_v41 }
  0xfb   : > { %4419 = vmatmul.mubr.msk.f32.gmra.mrb[102].mxu1 %vm451_vm4, %v5525_v24 }
  0xfc   : > { %4421 = vmatprep.mubr.msk.f32.mxu1 %vm4906_vm3, %v4907_v41 }
  0xfd   : > { %4355 = vmatmul.mubr.msk.f32.gmra.mrb[104].mxu0 %vm451_vm4, %v5236_v0 }
  0xfe   : > { %4357 = vmatprep.mubr.msk.f32.mxu0 %vm4906_vm3, %v4907_v41 }
  0xff   : > { %4422 = vmatmul.mubr.msk.f32.gmra.mrb[104].mxu1 %vm451_vm4, %v440_v29 }
 0x100   : > { %v5641_v30 = vpop.f32.mrb[0].mxu0  ;;  %4424 = vmatprep.mubr.msk.f32.mxu1 %vm4906_vm3, %v4907_v41 }
 0x101   : > { %v4050_v32 = vpop.f32.mrb[1].mxu0  ;;  %4358 = vmatmul.mubr.msk.f32.gmra.mrb[106].mxu0 %vm451_vm4, %v5347_v11 }
 0x102   : > { %4360 = vmatprep.mubr.msk.f32.mxu0 %vm4906_vm3, %v4907_v41  ;;  %v734_v33 = vpop.f32.mrb[0].mxu1 }
 0x103   : > { %v4108_v34 = vpop.f32.mrb[1].mxu1  ;;  %4425 = vmatmul.mubr.msk.f32.gmra.mrb[106].mxu1 %vm451_vm4, %v5646_v31 }
 0x104   : > { %v5654_v35 = vpop.f32.mrb[2].mxu0  ;;  %4427 = vmatprep.mubr.msk.f32.mxu1 %vm4906_vm3, %v4907_v41 }
 0x105   : > { %v4053_v38 = vpop.f32.mrb[3].mxu0  ;;  %4361 = vmatmul.mubr.msk.f32.gmra.mrb[108].mxu0 %vm451_vm4, %v5357_v12 }
 0x106   : > { %4363 = vmatprep.mubr.msk.f32.mxu0 %vm4906_vm3, %v4907_v41  ;;  %v739_v39 = vpop.f32.mrb[2].mxu1 }
 0x107   : > { %v4111_v40 = vpop.f32.mrb[3].mxu1  ;;  %4428 = vmatmul.mubr.msk.f32.gmra.mrb[108].mxu1 %vm451_vm4, %v5659_v36 }
 0x108   : > { %v5667_v42 = vpop.f32.mrb[4].mxu0  ;;  %4430 = vmatprep.mubr.msk.f32.mxu1 %vm4906_vm3, %v4907_v41 }
 0x109   : > { %v4056_v44 = vpop.f32.mrb[5].mxu0  ;;  %4364 = vmatmul.mubr.msk.f32.gmra.mrb[110].mxu0 %vm451_vm4, %v5368_v13 }
 0x10a   : > { %4366 = vmatprep.mubr.msk.f32.mxu0 %vm4906_vm3, %v4907_v41  ;;  %v744_v45 = vpop.f32.mrb[4].mxu1 }
 0x10b   : > { %v4114_v46 = vpop.f32.mrb[5].mxu1  ;;  %4431 = vmatmul.mubr.msk.f32.gmra.mrb[110].mxu1 %vm451_vm4, %v5672_v43 }
 0x10c   : > { %v582_v47 = vpop.f32.mrb[6].mxu0  ;;  %4433 = vmatprep.mubr.msk.f32.mxu1 %vm4906_vm3, %v4907_v41 }
 0x10d   : > { %v4059_v49 = vpop.f32.mrb[7].mxu0  ;;  %v5685_v50 = vadd.f32 %v734_v33, %v582_v47  ;;  %4367 = vmatmul.mubr.msk.f32.gmra.mrb[112].mxu0 %vm451_vm4, %v5379_v14 }
 0x10e   : > { %4369 = vmatprep.mubr.msk.f32.mxu0 %vm4906_vm3, %v4907_v41  ;;  %v749_v51 = vpop.f32.mrb[6].mxu1 }
 0x10f   : > { %v4117_v52 = vpop.f32.mrb[7].mxu1  ;;  %4434 = vmatmul.mubr.msk.f32.gmra.mrb[112].mxu1 %vm451_vm4, %v5683_v48 }
 0x110   : > { %v587_v53 = vpop.f32.mrb[8].mxu0  ;;  %4491 = vmatprep.mubr.msk.f32.mxu1 %vm4906_vm3, %v4907_v41 }
 0x111   : > { %v4062_v54 = vpop.f32.mrb[9].mxu0  ;;  %v5695_v55 = vadd.f32 %v739_v39, %v587_v53  ;;  %4370 = vmatmul.mubr.msk.f32.gmra.mrb[114].mxu0 %vm451_vm4, %v5390_v15 }
 0x112   : > { %4372 = vmatprep.mubr.msk.f32.mxu0 %vm4906_vm3, %v4907_v41  ;;  %v754_v57 = vpop.f32.mrb[8].mxu1 }
 0x113   : > { %v4120_v58 = vpop.f32.mrb[9].mxu1 }
 0x114   : > { %v592_v59 = vpop.f32.mrb[10].mxu0 }
 0x115   : > { %v4065_v62 = vpop.f32.mrb[11].mxu0  ;;  %v5702_v63 = vadd.f32 %v744_v45, %v592_v59  ;;  %4373 = vmatmul.mubr.msk.f32.gmra.mrb[116].mxu0 %vm451_vm4, %v439_v56 }
 0x116   : > { %4375 = vmatprep.mubr.msk.f32.mxu0 %vm4906_vm3, %v4907_v41  ;;  %v759_v1 = vpop.f32.mrb[10].mxu1 }
 0x117   : > { %v4123_v3 = vpop.f32.mrb[11].mxu1 }
 0x118   : > { %v597_v4 = vpop.f32.mrb[12].mxu0 }
 0x119   : > { %v4068_v5 = vpop.f32.mrb[13].mxu0  ;;  %v5707_v6 = vadd.f32 %v749_v51, %v597_v4  ;;  %4376 = vmatmul.mubr.msk.f32.gmra.mrb[118].mxu0 %vm451_vm4, %v440_v29 }
 0x11a   : > { %4378 = vmatprep.mubr.msk.f32.mxu0 %vm4906_vm3, %v4907_v41  ;;  %v764_v7 = vpop.f32.mrb[12].mxu1 }
 0x11b   : > { %v4126_v8 = vpop.f32.mrb[13].mxu1 }
 0x11c   : > { %v602_v9 = vpop.f32.mrb[14].mxu0 }
 0x11d   : > { %v4071_v10 = vpop.f32.mrb[15].mxu0  ;;  %v5712_v11 = vadd.f32 %v754_v57, %v602_v9  ;;  %4379 = vmatmul.mubr.msk.f32.gmra.mrb[120].mxu0 %vm451_vm4, %v5646_v31 }
 0x11e   : > { %4381 = vmatprep.mubr.msk.f32.mxu0 %vm4906_vm3, %v4907_v41  ;;  %v769_v12 = vpop.f32.mrb[14].mxu1 }
 0x11f   : > { %v4129_v16 = vpop.f32.mrb[15].mxu1 }
 0x120   : > { %v607_v17 = vpop.f32.mrb[16].mxu0 }
 0x121   : > { %v4074_v18 = vpop.f32.mrb[17].mxu0  ;;  %v5718_v19 = vadd.f32 %v759_v1, %v607_v17  ;;  %4382 = vmatmul.mubr.msk.f32.gmra.mrb[122].mxu0 %vm451_vm4, %v5659_v36 }
 0x122   : > { %4384 = vmatprep.mubr.msk.f32.mxu0 %vm4906_vm3, %v4907_v41  ;;  %v774_v21 = vpop.f32.mrb[16].mxu1 }
 0x123   : > { %v4132_v22 = vpop.f32.mrb[17].mxu1 }
 0x124   : > { %v612_v23 = vpop.f32.mrb[18].mxu0 }
 0x125   : > { %v4077_v26 = vpop.f32.mrb[19].mxu0  ;;  %v5724_v27 = vadd.f32 %v764_v7, %v612_v23  ;;  %4385 = vmatmul.mubr.msk.f32.gmra.mrb[124].mxu0 %vm451_vm4, %v5672_v43 }
 0x126   : > { %4440 = vmatprep.mubr.msk.f32.mxu0 %vm4906_vm3, %v4907_v41  ;;  %v779_v28 = vpop.f32.mrb[18].mxu1 }
 0x127   : > { %v4135_v29 = vpop.f32.mrb[19].mxu1 }
 0x128   : > { %v617_v32 = vpop.f32.mrb[20].mxu0 }
 0x129   : > { %v4080_v33 = vpop.f32.mrb[21].mxu0  ;;  %v5730_v34 = vadd.f32 %v769_v12, %v617_v32  ;;  %4441 = vmatmul.mubr.msk.f32.vlgmr.msra.gmra.mrb[126].mxu0 %vm451_vm4, %v5208_v60  ;;  %v3715_v32 = vld [vmem:[%s6450_s2 + $0x190] sm:$0xff] }
 0x12a   : > { %4443 = vmatprep.mubr.msk.f32.mxu0 %vm4906_vm3, %v4907_v41  ;;  %v784_v38 = vpop.f32.mrb[20].mxu1 }
 0x12b   : > { %v4138_v39 = vpop.f32.mrb[21].mxu1 }
 0x12c   : > { %v622_v40 = vpop.f32.mrb[22].mxu0 }
 0x12d   : > { %v4083_v44 = vpop.f32.mrb[23].mxu0  ;;  %v5736_v45 = vadd.f32 %v774_v21, %v622_v40  ;;  %4444 = vmatmul.mubr.msk.f32.gmra.mrb[128].mxu0 %vm451_vm4, %v5219_v61 }
 0x12e   : > { %4446 = vmatprep.mubr.msk.f32.mxu0 %vm4906_vm3, %v4907_v41  ;;  %v789_v46 = vpop.f32.mrb[22].mxu1 }
 0x12f   : > { %v4141_v47 = vpop.f32.mrb[23].mxu1 }
 0x130   : > { %v627_v49 = vpop.f32.mrb[24].mxu0 }
 0x131   : > { %v4086_v51 = vpop.f32.mrb[25].mxu0  ;;  %v5742_v60 = vadd.f32 %v779_v28, %v627_v49  ;;  %4447 = vmatmul.mubr.msk.f32.gmra.mrb[130].mxu0 %vm451_vm4, %v5236_v0 }
 0x132   : > { %4449 = vmatprep.mubr.msk.f32.mxu0 %vm4906_vm3, %v4907_v41  ;;  %v1050_v52 = vpop.f32.mrb[24].mxu1 }
 0x133   : > { %v4197_v53 = vpop.f32.mrb[25].mxu1 }
 0x134   : > { %v632_v54 = vpop.f32.mrb[26].mxu0 }
 0x135   : > { %v4089_v56 = vpop.f32.mrb[27].mxu0  ;;  %v5748_v61 = vadd.f32 %v784_v38, %v632_v54  ;;  %4450 = vmatmul.mubr.msk.f32.gmra.mrb[132].mxu0 %vm451_vm4, %v5257_v2 }
 0x136   : > { %4452 = vmatprep.mubr.msk.f32.mxu0 %vm4906_vm3, %v4907_v41  ;;  %v1055_v57 = vpop.f32.mrb[26].mxu1 }
 0x137   : > { %v4200_v58 = vpop.f32.mrb[27].mxu1 }
 0x138   : > { %v637_v59 = vpop.f32.mrb[28].mxu0 }
 0x139   : > { %v4092_v62 = vpop.f32.mrb[29].mxu0  ;;  %v5754_v0 = vadd.f32 %v789_v46, %v637_v59  ;;  %4453 = vmatmul.mubr.msk.f32.gmra.mrb[134].mxu0 %vm451_vm4, %v5446_v20 }
 0x13a   : > { %4455 = vmatprep.mubr.msk.f32.mxu0 %vm4906_vm3, %v4907_v41  ;;  %v1060_v1 = vpop.f32.mrb[28].mxu1 }
 0x13b   : > { %v4203_v3 = vpop.f32.mrb[29].mxu1 }
 0x13c   : > { %v719_v4 = vpop.f32.mrb[30].mxu0 }
 0x13d   : > { %v720_v2 = vadd.f32 %v719_v4, %v5641_v30  ;;  %v4099_v5 = vpop.f32.mrb[31].mxu0  ;;  %4456 = vmatmul.mubr.msk.f32.gmra.mrb[136].mxu0 %vm451_vm4, %v5368_v13 }
 0x13e   : > { %4458 = vmatprep.mubr.msk.f32.mxu0 %vm4906_vm3, %v4907_v41  ;;  %v1065_v7 = vpop.f32.mrb[30].mxu1 }
 0x13f   : > { %v4206_v8 = vpop.f32.mrb[31].mxu1 }
 0x140   : > { %v724_v9 = vpop.f32.mrb[32].mxu0 }
 0x141   : > { %v725_v20 = vadd.f32 %v724_v9, %v5654_v35  ;;  %v4102_v10 = vpop.f32.mrb[33].mxu0  ;;  %4459 = vmatmul.mubr.msk.f32.gmra.mrb[138].mxu0 %vm451_vm4, %v5379_v14 }
 0x142   : > { %4461 = vmatprep.mubr.msk.f32.mxu0 %vm4906_vm3, %v4907_v41  ;;  %v1070_v30 = vpop.f32.mrb[32].mxu1 }
 0x143   : > { %v4209_v12 = vpop.f32.mrb[33].mxu1 }
 0x144   : > { %v729_v16 = vpop.f32.mrb[34].mxu0 }
 0x145   : > { %v730_v13 = vadd.f32 %v729_v16, %v5667_v42  ;;  %v4105_v17 = vpop.f32.mrb[35].mxu0  ;;  %4462 = vmatmul.mubr.msk.f32.gmra.mrb[140].mxu0 %vm451_vm4, %v5390_v15 }
 0x146   : > { %4464 = vmatprep.mubr.msk.f32.mxu0 %vm4906_vm3, %v4907_v41  ;;  %v1075_v35 = vpop.f32.mrb[34].mxu1 }
 0x147   : > { %v4212_v18 = vpop.f32.mrb[35].mxu1 }
 0x148   : > { %v874_v21 = vpop.f32.mrb[36].mxu0 }
 0x149   : > { %v948_v22 = vadd.f32 %v874_v21, %v720_v2  ;;  %v4148_v14 = vpop.f32.mrb[37].mxu0  ;;  %4465 = vmatmul.mubr.msk.f32.gmra.mrb[142].mxu0 %vm451_vm4, %v5525_v24  ;;  %v3716_v24 = vld [vmem:[%s6450_s2 + $0x198] sm:$0xff] }
 0x14a   : > { %4467 = vmatprep.mubr.msk.f32.mxu0 %vm4906_vm3, %v4907_v41  ;;  %v1080_v23 = vpop.f32.mrb[36].mxu1  ;;  %v4736_v38 = vpack.c.bf16 %v3716_v24, %v3715_v32 }
 0x14b   : > { %v5779_v42 = vadd.f32 %v1050_v52, %v948_v22  ;;  %v4215_v26 = vpop.f32.mrb[37].mxu1 }
 0x14c   : > { %v879_v28 = vpop.f32.mrb[38].mxu0  ;;  %4737 = vmatpush3.bf16.msra.mxu1 %v4736_v38 }
 0x14d   : > { %v949_v15 = vadd.f32 %v879_v28, %v725_v20  ;;  %v4151_v29 = vpop.f32.mrb[39].mxu0  ;;  %4468 = vmatmul.mubr.msk.f32.gmra.mrb[144].mxu0 %vm451_vm4, %v5536_v25  ;;  %4489 = vmatprep.subr.mxu1 %v4907_v41 }
 0x14e   : > { %4470 = vmatprep.mubr.msk.f32.mxu0 %vm4906_vm3, %v4907_v41  ;;  %v1085_v33 = vpop.f32.mrb[38].mxu1 }
 0x14f   : > { %v5791_v39 = vadd.f32 %v1055_v57, %v949_v15  ;;  %v4218_v40 = vpop.f32.mrb[39].mxu1 }
 0x150   : > { %v884_v44 = vpop.f32.mrb[40].mxu0 }
 0x151   : > { %v950_v46 = vadd.f32 %v884_v44, %v730_v13  ;;  %v4154_v25 = vpop.f32.mrb[41].mxu0  ;;  %4471 = vmatmul.mubr.msk.f32.gmra.mrb[146].mxu0 %vm451_vm4, %v5646_v31 }
 0x152   : > { %4473 = vmatprep.mubr.msk.f32.mxu0 %vm4906_vm3, %v4907_v41  ;;  %v1090_v47 = vpop.f32.mrb[40].mxu1 }
 0x153   : > { %v5798_v49 = vadd.f32 %v1060_v1, %v950_v46  ;;  %v4221_v51 = vpop.f32.mrb[41].mxu1 }
 0x154   : > { %v889_v52 = vpop.f32.mrb[42].mxu0 }
 0x155   : > { %v951_v53 = vadd.f32 %v889_v52, %v5685_v50  ;;  %v4157_v54 = vpop.f32.mrb[43].mxu0  ;;  %4474 = vmatmul.mubr.msk.f32.gmra.mrb[148].mxu0 %vm451_vm4, %v5659_v36 }
 0x156   : > { %4476 = vmatprep.mubr.msk.f32.mxu0 %vm4906_vm3, %v4907_v41  ;;  %v1095_v31 = vpop.f32.mrb[42].mxu1 }
 0x157   : > { %v5805_v56 = vadd.f32 %v1065_v7, %v951_v53  ;;  %v4224_v57 = vpop.f32.mrb[43].mxu1 }
 0x158   : > { %v894_v58 = vpop.f32.mrb[44].mxu0 }
 0x159   : > { %v952_v59 = vadd.f32 %v894_v58, %v5695_v55  ;;  %v4160_v62 = vpop.f32.mrb[45].mxu0  ;;  %4477 = vmatmul.mubr.msk.f32.gmra.mrb[150].mxu0 %vm451_vm4, %v5672_v43  ;;  %v445_v55 = vld [vmem:[%s5084_s27 + $0x110] sm:$0xff]  ;;  %s405_s27 = scalar_lea.vmem %s6449_s1, %s3550_s10 }
 0x15a   : > { %4479 = vmatprep.mubr.msk.f32.mxu0 %vm4906_vm3, %v4907_v41  ;;  %v1100_v50 = vpop.f32.mrb[44].mxu1 }
 0x15b   : > { %v5812_v36 = vadd.f32 %v1070_v30, %v952_v59  ;;  %v4227_v1 = vpop.f32.mrb[45].mxu1 }
 0x15c   : > { %v899_v3 = vpop.f32.mrb[46].mxu0 }
 0x15d   : > { %v953_v4 = vadd.f32 %v899_v3, %v5702_v63  ;;  %v4163_v2 = vpop.f32.mrb[47].mxu0  ;;  %4480 = vmatmul.mubr.msk.f32.gmra.mrb[152].mxu0 %vm451_vm4, %v5683_v48 }
 0x15e   : > { %4482 = vmatprep.mubr.msk.f32.mxu0 %vm4906_vm3, %v4907_v41  ;;  %v1105_v5 = vpop.f32.mrb[46].mxu1 }
 0x15f   : > { %v5820_v43 = vadd.f32 %v1075_v35, %v953_v4  ;;  %v4230_v7 = vpop.f32.mrb[47].mxu1 }
 0x160   : > { %v904_v8 = vpop.f32.mrb[48].mxu0 }
 0x161   : > { %v954_v9 = vadd.f32 %v904_v8, %v5707_v6  ;;  %v4166_v20 = vpop.f32.mrb[49].mxu0  ;;  %4483 = vmatmul.mubr.msk.f32.gmra.mrb[154].mxu0 %vm451_vm4, %v445_v55 }
 0x162   : > { %v1110_v10 = vpop.f32.mrb[48].mxu1  ;;  %4566 = vmatprep.mubr.msk.f32.mxu0 %vm4906_vm3, %v4907_v41 }
 0x163   : > { %v5826_v63 = vadd.f32 %v1080_v23, %v954_v9  ;;  %v4233_v48 = vpop.f32.mrb[49].mxu1  ;;  %v3717_v23 = vld [vmem:[%s6450_s2 + $0x1a0] sm:$0xf] }
 0x164   : > { %v909_v30 = vpop.f32.mrb[50].mxu0  ;;  %4490 = vmatpush3.msk.msra.mxu1 %vm2023_vm5, %v3717_v23 }
 0x165   : > { %v955_v12 = vadd.f32 %v909_v30, %v5712_v11  ;;  %v4169_v16 = vpop.f32.mrb[51].mxu0  ;;  %4738 = vmatprep.subr.bf16.mxu1 %v4904_v37 }
 0x166   : > { %v1115_v13 = vpop.f32.mrb[50].mxu1 }
 0x167   : > { %v5829_v17 = vadd.f32 %v1085_v33, %v955_v12  ;;  %v4236_v35 = vpop.f32.mrb[51].mxu1 }
 0x168   : > { %v914_v18 = vpop.f32.mrb[52].mxu0  ;;  %v3748_v35 = vld [vmem:[%s6450_s2 + $0x238] sm:$0xff] }
 0x169   : > { %v956_v6 = vadd.f32 %v914_v18, %v5718_v19  ;;  %v4172_v21 = vpop.f32.mrb[53].mxu0 }
 0x16a   : > { %v1120_v22 = vpop.f32.mrb[52].mxu1 }
 0x16b   : > { %v5832_v14 = vadd.f32 %v1090_v47, %v956_v6  ;;  %v4239_v26 = vpop.f32.mrb[53].mxu1 }
 0x16c   : > { %v919_v28 = vpop.f32.mrb[54].mxu0 }
 0x16d   : > { %v957_v11 = vadd.f32 %v919_v28, %v5724_v27  ;;  %v4175_v15 = vpop.f32.mrb[55].mxu0 }
 0x16e   : > { %v1378_v29 = vpop.f32.mrb[54].mxu1 }
 0x16f   : > { %v5840_v19 = vadd.f32 %v1095_v31, %v957_v11  ;;  %v4295_v32 = vpop.f32.mrb[55].mxu1 }
 0x170   : > { %v924_v24 = vpop.f32.mrb[56].mxu0 }
 0x171   : > { %v958_v33 = vadd.f32 %v924_v24, %v5730_v34  ;;  %v4178_v38 = vpop.f32.mrb[57].mxu0 }
 0x172   : > { %v1383_v40 = vpop.f32.mrb[56].mxu1 }
 0x173   : > { %v5843_v44 = vadd.f32 %v1100_v50, %v958_v33  ;;  %v4298_v46 = vpop.f32.mrb[57].mxu1 }
 0x174   : > { %v929_v25 = vpop.f32.mrb[58].mxu0 }
 0x175   : > { %v959_v47 = vadd.f32 %v929_v25, %v5736_v45  ;;  %v4181_v51 = vpop.f32.mrb[59].mxu0 }
 0x176   : > { %v1388_v27 = vpop.f32.mrb[58].mxu1 }
 0x177   : > { %v5846_v52 = vadd.f32 %v1105_v5, %v959_v47  ;;  %v4301_v53 = vpop.f32.mrb[59].mxu1 }
 0x178   : > { %v934_v54 = vpop.f32.mrb[60].mxu0 }
 0x179   : > { %v960_v31 = vadd.f32 %v934_v54, %v5742_v60  ;;  %v4184_v57 = vpop.f32.mrb[61].mxu0 }
 0x17a   : > { %v1393_v58 = vpop.f32.mrb[60].mxu1 }
 0x17b   : > { %v5849_v59 = vadd.f32 %v1110_v10, %v960_v31  ;;  %v4304_v34 = vpop.f32.mrb[61].mxu1 }
 0x17c   : > { %v939_v62 = vpop.f32.mrb[62].mxu0 }
 0x17d   : > { %v961_v50 = vadd.f32 %v939_v62, %v5748_v61  ;;  %v4187_v1 = vpop.f32.mrb[63].mxu0 }
 0x17e   : > { %v1398_v3 = vpop.f32.mrb[62].mxu1 }
 0x17f   : > { %v5852_v4 = vadd.f32 %v1115_v13, %v961_v50  ;;  %v4307_v45 = vpop.f32.mrb[63].mxu1 }
 0x180   : > { %v944_v2 = vpop.f32.mrb[64].mxu0 }
 0x181   : > { %v962_v55 = vadd.f32 %v944_v2, %v5754_v0  ;;  %v4190_v5 = vpop.f32.mrb[65].mxu0  ;;  %v3747_v0 = vld [vmem:[%s6450_s2 + $0x230] sm:$0xff] }
 0x182   : > { %v1403_v7 = vpop.f32.mrb[64].mxu1  ;;  %v4751_v6 = vpack.c.bf16 %v3748_v35, %v3747_v0 }
 0x183   : > { %v5855_v8 = vadd.f32 %v1120_v22, %v962_v55  ;;  %v4310_v60 = vpop.f32.mrb[65].mxu1 }
 0x184   : > { %v1214_v9 = vpop.f32.mrb[66].mxu0  ;;  %4752 = vmatpush3.bf16.msra.mxu0 %v4751_v6 }
 0x185   : > { %v1288_v20 = vadd.f32 %v1214_v9, %v5779_v42  ;;  %v4246_v10 = vpop.f32.mrb[67].mxu0  ;;  %4564 = vmatprep.subr.mxu0 %v4907_v41 }
 0x186   : > { %v1408_v48 = vpop.f32.mrb[66].mxu1 }
 0x187   : > { %v5858_v30 = vadd.f32 %v1378_v29, %v1288_v20  ;;  %v4313_v61 = vpop.f32.mrb[67].mxu1 }
 0x188   : > { %v1219_v12 = vpop.f32.mrb[68].mxu0 }
 0x189   : > { %v1289_v16 = vadd.f32 %v1219_v12, %v5791_v39  ;;  %v4249_v13 = vpop.f32.mrb[69].mxu0 }
 0x18a   : > { %v1413_v18 = vpop.f32.mrb[68].mxu1 }
 0x18b   : > { %v5867_v42 = vadd.f32 %v1383_v40, %v1289_v16  ;;  %v4316_v21 = vpop.f32.mrb[69].mxu1 }
 0x18c   : > { %v1224_v22 = vpop.f32.mrb[70].mxu0 }
 0x18d   : > { %v1290_v26 = vadd.f32 %v1224_v22, %v5798_v49  ;;  %v4252_v23 = vpop.f32.mrb[71].mxu0 }
 0x18e   : > { %v1418_v39 = vpop.f32.mrb[70].mxu1 }
 0x18f   : > { %v5871_v28 = vadd.f32 %v1388_v27, %v1290_v26  ;;  %v4319_v11 = vpop.f32.mrb[71].mxu1 }
 0x190   : > { %v1229_v15 = vpop.f32.mrb[72].mxu0 }
 0x191   : > { %v1291_v29 = vadd.f32 %v1229_v15, %v5805_v56  ;;  %v4255_v32 = vpop.f32.mrb[73].mxu0 }
 0x192   : > { %v1423_v24 = vpop.f32.mrb[72].mxu1 }
 0x193   : > { %v5874_v33 = vadd.f32 %v1393_v58, %v1291_v29  ;;  %v4322_v38 = vpop.f32.mrb[73].mxu1 }
 0x194   : > { %v1234_v40 = vpop.f32.mrb[74].mxu0 }
 0x195   : > { %v1292_v46 = vadd.f32 %v1234_v40, %v5812_v36  ;;  %v4258_v25 = vpop.f32.mrb[75].mxu0  ;;  %v3749_v36 = vld [vmem:[%s6450_s2 + $0x240] sm:$0xf] }
 0x196   : > { %v1428_v49 = vpop.f32.mrb[74].mxu1  ;;  %4565 = vmatpush3.msk.msra.mxu0 %vm2023_vm5, %v3749_v36 }
 0x197   : > { %v5877_v47 = vadd.f32 %v1398_v3, %v1292_v46  ;;  %v4325_v51 = vpop.f32.mrb[75].mxu1  ;;  %4756 = vmatprep.subr.bf16.mxu0 %v4904_v37 }
 0x198   : > { %v1239_v53 = vpop.f32.mrb[76].mxu0 }
 0x199   : > { %v1293_v27 = vadd.f32 %v1239_v53, %v5820_v43  ;;  %v4261_v54 = vpop.f32.mrb[77].mxu0 }
 0x19a   : > { %v1433_v31 = vpop.f32.mrb[76].mxu1 }
 0x19b   : > { %v5880_v57 = vadd.f32 %v1403_v7, %v1293_v27  ;;  %v4328_v56 = vpop.f32.mrb[77].mxu1 }
 0x19c   : > { %v1244_v34 = vpop.f32.mrb[78].mxu0 }
 0x19d   : > { %v1294_v58 = vadd.f32 %v1244_v34, %v5826_v63  ;;  %v4264_v62 = vpop.f32.mrb[79].mxu0 }
 0x19e   : > { %v1438_v50 = vpop.f32.mrb[78].mxu1 }
 0x19f   : > { %v5887_v1 = vadd.f32 %v1408_v48, %v1294_v58  ;;  %v4331_v3 = vpop.f32.mrb[79].mxu1 }
 0x1a0   : > { %v1249_v43 = vpop.f32.mrb[80].mxu0 }
 0x1a1   : > { %v1295_v45 = vadd.f32 %v1249_v43, %v5829_v17  ;;  %v4267_v2 = vpop.f32.mrb[81].mxu0 }
 0x1a2   : > { %v1443_v55 = vpop.f32.mrb[80].mxu1 }
 0x1a3   : > { %v5891_v5 = vadd.f32 %v1413_v18, %v1295_v45  ;;  %v4334_v63 = vpop.f32.mrb[81].mxu1 }
 0x1a4   : > { %v1254_v7 = vpop.f32.mrb[82].mxu0 }
 0x1a5   : > { %v1296_v60 = vadd.f32 %v1254_v7, %v5832_v14  ;;  %v4270_v9 = vpop.f32.mrb[83].mxu0 }
 0x1a6   : > { %v1448_v20 = vpop.f32.mrb[82].mxu1 }
 0x1a7   : > { %v5894_v10 = vadd.f32 %v1418_v39, %v1296_v60  ;;  %v4337_v48 = vpop.f32.mrb[83].mxu1 }
 0x1a8   : > { %v1259_v61 = vpop.f32.mrb[84].mxu0 }
 0x1a9   : > { %v1297_v12 = vadd.f32 %v1259_v61, %v5840_v19  ;;  %v4273_v16 = vpop.f32.mrb[85].mxu0 }
 0x1aa   : > { %v1718_v13 = vpop.f32.mrb[84].mxu1 }
 0x1ab   : > { %v5897_v0 = vadd.f32 %v1423_v24, %v1297_v12  ;;  %v4393_v17 = vpop.f32.mrb[85].mxu1 }
 0x1ac   : > { %v1264_v35 = vpop.f32.mrb[86].mxu0 }
 0x1ad   : > { %v1298_v18 = vadd.f32 %v1264_v35, %v5843_v44  ;;  %v4276_v6 = vpop.f32.mrb[87].mxu0 }
 0x1ae   : > { %v1723_v21 = vpop.f32.mrb[86].mxu1 }
 0x1af   : > { %v5900_v22 = vadd.f32 %v1428_v49, %v1298_v18  ;;  %v4396_v14 = vpop.f32.mrb[87].mxu1 }
 0x1b0   : > { %v1269_v26 = vpop.f32.mrb[88].mxu0 }
 0x1b1   : > { %v1299_v23 = vadd.f32 %v1269_v26, %v5846_v52  ;;  %v4279_v39 = vpop.f32.mrb[89].mxu0 }
 0x1b2   : > { %v1728_v11 = vpop.f32.mrb[88].mxu1 }
 0x1b3   : > { %v5903_v15 = vadd.f32 %v1433_v31, %v1299_v23  ;;  %v4399_v19 = vpop.f32.mrb[89].mxu1 }
 0x1b4   : > { %v1274_v29 = vpop.f32.mrb[90].mxu0 }
 0x1b5   : > { %v1300_v32 = vadd.f32 %v1274_v29, %v5849_v59  ;;  %v4282_v24 = vpop.f32.mrb[91].mxu0 }
 0x1b6   : > { %v1733_v38 = vpop.f32.mrb[90].mxu1 }
 0x1b7   : > { %v5906_v40 = vadd.f32 %v1438_v50, %v1300_v32  ;;  %v4402_v44 = vpop.f32.mrb[91].mxu1 }
 0x1b8   : > { %v1279_v46 = vpop.f32.mrb[92].mxu0 }
 0x1b9   : > { %v1301_v25 = vadd.f32 %v1279_v46, %v5852_v4  ;;  %v4285_v49 = vpop.f32.mrb[93].mxu0 }
 0x1ba   : > { %v1738_v51 = vpop.f32.mrb[92].mxu1 }
 0x1bb   : > { %v5909_v53 = vadd.f32 %v1443_v55, %v1301_v25  ;;  %v4405_v52 = vpop.f32.mrb[93].mxu1 }
 0x1bc   : > { %v1284_v27 = vpop.f32.mrb[94].mxu0 }
 0x1bd   : > { %v1302_v54 = vadd.f32 %v1284_v27, %v5855_v8  ;;  %v4288_v31 = vpop.f32.mrb[95].mxu0 }
 0x1be   : > { %v1743_v56 = vpop.f32.mrb[94].mxu1 }
 0x1bf   : > { %v5912_v34 = vadd.f32 %v1448_v20, %v1302_v54  ;;  %v4408_v59 = vpop.f32.mrb[95].mxu1 }
 0x1c0   : > { %v1554_v58 = vpop.f32.mrb[96].mxu0 }
 0x1c1   : > { %v1628_v62 = vadd.f32 %v1554_v58, %v5858_v30  ;;  %v4344_v36 = vpop.f32.mrb[97].mxu0 }
 0x1c2   : > { %v1748_v50 = vpop.f32.mrb[96].mxu1 }
 0x1c3   : > { %v5915_v3 = vadd.f32 %v1718_v13, %v1628_v62  ;;  %v4411_v4 = vpop.f32.mrb[97].mxu1 }
 0x1c4   : > { %v1559_v43 = vpop.f32.mrb[98].mxu0 }
 0x1c5   : > { %v1629_v45 = vadd.f32 %v1559_v43, %v5867_v42  ;;  %v4347_v2 = vpop.f32.mrb[99].mxu0 }
 0x1c6   : > { %v1753_v55 = vpop.f32.mrb[98].mxu1 }
 0x1c7   : > { %v5918_v63 = vadd.f32 %v1723_v21, %v1629_v45  ;;  %v4414_v8 = vpop.f32.mrb[99].mxu1 }
 0x1c8   : > { %v1564_v7 = vpop.f32.mrb[100].mxu0 }
 0x1c9   : > { %v1630_v60 = vadd.f32 %v1564_v7, %v5871_v28  ;;  %v4350_v9 = vpop.f32.mrb[101].mxu0 }
 0x1ca   : > { %v1758_v20 = vpop.f32.mrb[100].mxu1 }
 0x1cb   : > { %v5921_v48 = vadd.f32 %v1728_v11, %v1630_v60  ;;  %v4417_v30 = vpop.f32.mrb[101].mxu1 }
 0x1cc   : > { %v1569_v61 = vpop.f32.mrb[102].mxu0 }
 0x1cd   : > { %v1631_v12 = vadd.f32 %v1569_v61, %v5874_v33  ;;  %v4353_v16 = vpop.f32.mrb[103].mxu0 }
 0x1ce   : > { %v1763_v13 = vpop.f32.mrb[102].mxu1 }
 0x1cf   : > { %v5924_v17 = vadd.f32 %v1733_v38, %v1631_v12  ;;  %v4420_v42 = vpop.f32.mrb[103].mxu1 }
 0x1d0   : > { %v1574_v35 = vpop.f32.mrb[104].mxu0 }
 0x1d1   : > { %v1632_v18 = vadd.f32 %v1574_v35, %v5877_v47  ;;  %v4356_v6 = vpop.f32.mrb[105].mxu0 }
 0x1d2   : > { %v1768_v21 = vpop.f32.mrb[104].mxu1 }
 0x1d3   : > { %v5927_v14 = vadd.f32 %v1738_v51, %v1632_v18  ;;  %v4423_v28 = vpop.f32.mrb[105].mxu1 }
 0x1d4   : > { %v1579_v26 = vpop.f32.mrb[106].mxu0 }
 0x1d5   : > { %v1633_v23 = vadd.f32 %v1579_v26, %v5880_v57  ;;  %v4359_v39 = vpop.f32.mrb[107].mxu0 }
 0x1d6   : > { %v1773_v11 = vpop.f32.mrb[106].mxu1  ;;  %v3712_v39 = vld [vmem:[%s6450_s2 + $0x168] sm:$0xff] }
 0x1d7   : > { %v5930_v19 = vadd.f32 %v1743_v56, %v1633_v23  ;;  %v4426_v33 = vpop.f32.mrb[107].mxu1 }
 0x1d8   : > { %v1584_v29 = vpop.f32.mrb[108].mxu0 }
 0x1d9   : > { %v1634_v32 = vadd.f32 %v1584_v29, %v5887_v1  ;;  %v4362_v24 = vpop.f32.mrb[109].mxu0 }
 0x1da   : > { %v1778_v38 = vpop.f32.mrb[108].mxu1 }
 0x1db   : > { %v5933_v44 = vadd.f32 %v1748_v50, %v1634_v32  ;;  %v4429_v47 = vpop.f32.mrb[109].mxu1 }
 0x1dc   : > { %v1589_v46 = vpop.f32.mrb[110].mxu0 }
 0x1dd   : > { %v1635_v25 = vadd.f32 %v1589_v46, %v5891_v5  ;;  %v4365_v49 = vpop.f32.mrb[111].mxu0 }
 0x1de   : > { %v1783_v51 = vpop.f32.mrb[110].mxu1 }
 0x1df   : > { %v5936_v52 = vadd.f32 %v1753_v55, %v1635_v25  ;;  %v4432_v57 = vpop.f32.mrb[111].mxu1 }
 0x1e0   : > { %v1594_v27 = vpop.f32.mrb[112].mxu0 }
 0x1e1   : > { %v1636_v54 = vadd.f32 %v1594_v27, %v5894_v10  ;;  %v4368_v31 = vpop.f32.mrb[113].mxu0 }
 0x1e2   : > { %v1788_v56 = vpop.f32.mrb[112].mxu1 }
 0x1e3   : > { %v5939_v59 = vadd.f32 %v1758_v20, %v1636_v54  ;;  %v4435_v1 = vpop.f32.mrb[113].mxu1 }
 0x1e4   : > { %v1599_v58 = vpop.f32.mrb[114].mxu0  ;;  %v3727_v1 = vld [vmem:[%s6450_s2 + $0x1c0] sm:$0xff] }
 0x1e5   : > { %v1637_v62 = vadd.f32 %v1599_v58, %v5897_v0  ;;  %v4371_v36 = vpop.f32.mrb[115].mxu0 }
 0x1e7   : > { %v5942_v50 = vadd.f32 %v1763_v13, %v1637_v62 }
 0x1e8   : > { %v1604_v5 = vpop.f32.mrb[116].mxu0 }
 0x1e9   : > { %v1638_v4 = vadd.f32 %v1604_v5, %v5900_v22  ;;  %v4374_v43 = vpop.f32.mrb[117].mxu0  ;;  %v1971_v22 = vlaneseq }
 0x1eb   : > { %v5945_v45 = vadd.f32 %v1768_v21, %v1638_v4  ;;  %v5957_v42 = vshrl.u32 %v1971_v22, 7 }
 0x1ec   : > { %v1609_v2 = vpop.f32.mrb[118].mxu0 }
 0x1ed   : > { %v1639_v10 = vadd.f32 %v1609_v2, %v5903_v15  ;;  %v4377_v55 = vpop.f32.mrb[119].mxu0  ;;  %v1973_v6 = vsub.s32 0, %v5957_v42 }
 0x1ef   : > { %v5948_v8 = vadd.f32 %v1773_v11, %v1639_v10  ;;  %v3728_v10 = vld [vmem:[%s6450_s2 + $0x1c8] sm:$0xf] }
 0x1f0   : > { %v1614_v7 = vpop.f32.mrb[120].mxu0 }
 0x1f1   : > { %v1640_v60 = vadd.f32 %v1614_v7, %v5906_v40  ;;  %v4380_v9 = vpop.f32.mrb[121].mxu0 }
 0x1f3   : > { %v5951_v0 = vadd.f32 %v1778_v38, %v1640_v60  ;;  %v3734_v60 = vld [vmem:[%s6450_s2 + $0x1e8] sm:$0xff] }
 0x1f4   : > { %v1619_v20 = vpop.f32.mrb[122].mxu0 }
 0x1f5   : > { %v1641_v30 = vadd.f32 %v1619_v20, %v5909_v53  ;;  %v4383_v61 = vpop.f32.mrb[123].mxu0  ;;  %v5966_v53 = vld [vmem:[%s6452_s4] sm:$0xff] }
 0x1f6   : > { %v5969_v26 = vrot.slane %v5966_v53, %v1973_v6  ;;  %v3761_v20 = vld [vmem:[%s6450_s2 + $0x280] sm:$0xff] }
 0x1f7   : > { %v5954_v12 = vadd.f32 %v1783_v51, %v1641_v30 }
 0x1f8   : > { %v1624_v16 = vpop.f32.mrb[124].mxu0 }
 0x1f9   : > { %v1642_v13 = vadd.f32 %v1624_v16, %v5912_v34  ;;  %v4386_v15 = vpop.f32.mrb[125].mxu0 }
 0x1fb   : > { %v5959_v35 = vadd.f32 %v1788_v56, %v1642_v13  ;;  %v3726_v56 = vld [vmem:[%s6450_s2 + $0x1b8] sm:$0xff] }
 0x1fc   : > { %v1882_v18 = vpop.f32.mrb[126].mxu0  ;;  %v4742_v62 = vpack.c.bf16 %v3727_v1, %v3726_v56 }
 0x1fd   : > { %v1956_v40 = vadd.f32 %v1882_v18, %v5915_v3  ;;  %v4442_v21 = vpop.f32.mrb[127].mxu0  ;;  %v3713_v3 = vld [vmem:[%s6450_s2 + $0x170] sm:$0xff] }
 0x1fe   : > { %v4739_v29 = vpack.c.bf16 %v3713_v3, %v3712_v39  ;;  %v3763_v39 = vld [vmem:[%s6450_s2 + $0x290] sm:$0xf] }
 0x200   : > { %v1887_v28 = vpop.f32.mrb[128].mxu0 }
 0x201   : > { %v1957_v34 = vadd.f32 %v1887_v28, %v5918_v63  ;;  %v4445_v23 = vpop.f32.mrb[129].mxu0 }
 0x203   : > { %v1976_v11 = vadd.f32 %v5969_v26, %v1957_v34  ;;  %v3735_v34 = vld [vmem:[%s6450_s2 + $0x1f0] sm:$0xf] }
 0x204   : > { %v1892_v33 = vpop.f32.mrb[130].mxu0 }
 0x205   : > { %v1991_v32 = vmax.f32 %v1976_v11, 0.0  ;;  %v1958_v24 = vadd.f32 %v1892_v33, %v5921_v48  ;;  %v4448_v38 = vpop.f32.mrb[131].mxu0  ;;  %v3714_v48 = vld [vmem:[%s6450_s2 + $0x178] sm:$0xf] }
 0x206   : > { %v3741_v38 = vld [vmem:[%s6450_s2 + $0x210] sm:$0xff] }
 0x207   : > { %v1977_v63 = vadd.f32 %v5969_v26, %v1958_v24  ;;  %4492 = vmatmul.mubr.msk.f32.vlgmr.msra.gmra.mrb[114].mxu1 %vm2013_vm6, %v1991_v32  ;;  %v3740_v24 = vld [vmem:[%s6450_s2 + $0x208] sm:$0xff] }
 0x208   : > { %v1897_v47 = vpop.f32.mrb[132].mxu0  ;;  %4740 = vmatpush3.bf16.msra.mxu1 %v4739_v29  ;;  %4494 = vmatprep.mubr.msk.f32.mxu1 %vm4906_vm3, %v4907_v41 }
 0x209   : > { %v1992_v46 = vmax.f32 %v1977_v63, 0.0  ;;  %v1959_v25 = vadd.f32 %v1897_v47, %v5924_v17  ;;  %v4451_v49 = vpop.f32.mrb[133].mxu0  ;;  %4504 = vmatprep.subr.mxu1 %v4907_v41  ;;  %v1975_v17 = vadd.f32 %v5969_v26, %v1956_v40  ;;  %v4748_v63 = vpack.c.bf16 %v3741_v38, %v3740_v24 }
 0x20b   : > { %v5990_v51 = vadd.f32 %v5969_v26, %v1959_v25  ;;  %4495 = vmatmul.mubr.msk.f32.gmra.mrb[116].mxu1 %vm2013_vm6, %v1992_v46  ;;  %v1990_v36 = vmax.f32 %v1975_v17, 0.0 }
 0x20c   : > { %v1902_v57 = vpop.f32.mrb[134].mxu0  ;;  %4497 = vmatprep.mubr.msk.f32.mxu1 %vm4906_vm3, %v4907_v41  ;;  %4505 = vmatpush3.msk.msra.mxu1 %vm2023_vm5, %v3714_v48 }
 0x20d   : > { %v1993_v27 = vmax.f32 %v5990_v51, 0.0  ;;  %v1960_v54 = vadd.f32 %v1902_v57, %v5927_v14  ;;  %v4454_v31 = vpop.f32.mrb[135].mxu0  ;;  %4741 = vmatprep.subr.bf16.mxu1 %v4904_v37 }
 0x20f   : > { %4498 = vmatmul.mubr.msk.f32.gmra.mrb[118].mxu1 %vm2013_vm6, %v1993_v27  ;;  %v1979_v6 = vadd.f32 %v5969_v26, %v1960_v54  ;;  %v3742_v54 = vld [vmem:[%s6450_s2 + $0x218] sm:$0xf] }
 0x210   : > { %v1907_v58 = vpop.f32.mrb[136].mxu0  ;;  %4506 = vmatprep.mubr.msk.f32.mxu1 %vm4906_vm3, %v4907_v41 }
 0x211   : > { %v1961_v14 = vadd.f32 %v1907_v58, %v5930_v19  ;;  %v4457_v5 = vpop.f32.mrb[137].mxu0  ;;  %v1994_v3 = vmax.f32 %v1979_v6, 0.0  ;;  %v3783_v6 = vld [vmem:[%s6450_s2 + $0x310] sm:$0xff] }
 0x213   : > { %4507 = vmatmul.mubr.msk.f32.vlgmr.msra.gmra.mrb[120].mxu1 %vm2013_vm6, %v1990_v36  ;;  %v1980_v11 = vadd.f32 %v5969_v26, %v1961_v14  ;;  %v3755_v36 = vld [vmem:[%s6450_s2 + $0x260] sm:$0xff] }
 0x214   : > { %v1912_v4 = vpop.f32.mrb[138].mxu0  ;;  %4743 = vmatpush3.bf16.msra.mxu1 %v4742_v62  ;;  %4509 = vmatprep.mubr.msk.f32.mxu1 %vm4906_vm3, %v4907_v41  ;;  %v3754_v62 = vld [vmem:[%s6450_s2 + $0x258] sm:$0xff] }
 0x215   : > { %v1962_v43 = vadd.f32 %v1912_v4, %v5933_v44  ;;  %v4460_v2 = vpop.f32.mrb[139].mxu0  ;;  %4519 = vmatprep.subr.mxu1 %v4907_v41  ;;  %v3733_v44 = vld [vmem:[%s6450_s2 + $0x1e0] sm:$0xff]  ;;  %v1995_v47 = vmax.f32 %v1980_v11, 0.0  ;;  %v4754_v5 = vpack.c.bf16 %v3755_v36, %v3754_v62 }
 0x216   : > { %v4745_v61 = vpack.c.bf16 %v3734_v60, %v3733_v44 }
 0x217   : > { %4510 = vmatmul.mubr.msk.f32.gmra.mrb[122].mxu1 %vm2013_vm6, %v1991_v32 }
 0x218   : > { %v1917_v19 = vpop.f32.mrb[140].mxu0  ;;  %4512 = vmatprep.mubr.msk.f32.mxu1 %vm4906_vm3, %v4907_v41  ;;  %4520 = vmatpush3.msk.msra.mxu1 %vm2023_vm5, %v3728_v10 }
 0x219   : > { %v1963_v55 = vadd.f32 %v1917_v19, %v5936_v52  ;;  %v4463_v7 = vpop.f32.mrb[141].mxu0  ;;  %4744 = vmatprep.subr.bf16.mxu1 %v4904_v37  ;;  %v3762_v52 = vld [vmem:[%s6450_s2 + $0x288] sm:$0xff] }
 0x21a   : > { %v4757_v15 = vpack.c.bf16 %v3762_v52, %v3761_v20  ;;  %v3756_v19 = vld [vmem:[%s6450_s2 + $0x268] sm:$0xf]  ;;  %v3769_v7 = vld [vmem:[%s6450_s2 + $0x2b0] sm:$0xff]  ;;  %v3776_v52 = vld [vmem:[%s6450_s2 + $0x2d8] sm:$0xff] }
 0x21b   : > { %v1982_v9 = vadd.f32 %v5969_v26, %v1963_v55  ;;  %4513 = vmatmul.mubr.msk.f32.gmra.mrb[124].mxu1 %vm2013_vm6, %v1992_v46  ;;  %v3768_v55 = vld [vmem:[%s6450_s2 + $0x2a8] sm:$0xff]  ;;  %v3775_v20 = vld [vmem:[%s6450_s2 + $0x2d0] sm:$0xff] }
 0x21c   : > { %v1922_v30 = vpop.f32.mrb[142].mxu0  ;;  %4521 = vmatprep.mubr.msk.f32.mxu1 %vm4906_vm3, %v4907_v41  ;;  %v4760_v44 = vpack.c.bf16 %v3769_v7, %v3768_v55 }
 0x21d   : > { %v6040_v22 = vmax.f32 %v1982_v9, 0.0  ;;  %v1964_v16 = vadd.f32 %v1922_v30, %v5939_v59  ;;  %v4466_v13 = vpop.f32.mrb[143].mxu0  ;;  %v4769_v30 = vpack.c.bf16 %v3776_v52, %v3775_v20 }
 0x21f   : > { %v6044_v18 = vadd.f32 %v5969_v26, %v1964_v16  ;;  %4522 = vmatmul.mubr.msk.f32.vlgmr.msra.gmra.mrb[126].mxu1 %vm2013_vm6, %v1992_v46  ;;  %4567 = vmatmul.mubr.msk.f32.vlgmr.msra.gmra.mrb[156].mxu0 %vm2013_vm6, %v6040_v22  ;;  %v1981_v46 = vadd.f32 %v5969_v26, %v1962_v43  ;;  %v3777_v16 = vld [vmem:[%s6450_s2 + $0x2e0] sm:$0xff] }
 0x220   : > { %v1927_v40 = vpop.f32.mrb[144].mxu0  ;;  %4746 = vmatpush3.bf16.msra.mxu1 %v4745_v61  ;;  %4524 = vmatprep.mubr.msk.f32.mxu1 %vm4906_vm3, %v4907_v41  ;;  %v3780_v61 = vld [vmem:[%s6450_s2 + $0x2f8] sm:$0xff] }
 0x221   : > { %v1998_v21 = vmax.f32 %v6044_v18, 0.0  ;;  %v1965_v59 = vadd.f32 %v1927_v40, %v5942_v50  ;;  %4569 = vmatprep.mubr.msk.f32.mxu0 %vm4906_vm3, %v4907_v41  ;;  %v4469_v28 = vpop.f32.mrb[145].mxu0  ;;  %4534 = vmatprep.subr.mxu1 %v4907_v41  ;;  %v1996_v57 = vmax.f32 %v1981_v46, 0.0  ;;  %v3782_v40 = vld [vmem:[%s6450_s2 + $0x308] sm:$0xff] }
 0x222   : > { %4758 = vmatpush3.bf16.msra.mxu0 %v4757_v15  ;;  %v3778_v15 = vld [vmem:[%s6450_s2 + $0x2e8] sm:$0xff]  ;;  %v3784_v28 = vld [vmem:[%s6450_s2 + $0x318] sm:$0xff] }
 0x223   : > { %v1984_v23 = vadd.f32 %v5969_v26, %v1965_v59  ;;  %4525 = vmatmul.mubr.msk.f32.gmra.mrb[128].mxu1 %vm2013_vm6, %v1993_v27  ;;  %4570 = vmatmul.mubr.msk.f32.gmra.mrb[158].mxu0 %vm2013_vm6, %v1998_v21  ;;  %v4772_v18 = vpack.c.bf16 %v3778_v15, %v3777_v16  ;;  %v3779_v59 = vld [vmem:[%s6450_s2 + $0x2f0] sm:$0xff] }
 0x224   : > { %v1932_v50 = vpop.f32.mrb[146].mxu0  ;;  %4527 = vmatprep.mubr.msk.f32.mxu1 %vm4906_vm3, %v4907_v41  ;;  %4535 = vmatpush3.msk.msra.mxu1 %vm2023_vm5, %v3735_v34 }
 0x225   : > { %v1999_v33 = vmax.f32 %v1984_v23, 0.0  ;;  %v6073_v29 = vadd.f32 %v1932_v50, %v5945_v45  ;;  %4572 = vmatprep.mubr.msk.f32.mxu0 %vm4906_vm3, %v4907_v41  ;;  %v4472_v32 = vpop.f32.mrb[147].mxu0  ;;  %4747 = vmatprep.subr.bf16.mxu1 %v4904_v37 }
 0x226   : > { %4594 = vmatprep.subr.mxu0 %v4907_v41 }
 0x227   : > { %4528 = vmatmul.mubr.msk.f32.gmra.mrb[130].mxu1 %vm2013_vm6, %v1994_v3  ;;  %4573 = vmatmul.mubr.msk.f32.gmra.mrb[160].mxu0 %vm2013_vm6, %v1999_v33 }
 0x228   : > { %v1937_v45 = vpop.f32.mrb[148].mxu0  ;;  %4536 = vmatprep.mubr.msk.f32.mxu1 %vm4906_vm3, %v4907_v41  ;;  %4595 = vmatpush3.msk.msra.mxu0 %vm2023_vm5, %v3763_v39 }
 0x229   : > { %v1967_v25 = vadd.f32 %v1937_v45, %v5948_v8  ;;  %v4475_v49 = vpop.f32.mrb[149].mxu0  ;;  %4596 = vmatprep.mubr.msk.f32.mxu0 %vm4906_vm3, %v4907_v41  ;;  %4762 = vmatprep.subr.bf16.mxu0 %v4904_v37 }
 0x22b   : > { %v1986_v48 = vadd.f32 %v5969_v26, %v1967_v25  ;;  %4537 = vmatmul.mubr.msk.f32.vlgmr.msra.gmra.mrb[132].mxu1 %vm2013_vm6, %v1995_v47 }
 0x22c   : > { %v1942_v51 = vpop.f32.mrb[150].mxu0  ;;  %4749 = vmatpush3.bf16.msra.mxu1 %v4748_v63  ;;  %4539 = vmatprep.mubr.msk.f32.mxu1 %vm4906_vm3, %v4907_v41 }
 0x22d   : > { %v2001_v17 = vmax.f32 %v1986_v48, 0.0  ;;  %v1968_v27 = vadd.f32 %v1942_v51, %v5951_v0  ;;  %v4478_v8 = vpop.f32.mrb[151].mxu0  ;;  %4549 = vmatprep.subr.mxu1 %v4907_v41 }
 0x22f   : > { %v1987_v31 = vadd.f32 %v5969_v26, %v1968_v27  ;;  %4540 = vmatmul.mubr.msk.f32.gmra.mrb[134].mxu1 %vm2013_vm6, %v1996_v57  ;;  %4597 = vmatmul.mubr.msk.f32.vlgmr.msra.gmra.mrb[162].mxu0 %vm2013_vm6, %v2001_v17 }
 0x230   : > { %v1947_v56 = vpop.f32.mrb[152].mxu0  ;;  %4542 = vmatprep.mubr.msk.f32.mxu1 %vm4906_vm3, %v4907_v41  ;;  %4550 = vmatpush3.msk.msra.mxu1 %vm2023_vm5, %v3742_v54 }
 0x231   : > { %v2002_v0 = vmax.f32 %v1987_v31, 0.0  ;;  %v1969_v1 = vadd.f32 %v1947_v56, %v5954_v12  ;;  %4599 = vmatprep.mubr.msk.f32.mxu0 %vm4906_vm3, %v4907_v41  ;;  %v4481_v58 = vpop.f32.mrb[153].mxu0  ;;  %4753 = vmatprep.subr.bf16.mxu1 %v4904_v37 }
 0x233   : > { %v1988_v14 = vadd.f32 %v5969_v26, %v1969_v1  ;;  %4543 = vmatmul.mubr.msk.f32.gmra.mrb[136].mxu1 %vm2013_vm6, %v6040_v22  ;;  %4600 = vmatmul.mubr.msk.f32.gmra.mrb[164].mxu0 %vm2013_vm6, %v2002_v0 }
 0x234   : > { %v1952_v12 = vpop.f32.mrb[154].mxu0  ;;  %4551 = vmatprep.mubr.msk.f32.mxu1 %vm4906_vm3, %v4907_v41  ;;  %4602 = vmatprep.mubr.msk.f32.mxu0 %vm4906_vm3, %v4907_v41 }
 0x235   : > { %v2003_v4 = vmax.f32 %v1988_v14, 0.0  ;;  %v1970_v43 = vadd.f32 %v1952_v12, %v5959_v35  ;;  %v4484_v2 = vpop.f32.mrb[155].mxu0  ;;  %v1985_v35 = vadd.f32 %v5969_v26, %v6073_v29 }
 0x237   : > { %v1989_v10 = vadd.f32 %v5969_v26, %v1970_v43  ;;  %4552 = vmatmul.mubr.msk.f32.vlgmr.msra.gmra.mrb[138].mxu1 %vm2013_vm6, %v1996_v57  ;;  %4603 = vmatmul.mubr.msk.f32.gmra.mrb[166].mxu0 %vm2013_vm6, %v2003_v4  ;;  %v2000_v60 = vmax.f32 %v1985_v35, 0.0  ;;  %v3770_v26 = vld [vmem:[%s6450_s2 + $0x2b8] sm:$0xf] }
 0x238   : > { %4755 = vmatpush3.bf16.msra.mxu1 %v4754_v5  ;;  %4554 = vmatprep.mubr.msk.f32.mxu1 %vm4906_vm3, %v4907_v41 }
 0x239   : > { %4579 = vmatprep.subr.mxu1 %v4907_v41  ;;  %4630 = vmatprep.mubr.msk.f32.mxu0 %vm4906_vm3, %v4907_v41  ;;  %v2004_v9 = vmax.f32 %v1989_v10, 0.0 }
 0x23b   : > { %4555 = vmatmul.mubr.msk.f32.gmra.mrb[140].mxu1 %vm2013_vm6, %v6040_v22  ;;  %v3781_v22 = vld [vmem:[%s6450_s2 + $0x300] sm:$0xff] }
 0x23c   : > { %4557 = vmatprep.mubr.msk.f32.mxu1 %vm4906_vm3, %v4907_v41  ;;  %4580 = vmatpush3.msk.msra.mxu1 %vm2023_vm5, %v3756_v19  ;;  %v4763_v13 = vpack.c.bf16 %v3781_v22, %v3780_v61 }
 0x23d   : > { %4759 = vmatprep.subr.bf16.mxu1 %v4904_v37 }
 0x23e   : > { %4764 = vmatpush3.bf16.msra.mxu0 %v4763_v13 }
 0x23f   : > { %4558 = vmatmul.mubr.msk.f32.gmra.mrb[142].mxu1 %vm2013_vm6, %v1998_v21  ;;  %4765 = vmatprep.subr.bf16.mxu0 %v4904_v37  ;;  %v4766_v21 = vpack.c.bf16 %v3783_v6, %v3782_v40 }
 0x240   : > { %4581 = vmatprep.mubr.msk.f32.mxu1 %vm4906_vm3, %v4907_v41 }
 0x242   : > { %4767 = vmatpush3.bf16.msra.mxu0 %v4766_v21 }
 0x243   : > { %4582 = vmatmul.mubr.msk.f32.vlgmr.msra.gmra.mrb[144].mxu1 %vm2013_vm6, %v2000_v60  ;;  %4628 = vmatprep.subr.mxu0 %v4907_v41 }
 0x244   : > { %4761 = vmatpush3.bf16.msra.mxu1 %v4760_v44  ;;  %4584 = vmatprep.mubr.msk.f32.mxu1 %vm4906_vm3, %v4907_v41 }
 0x245   : > { %4609 = vmatprep.subr.mxu1 %v4907_v41 }
 0x246   : > { %4629 = vmatpush3.msra.mxu0 %v3784_v28 }
 0x247   : > { %4585 = vmatmul.mubr.msk.f32.gmra.mrb[146].mxu1 %vm2013_vm6, %v2001_v17  ;;  %4774 = vmatprep.subr.bf16.mxu0 %v4904_v37 }
 0x248   : > { %4587 = vmatprep.mubr.msk.f32.mxu1 %vm4906_vm3, %v4907_v41  ;;  %4610 = vmatpush3.msk.msra.mxu1 %vm2023_vm5, %v3770_v26 }
 0x249   : > { %4768 = vmatprep.subr.bf16.mxu1 %v4904_v37 }
 0x24b   : > { %4588 = vmatmul.mubr.msk.f32.gmra.mrb[148].mxu1 %vm2013_vm6, %v2002_v0 }
 0x24c   : > { %4611 = vmatprep.mubr.msk.f32.mxu1 %vm4906_vm3, %v4907_v41 }
 0x24f   : > { %4612 = vmatmul.mubr.msk.f32.vlgmr.msra.gmra.mrb[150].mxu1 %vm2013_vm6, %v2002_v0 }
 0x250   : > { %4614 = vmatprep.mubr.msk.f32.mxu1 %vm4906_vm3, %v4907_v41  ;;  %4770 = vmatpush3.bf16.msra.mxu1 %v4769_v30 }
 0x251   : > { %4771 = vmatprep.subr.bf16.mxu1 %v4904_v37 }
 0x253   : > { %4615 = vmatmul.mubr.msk.f32.gmra.mrb[152].mxu1 %vm2013_vm6, %v2003_v4 }
 0x254   : > { %4617 = vmatprep.mubr.msk.f32.mxu1 %vm4906_vm3, %v4907_v41  ;;  %4773 = vmatpush3.bf16.msra.mxu1 %v4772_v18 }
 0x255   : > { %4647 = vmatprep.subr.mxu1 %v4907_v41 }
 0x257   : > { %4618 = vmatmul.mubr.msk.f32.gmra.mrb[154].mxu1 %vm2013_vm6, %v2004_v9 }
 0x258   : > { %4649 = vmatprep.mubr.msk.f32.mxu1 %vm4906_vm3, %v4907_v41  ;;  %4648 = vmatpush3.msra.mxu1 %v3779_v59 }
 0x259   : > { %4780 = vmatprep.subr.bf16.mxu1 %v4904_v37 }
 0x25b   : > { %4650 = vmatmul.mubr.f32.vlgmr.msra.gmra.mrb[156].mxu1 %v4907_v41 }
 0x25c   : > { %4652 = vmatprep.mubr.msk.f32.mxu1 %vm4906_vm3, %v4907_v41 }
 0x2da   : > { %v2093_v34 = vpop.f32.mrb[114].mxu1 }
 0x2db   : > { %v4493_v23 = vpop.f32.mrb[115].mxu1 }
 0x2de   : > { %v2098_v50 = vpop.f32.mrb[116].mxu1 }
 0x2df   : > { %v4496_v39 = vpop.f32.mrb[117].mxu1 }
 0x2e2   : > { %v2103_v3 = vpop.f32.mrb[118].mxu1 }
 0x2e3   : > { %v4499_v11 = vpop.f32.mrb[119].mxu1 }
 0x2e6   : > { %v2179_v33 = vpop.f32.mrb[120].mxu1 }
 0x2e7   : > { %v2180_v29 = vadd.f32 %v2179_v33, %v2093_v34  ;;  %v4508_v32 = vpop.f32.mrb[121].mxu1 }
 0x2ea   : > { %v2184_v24 = vpop.f32.mrb[122].mxu1 }
 0x2eb   : > { %v2185_v38 = vadd.f32 %v2184_v24, %v2098_v50  ;;  %v4511_v45 = vpop.f32.mrb[123].mxu1 }
 0x2ee   : > { %v2189_v63 = vpop.f32.mrb[124].mxu1 }
 0x2ef   : > { %v2190_v47 = vadd.f32 %v2189_v63, %v2103_v3  ;;  %v4514_v46 = vpop.f32.mrb[125].mxu1  ;;  %v2858_v3 = vsub.s32 1, %v5957_v42 }
 0x2f0   : > { %v3790_v46 = vld [vmem:[%s6450_s2 + $0x320] sm:$0xff] }
 0x2f1   : > { %v2859_v24 = vrot.slane %v5966_v53, %v2858_v3 }
 0x2f2   : > { %v2269_v25 = vpop.f32.mrb[126].mxu1  ;;  %v2554_v49 = vpop.f32.mrb[156].mxu0 }
 0x2f3   : > { %v2283_v48 = vadd.f32 %v2269_v25, %v2180_v29  ;;  %v4523_v51 = vpop.f32.mrb[127].mxu1  ;;  %v4568_v57 = vpop.f32.mrb[157].mxu0  ;;  %v3791_v25 = vld [vmem:[%s6450_s2 + $0x328] sm:$0xff] }
 0x2f4   : > { %v4775_v51 = vpack.c.bf16 %v3791_v25, %v3790_v46  ;;  %v3185_v46 = vld [vmem:[%s6451_s3 + $0xb0] sm:$0xff]  ;;  %v3186_v25 = vld [vmem:[%s6451_s3 + $0xb8] sm:$0xff] }
 0x2f6   : > { %v2274_v17 = vpop.f32.mrb[128].mxu1  ;;  %v2559_v27 = vpop.f32.mrb[158].mxu0 }
 0x2f7   : > { %v2284_v8 = vadd.f32 %v2274_v17, %v2185_v38  ;;  %v4526_v54 = vpop.f32.mrb[129].mxu1  ;;  %v4571_v31 = vpop.f32.mrb[159].mxu0 }
 0x2f8   : > { %v3793_v54 = vld [vmem:[%s6450_s2 + $0x338] sm:$0xff] }
 0x2fa   : > { %v2279_v56 = vpop.f32.mrb[130].mxu1  ;;  %v2564_v0 = vpop.f32.mrb[160].mxu0 }
 0x2fb   : > { %v2285_v1 = vadd.f32 %v2279_v56, %v2190_v47  ;;  %v4529_v58 = vpop.f32.mrb[131].mxu1  ;;  %v4574_v62 = vpop.f32.mrb[161].mxu0 }
 0x2fe   : > { %v2368_v36 = vpop.f32.mrb[132].mxu1 }
 0x2ff   : > { %v2382_v14 = vadd.f32 %v2368_v36, %v2283_v48  ;;  %v4538_v12 = vpop.f32.mrb[133].mxu1 }
 0x300   : > { %v3794_v12 = vld [vmem:[%s6450_s2 + $0x340] sm:$0xff] }
 0x302   : > { %v2373_v5 = vpop.f32.mrb[134].mxu1  ;;  %v2746_v4 = vpop.f32.mrb[162].mxu0 }
 0x303   : > { %v2383_v43 = vadd.f32 %v2373_v5, %v2284_v8  ;;  %v4541_v2 = vpop.f32.mrb[135].mxu1  ;;  %v4598_v10 = vpop.f32.mrb[163].mxu0  ;;  %v3792_v8 = vld [vmem:[%s6450_s2 + $0x330] sm:$0xff] }
 0x304   : > { %v3272_v2 = vld [vmem:[%s6451_s3 + $0xf8] sm:$0xff]  ;;  %v3273_v10 = vld [vmem:[%s6451_s3 + $0x100] sm:$0xff] }
 0x306   : > { %v2378_v19 = vpop.f32.mrb[136].mxu1  ;;  %v2751_v35 = vpop.f32.mrb[164].mxu0 }
 0x307   : > { %v2384_v55 = vadd.f32 %v2378_v19, %v2285_v1  ;;  %v4544_v7 = vpop.f32.mrb[137].mxu1  ;;  %v4601_v44 = vpop.f32.mrb[165].mxu0 }
 0x308   : > { %v3164_v7 = vld [vmem:[%s6451_s3 + $0x8] sm:$0xff] }
 0x30a   : > { %v2461_v60 = vpop.f32.mrb[138].mxu1  ;;  %v2756_v26 = vpop.f32.mrb[166].mxu0 }
 0x30b   : > { %v2475_v9 = vadd.f32 %v2461_v60, %v2382_v14  ;;  %v4553_v20 = vpop.f32.mrb[139].mxu1  ;;  %v4604_v52 = vpop.f32.mrb[167].mxu0  ;;  %v3165_v60 = vld [vmem:[%s6451_s3 + $0x10] sm:$0xff] }
 0x30c   : > { %v3167_v52 = vld [vmem:[%s6451_s3 + $0x20] sm:$0xff] }
 0x30d   : > { %v2568_v30 = vadd.f32 %v2554_v49, %v2475_v9 }
 0x30e   : > { %v2466_v61 = vpop.f32.mrb[140].mxu1 }
 0x30f   : > { %v2476_v22 = vadd.f32 %v2466_v61, %v2383_v43  ;;  %v4556_v16 = vpop.f32.mrb[141].mxu1  ;;  %v3271_v43 = vld [vmem:[%s6451_s3 + $0xf0] sm:$0xff]  ;;  %v6310_v61 = vld [vmem:[%s405_s27] sm:$0xff] }
 0x310   : > { %v4826_v19 = vpack.c.bf16 %v3272_v2, %v3271_v43  ;;  %v3169_v16 = vld [vmem:[%s6451_s3 + $0x30] sm:$0xff] }
 0x311   : > { %v2569_v13 = vadd.f32 %v2559_v27, %v2476_v22 }
 0x312   : > { %v2471_v15 = vpop.f32.mrb[142].mxu1 }
 0x313   : > { %v2477_v18 = vadd.f32 %v2471_v15, %v2384_v55  ;;  %v4559_v40 = vpop.f32.mrb[143].mxu1  ;;  %v3163_v55 = vld [vmem:[%s6451_s3] sm:$0xff] }
 0x314   : > { %v4781_v44 = vpack.c.bf16 %v3164_v7, %v3163_v55  ;;  %v3172_v40 = vld [vmem:[%s6451_s3 + $0x48] sm:$0xff] }
 0x315   : > { %v2570_v6 = vadd.f32 %v2564_v0, %v2477_v18  ;;  %v4778_v0 = vpack.c.bf16 %v3793_v54, %v3792_v8  ;;  %v3171_v18 = vld [vmem:[%s6451_s3 + $0x40] sm:$0xff] }
 0x316   : > { %v2653_v21 = vpop.f32.mrb[144].mxu1  ;;  %4782 = vmatpush1.bf16.msra.mxu1 %v4781_v44 }
 0x317   : > { %v2667_v59 = vadd.f32 %v2653_v21, %v2568_v30  ;;  %v4583_v28 = vpop.f32.mrb[145].mxu1  ;;  %4783 = vmatprep.subr.bf16.mxu1 %v4904_v37  ;;  %v3168_v30 = vld [vmem:[%s6451_s3 + $0x28] sm:$0xff]  ;;  %v3174_v21 = vld [vmem:[%s6451_s3 + $0x58] sm:$0xff] }
 0x318   : > { %v4787_v22 = vpack.c.bf16 %v3168_v30, %v3167_v52  ;;  %v3175_v28 = vld [vmem:[%s6451_s3 + $0x60] sm:$0xff] }
 0x319   : > { %v2760_v34 = vadd.f32 %v2746_v4, %v2667_v59 }
 0x31a   : > { %v2658_v23 = vpop.f32.mrb[146].mxu1 }
 0x31b   : > { %v2668_v50 = vadd.f32 %v2658_v23, %v2569_v13  ;;  %v4586_v39 = vpop.f32.mrb[147].mxu1  ;;  %v3170_v13 = vld [vmem:[%s6451_s3 + $0x38] sm:$0xff] }
 0x31c   : > { %v4790_v15 = vpack.c.bf16 %v3170_v13, %v3169_v16  ;;  %v3178_v39 = vld [vmem:[%s6451_s3 + $0x78] sm:$0xff] }
 0x31d   : > { %v2761_v11 = vadd.f32 %v2751_v35, %v2668_v50  ;;  %v3274_v35 = vld [vmem:[%s6451_s3 + $0x108] sm:$0xff]  ;;  %v3177_v50 = vld [vmem:[%s6451_s3 + $0x70] sm:$0xff] }
 0x31e   : > { %v2663_v33 = vpop.f32.mrb[148].mxu1  ;;  %v4829_v9 = vpack.c.bf16 %v3274_v35, %v3273_v10  ;;  %v4802_v3 = vpack.c.bf16 %v3178_v39, %v3177_v50 }
 0x31f   : > { %v2669_v29 = vadd.f32 %v2663_v33, %v2570_v6  ;;  %v4589_v32 = vpop.f32.mrb[149].mxu1  ;;  %v4793_v6 = vpack.c.bf16 %v3172_v40, %v3171_v18  ;;  %v3180_v33 = vld [vmem:[%s6451_s3 + $0x88] sm:$0xff] }
 0x320   : > { %v3181_v32 = vld [vmem:[%s6451_s3 + $0x90] sm:$0xff] }
 0x321   : > { %v2762_v38 = vadd.f32 %v2756_v26, %v2669_v29  ;;  %v3166_v26 = vld [vmem:[%s6451_s3 + $0x18] sm:$0xff] }
 0x322   : > { %v2839_v45 = vpop.f32.mrb[150].mxu1  ;;  %v4784_v20 = vpack.c.bf16 %v3166_v26, %v3165_v60 }
 0x323   : > { %v2853_v63 = vadd.f32 %v2839_v45, %v2760_v34  ;;  %v4613_v47 = vpop.f32.mrb[151].mxu1  ;;  %v3176_v34 = vld [vmem:[%s6451_s3 + $0x68] sm:$0xff]  ;;  %v3183_v45 = vld [vmem:[%s6451_s3 + $0xa0] sm:$0xff] }
 0x324   : > { %4785 = vmatpush1.bf16.msra.mxu1 %v4784_v20  ;;  %v4799_v23 = vpack.c.bf16 %v3176_v34, %v3175_v28 }
 0x325   : > { %v2860_v49 = vadd.f32 %v2859_v24, %v2853_v63  ;;  %4786 = vmatprep.subr.bf16.mxu1 %v4904_v37  ;;  %v3184_v63 = vld [vmem:[%s6451_s3 + $0xa8] sm:$0xff] }
 0x326   : > { %v2844_v48 = vpop.f32.mrb[152].mxu1  ;;  %v4811_v47 = vpack.c.bf16 %v3184_v63, %v3183_v45 }
 0x327   : > { %v2863_v57 = vmax.f32 %v2860_v49, 0.0  ;;  %v2854_v17 = vadd.f32 %v2844_v48, %v2761_v11  ;;  %v4616_v27 = vpop.f32.mrb[153].mxu1  ;;  %v3179_v11 = vld [vmem:[%s6451_s3 + $0x80] sm:$0xff]  ;;  %v4814_v49 = vpack.c.bf16 %v3186_v25, %v3185_v46 }
 0x328   : > { %4788 = vmatpush1.bf16.msra.mxu1 %v4787_v22  ;;  %v4805_v29 = vpack.c.bf16 %v3180_v33, %v3179_v11  ;;  %v3187_v48 = vld [vmem:[%s6451_s3 + $0xc0] sm:$0xff]  ;;  %v3190_v27 = vld [vmem:[%s6451_s3 + $0xd8] sm:$0xff]  ;;  %v3195_v11 = vsub.s32 3, %v5957_v42 }
 0x329   : > { %v2861_v31 = vadd.f32 %v2859_v24, %v2854_v17  ;;  %4631 = vmatmul.mubr.msk.f32.vlgmr.msra.gmra.mrb[168].mxu0 %vm2878_vm7, %v2863_v57  ;;  %4653 = vmatmul.mubr.msk.f32.gmra.mrb[158].mxu1 %vm2878_vm7, %v2863_v57  ;;  %v3189_v17 = vld [vmem:[%s6451_s3 + $0xd0] sm:$0xff] }
 0x32a   : > { %v2849_v56 = vpop.f32.mrb[154].mxu1  ;;  %4776 = vmatpush3.bf16.msra.mxu0 %v4775_v51  ;;  %4633 = vmatprep.mubr.msk.f32.mxu0 %vm4906_vm3, %v4907_v41  ;;  %v3188_v51 = vld [vmem:[%s6451_s3 + $0xc8] sm:$0xff]  ;;  %v4820_v8 = vpack.c.bf16 %v3190_v27, %v3189_v17  ;;  %v3196_v33 = vrot.slane %v5966_v53, %v3195_v11  ;;  %v3383_v17 = vld [vmem:[%s6451_s3 + $0x120] sm:$0xff] }
 0x32b   : > { %v2864_v1 = vmax.f32 %v2861_v31, 0.0  ;;  %v2855_v58 = vadd.f32 %v2849_v56, %v2762_v38  ;;  %v4619_v62 = vpop.f32.mrb[155].mxu1  ;;  %4655 = vmatprep.mubr.msk.f32.mxu1 %vm4906_vm3, %v4907_v41  ;;  %4777 = vmatprep.subr.bf16.mxu0 %v4904_v37  ;;  %v4817_v57 = vpack.c.bf16 %v3188_v51, %v3187_v48 }
 0x32c   : > { %4789 = vmatprep.subr.bf16.mxu1 %v4904_v37 }
 0x32d   : > { %v2862_v36 = vadd.f32 %v2859_v24, %v2855_v58  ;;  %4634 = vmatmul.mubr.msk.f32.gmra.mrb[170].mxu0 %vm2878_vm7, %v2864_v1  ;;  %4656 = vmatmul.mubr.msk.f32.gmra.mrb[160].mxu1 %vm2878_vm7, %v2864_v1  ;;  %v3182_v24 = vld [vmem:[%s6451_s3 + $0x98] sm:$0xff] }
 0x32e   : > { %4779 = vmatpush3.bf16.msra.mxu0 %v4778_v0  ;;  %4636 = vmatprep.mubr.msk.f32.mxu0 %vm4906_vm3, %v4907_v41  ;;  %v6264_v5 = vpop.f32.mrb[156].mxu1  ;;  %v4808_v38 = vpack.c.bf16 %v3182_v24, %v3181_v32 }
 0x32f   : > { %v2865_v14 = vmax.f32 %v2862_v36, 0.0  ;;  %4666 = vmatprep.subr.mxu0 %v4907_v41  ;;  %v4651_v4 = vpop.f32.mrb[157].mxu1  ;;  %4791 = vmatpush1.bf16.msra.mxu1 %v4790_v15 }
 0x330   : > { %4792 = vmatprep.subr.bf16.mxu1 %v4904_v37  ;;  %v3142_v4 = vsub.s32 2, %v5957_v42 }
 0x331   : > { %4637 = vmatmul.mubr.msk.f32.gmra.mrb[172].mxu0 %vm2878_vm7, %v2865_v14 }
 0x332   : > { %4667 = vmatpush3.msra.mxu0 %v3794_v12  ;;  %4668 = vmatprep.mubr.msk.f32.mxu0 %vm4906_vm3, %v4907_v41  ;;  %v3143_v35 = vrot.slane %v5966_v53, %v3142_v4 }
 0x333   : > { %4825 = vmatprep.subr.bf16.mxu0 %v4904_v37  ;;  %4794 = vmatpush1.bf16.msra.mxu1 %v4793_v6  ;;  %v3277_v6 = vsub.s32 4, %v5957_v42 }
 0x334   : > { %4795 = vmatprep.subr.bf16.mxu1 %v4904_v37 }
 0x335   : > { %4669 = vmatmul.mubr.msk.f32.vlgmr.msra.gmra.mrb[174].mxu0 %vm2878_vm7, %v2864_v1 }
 0x336   : > { %4671 = vmatprep.mubr.msk.f32.mxu0 %vm4906_vm3, %v4907_v41  ;;  %4827 = vmatpush3.bf16.msra.mxu0 %v4826_v19  ;;  %v3191_v19 = vld [vmem:[%s6451_s3 + $0xe0] sm:$0xff] }
 0x337   : > { %4828 = vmatprep.subr.bf16.mxu0 %v4904_v37 }
 0x339   : > { %4672 = vmatmul.mubr.msk.f32.gmra.mrb[176].mxu0 %vm2878_vm7, %v2865_v14 }
 0x33a   : > { %4674 = vmatprep.mubr.msk.f32.mxu0 %vm4906_vm3, %v4907_v41  ;;  %4830 = vmatpush3.bf16.msra.mxu0 %v4829_v9 }
 0x33b   : > { %4831 = vmatprep.subr.bf16.mxu0 %v4904_v37 }
 0x33d   : > { %4675 = vmatmul.mubr.f32.gmra.mrb[178].mxu0 %v4907_v41 }
 0x33e   : > { %4685 = vmatprep.mubr.msk.f32.mxu0 %vm4906_vm3, %v4907_v41 }
 0x341   : > { %4686 = vmatmul.mubr.msk.f32.vlgmr.msra.gmra.mrb[180].mxu0 %vm3160_vm8, %v6310_v61 }
 0x342   : > { %4696 = vmatprep.mubr.msk.f32.mxu0 %vm4906_vm3, %v4907_v41  ;;  %v3173_v41 = vld [vmem:[%s6451_s3 + $0x50] sm:$0xff] }
 0x343   : > { %v4796_v59 = vpack.c.bf16 %v3174_v21, %v3173_v41  ;;  %v3278_v41 = vrot.slane %v5966_v53, %v3277_v6  ;;  %v3381_v53 = vld [vmem:[%s6451_s3 + $0x110] sm:$0xff] }
 0x345   : > { %4797 = vmatpush1.bf16.msra.mxu1 %v4796_v59 }
 0x346   : > { %4798 = vmatprep.subr.bf16.mxu1 %v4904_v37 }
 0x349   : > { %4800 = vmatpush1.bf16.msra.mxu1 %v4799_v23 }
 0x34a   : > { %4801 = vmatprep.subr.bf16.mxu1 %v4904_v37 }
 0x34d   : > { %4803 = vmatpush1.bf16.msra.mxu1 %v4802_v3 }
 0x34e   : > { %4804 = vmatprep.subr.bf16.mxu1 %v4904_v37 }
 0x351   : > { %4806 = vmatpush1.bf16.msra.mxu1 %v4805_v29 }
 0x352   : > { %4807 = vmatprep.subr.bf16.mxu1 %v4904_v37 }
 0x355   : > { %4809 = vmatpush1.bf16.msra.mxu1 %v4808_v38 }
 0x356   : > { %4810 = vmatprep.subr.bf16.mxu1 %v4904_v37 }
 0x359   : > { %4812 = vmatpush1.bf16.msra.mxu1 %v4811_v47 }
 0x35a   : > { %4813 = vmatprep.subr.bf16.mxu1 %v4904_v37 }
 0x35d   : > { %4815 = vmatpush1.bf16.msra.mxu1 %v4814_v49 }
 0x35e   : > { %4816 = vmatprep.subr.bf16.mxu1 %v4904_v37 }
 0x361   : > { %4818 = vmatpush1.bf16.msra.mxu1 %v4817_v57  ;;  %v3382_v57 = vld [vmem:[%s6451_s3 + $0x118] sm:$0xff] }
 0x362   : > { %4819 = vmatprep.subr.bf16.mxu1 %v4904_v37  ;;  %v4832_v27 = vpack.c.bf16 %v3382_v57, %v3381_v53 }
 0x364   : > { %4833 = vmatpush3.bf16.msra.mxu0 %v4832_v27 }
 0x365   : > { %4821 = vmatpush1.bf16.msra.mxu1 %v4820_v8  ;;  %4834 = vmatprep.subr.bf16.mxu0 %v4904_v37 }
 0x366   : > { %4822 = vmatprep.subr.bf16.mxu1 %v4904_v37  ;;  %v4879_v37 = vld [vmem:[%s6452_s4] sm:$0xff] }
 0x3fc   : > { %v2954_v54 = vpop.f32.mrb[168].mxu0  ;;  %v3042_v31 = vpop.f32.mrb[158].mxu1 }
 0x3fd   : > { %v3038_v56 = vadd.f32 %v6264_v5, %v2954_v54  ;;  %v4632_v0 = vpop.f32.mrb[169].mxu0  ;;  %v4654_v1 = vpop.f32.mrb[159].mxu1  ;;  %v3192_v5 = vld [vmem:[%s6451_s3 + $0xe8] sm:$0xff] }
 0x3fe   : > { %v4823_v55 = vpack.c.bf16 %v3192_v5, %v3191_v19 }
 0x400   : > { %v2959_v58 = vpop.f32.mrb[170].mxu0  ;;  %v3047_v62 = vpop.f32.mrb[160].mxu1  ;;  %4824 = vmatpush1.bf16.msra.mxu1 %v4823_v55 }
 0x401   : > { %v3043_v36 = vadd.f32 %v3042_v31, %v2959_v58  ;;  %v4635_v14 = vpop.f32.mrb[171].mxu0  ;;  %v4657_v12 = vpop.f32.mrb[161].mxu1 }
 0x402   : > { %v3387_v14 = vsub.s32 5, %v5957_v42 }
 0x404   : > { %v2964_v43 = vpop.f32.mrb[172].mxu0  ;;  %v3388_v12 = vrot.slane %v4879_v37, %v3387_v14 }
 0x405   : > { %v3048_v2 = vadd.f32 %v3047_v62, %v2964_v43  ;;  %v4638_v10 = vpop.f32.mrb[173].mxu0 }
 0x408   : > { %v3123_v7 = vpop.f32.mrb[174].mxu0 }
 0x409   : > { %v3137_v44 = vadd.f32 %v3123_v7, %v3038_v56  ;;  %v4670_v60 = vpop.f32.mrb[175].mxu0 }
 0x40b   : > { %v3144_v26 = vadd.f32 %v3143_v35, %v3137_v44 }
 0x40c   : > { %v3128_v9 = vpop.f32.mrb[176].mxu0 }
 0x40d   : > { %v3138_v20 = vadd.f32 %v3128_v9, %v3043_v36  ;;  %v4673_v52 = vpop.f32.mrb[177].mxu0  ;;  %v3147_v23 = vmax.f32 %v3144_v26, 0.0 }
 0x40f   : > { %v3145_v30 = vadd.f32 %v3143_v35, %v3138_v20 }
 0x410   : > { %v3133_v22 = vpop.f32.mrb[178].mxu0 }
 0x411   : > { %v3139_v16 = vadd.f32 %v3133_v22, %v3048_v2  ;;  %v4676_v13 = vpop.f32.mrb[179].mxu0  ;;  %v3148_v15 = vmax.f32 %v3145_v30, 0.0 }
 0x413   : > { %v3146_v18 = vadd.f32 %v3143_v35, %v3139_v16  ;;  %3151 = vrot.lane.b32.xlu0 %v3148_v15, %s4908_s30 }
 0x414   : > { %v3348_v21 = vpop.f32.mrb[180].mxu0 }
 0x415   : > { %v3149_v40 = vmax.f32 %v3146_v18, 0.0  ;;  %v3349_v59 = vadd.f32 %v3348_v21, %v3278_v41  ;;  %v4687_v28 = vpop.f32.mrb[181].mxu0 }
 0x417   : > { %3155 = vrot.lane.b32.xlu0 %v3149_v40, %s4909_s6  ;;  %3360 = vrot.lane.b32.xlu1 %v3349_v59, %s4910_s7 }
 0x485   : > { %v3152_v34 = vpop.permute.xlu0 %3151 }
 0x486   : > { %v3159_v3 = vsel %vm3158_vm9, %v3147_v23, %v3152_v34 }
 0x489   : > { %v3156_v50 = vpop.permute.xlu0 %3155  ;;  %v3361_v46 = vpop.permute.xlu1 %3360 }
 0x48a   : > { %v3161_v39 = vsel %vm3160_vm8, %v3152_v34, %v3156_v50 }
 0x48b   : > { %3797 = vmatprep.mubr.msk.f32.mxu1 %vm3197_vm10, %v3161_v39 }
 0x48c   : > { %3266 = vmatmul.mubr.f32.vlgmr.msra.gmra.mrb[162].mxu1 %v3159_v3 }
 0x55f   : > { %v3267_v29 = vpop.f32.mrb[162].mxu1 }
 0x560   : > { %v3268_v32 = vadd.f32 %v3267_v29, %v3196_v33  ;;  %v3269_v24 = vpop.f32.mrb[163].mxu1 }
 0x562   : > { %v3352_v38 = vadd.f32 %v3349_v59, %v3268_v32 }
 0x564   : > { %v3799_v45 = vmul.f32 -1.442695, %v3352_v38 }
 0x566   : > { %4873 = vpow2.f32 %v3799_v45 }
 0x570   : > { %v4874_v63 = vpop.eup %4873 }
 0x571   : > { %v3356_v47 = vadd.f32 1.0, %v4874_v63 }
 0x573   : > { %4875 = vrcp.f32 %v3356_v47 }
 0x57d   : > { %v4876_v25 = vpop.eup %4875 }
 0x57e   : > { %v3363_v49 = vmul.f32 %v4876_v25, %v3361_v46  ;;  %v3370_v56 = vsub.f32 1.0, %v4876_v25 }
 0x580   : > { %3365 = vrot.lane.b32.xlu1 %v3363_v49, %s4910_s7 }
 0x584   : > { %3376 = vrot.lane.b32.xlu1 %v6310_v61, %s4909_s6  ;;  %v3384_v61 = vld [vmem:[%s6451_s3 + $0x128] sm:$0xff] }
 0x585   : > { %v4835_v8 = vpack.c.bf16 %v3384_v61, %v3383_v17 }
 0x587   : > { %4836 = vmatpush3.bf16.msra.mxu0 %v4835_v8 }
 0x5f2   : > { %v3366_v48 = vpop.permute.xlu1 %3365 }
 0x5f3   : > { %v3368_v51 = vadd.f32 %v3366_v48, %v3268_v32 }
 0x5f5   : > { %4877 = vtanh.f32 %v3368_v51 }
 0x5f6   : > { %v3377_v31 = vpop.permute.xlu1 %3376 }
 0x5f7   : > { %v3379_v1 = vmul.f32 %v4876_v25, %v3377_v31 }
 0x5ff   : > { %v4878_v54 = vpop.eup %4877 }
 0x600   : > { %3372 = vrot.lane.b32.xlu0 %v4878_v54, %s4911_s15 }
 0x672   : > { %v3373_v0 = vpop.permute.xlu0 %3372 }
 0x673   : > { %v3375_v58 = vmul.f32 %v3373_v0, %v3370_v56 }
 0x675   : > { %v3380_v62 = vadd.f32 %v3379_v1, %v3375_v58 }
 0x677   : > { %3390 = vrot.lane.b32.xlu0 %v3380_v62, %s4911_s15 }
 0x6e9   : > { %v3391_v36 = vpop.permute.xlu0 %3390 }
 0x6ea   : > { %4697 = vmatmul.mubr.msk.f32.vlgmr.msra.gmra.mrb[182].mxu0 %vm3160_vm8, %v3391_v36 }
 0x7bd   : > { %v3460_v4 = vpop.f32.mrb[182].mxu0 }
 0x7be   : > { %v3461_v43 = vadd.f32 %v3460_v4, %v3388_v12  ;;  %v4698_v2 = vpop.f32.mrb[183].mxu0 }
 0x7c0   : > { %3466 = vrot.lane.b32.xlu1 %v3461_v43, %s4909_s6 }
 0x832   : > { %v3467_v10 = vpop.permute.xlu1 %3466 }
 0x833   : > { %v3469_v19 = vsel %vm3160_vm8, %v3391_v36, %v3467_v10 }
 0x834   : > { %v3471_v42 = vsel %vm3470_vm11, %v3469_v19, 0.0 }
 0x835   : > { %3472 = vst [vmem:[%s409_s24] sm:$0xff] %v3471_v42 }
 0x836 PF: > { %p12_p9 = scmp.ge.s32.totalorder %s4959_s22, 4   ;;  %s6456_s18 = smov %s4898_s19 }
 0x837   : > { %s6457_s19 = smov %s4968_s25  ;;  %s6458_s20 = smov %s4959_s22 }
 0x838   :  { %14 = sbr.rel (!%p12_p9) target bundleno = 2 (0x2), region = 136 }

</bundles_post_ra>
